<compile_context>
chip_gen: v5e
topology: v5e:2x2
jax: 0.10.0
libtpu: 0.0.40
codegen_flags: <defaults>
</compile_context>

<pallas_src>
import functools
import math

import jax
import jax.numpy as jnp
from jax import lax
from jax.experimental import pallas as pl
from jax.experimental.pallas import tpu as pltpu

# ---- scaled-down config (bert-base-uncased would be D=768, 12 layers, vocab 30522) ----
VOCAB = 64
MAX_POS = 128      # position-embedding table sized >= max sequence length
D = 128            # hidden size          (bert-base: 768)
H = 8              # attention heads      (nhead=8 in the module)
DH = D // H
FF_BERT = 4 * D    # bert intermediate    (bert-base: 3072)
FF_ENC = 256       # dim_feedforward      (module: 2048)
BERT_LAYERS = 2    # TODO(synk): bert-base-uncased has 12 encoder layers; scaled down for this synthetic kernel.
ENC_LAYERS = 6     # nn.TransformerEncoder(num_layers=6)
L_TOTAL = BERT_LAYERS + ENC_LAYERS
NUM_LABELS = 4
FC_PAD = 128       # lane-dense fc output; sliced to NUM_LABELS outside the kernel
BERT_EPS = 1e-12
ENC_EPS = 1e-5
ATTN_SCALE = 1.0 / math.sqrt(DH)
INV_SQRT2 = 1.0 / math.sqrt(2.0)

# Row layout of the coalesced per-layer vector table [L, NUM_VEC_ROWS, D]:
VEC_QB, VEC_KB, VEC_VB, VEC_BO, VEC_LN1G, VEC_LN1B, VEC_B2, VEC_LN2G, VEC_LN2B = range(9)
NUM_VEC_ROWS = 9


# ------------------------------ fused stack kernel ------------------------------

def _layernorm(x, g, b, eps):
    mean = jnp.mean(x, axis=-1, keepdims=True)
    var = jnp.mean(jnp.square(x - mean), axis=-1, keepdims=True)
    return (x - mean) * lax.rsqrt(var + eps) * g + b


def _stack_kernel(flags_ref,                       # SMEM [L] int32 (scalar prefetch): 1=BERT, 0=encoder
                  emb_ref, embg_ref, embb_ref,     # [BS,D] f32, [1,D], [1,D]
                  bias_ref,                        # [2, BS*H, BS] f32 additive score bias (0=enc, 1=bert)
                  hmask_ref,                       # [H, D] f32 head lane masks (constant)
                  wqkv_ref, wo_ref,                # [1,D,3D] bf16, [1,D,D] bf16 (per-layer blocks)
                  vecs_ref,                        # [1,NUM_VEC_ROWS,D] f32 coalesced biases / LN params
                  w1b_ref, b1b_ref, w2b_ref,       # BERT FFN blocks  (FF=FF_BERT)
                  w1e_ref, b1e_ref, w2e_ref,       # encoder FFN blocks (FF=FF_ENC)
                  fcw_ref, fcb_ref,                # [D,FC_PAD] bf16, [1,FC_PAD] f32
                  o_ref,                           # [B,FC_PAD] f32 (output)
                  x_scr,                           # VMEM scratch [BS,D] f32 (resident activation)
                  *, batch, seq):
    l = pl.program_id(0)
    is_bert = flags_ref[l]
    bs = batch * seq

    # ---- layer 0: embedding LayerNorm into the resident activation scratch ----
    @pl.when(l == 0)
    def _():
        x_scr[...] = _layernorm(emb_ref[...], embg_ref[...], embb_ref[...], BERT_EPS)

    x = x_scr[...]                                 # [BS, D] f32, never leaves VMEM
    x_bf = x.astype(jnp.bfloat16)

    vec = vecs_ref[0]                              # [NUM_VEC_ROWS, D]
    hmask = hmask_ref[...]                         # [H, D]

    # ---- fused QKV projection: one [BS,D] x [D,3D] bf16 matmul, f32 accumulate ----
    qkv = jnp.dot(x_bf, wqkv_ref[0], preferred_element_type=jnp.float32)   # [BS, 3D]
    q = (qkv[:, :D] + vec[VEC_QB:VEC_QB + 1, :]) * ATTN_SCALE
    k = qkv[:, D:2 * D] + vec[VEC_KB:VEC_KB + 1, :]
    v = qkv[:, 2 * D:] + vec[VEC_VB:VEC_VB + 1, :]

    # ---- multi-head attention as two large matmuls ----
    # q_big rows are (head, token) pairs with non-head lanes zeroed, so the full-D
    # contraction against all keys yields per-head scores; softmax is then a plain
    # per-row softmax over the bs key columns (cross-batch keys and, on BERT layers,
    # padded keys are suppressed by the precomputed additive bias).
    q_big = jnp.concatenate([q * hmask[h:h + 1, :] for h in range(H)], axis=0)    # [H*BS, D]
    s = lax.dot_general(q_big.astype(jnp.bfloat16), k.astype(jnp.bfloat16),
                        (((1,), (1,)), ((), ())),
                        preferred_element_type=jnp.float32)                       # [H*BS, BS]
    s = s + bias_ref[is_bert]
    m = jnp.max(s, axis=-1, keepdims=True)
    p = jnp.exp(s - m)
    p = p * pl.reciprocal(jnp.sum(p, axis=-1, keepdims=True), approx=True)
    ctx_big = jnp.dot(p.astype(jnp.bfloat16), v.astype(jnp.bfloat16),
                      preferred_element_type=jnp.float32)                         # [H*BS, D]
    # Gather per-head context lanes back into a single [BS, D] tensor.
    ctx = ctx_big[0:bs, :] * hmask[0:1, :]
    for h in range(1, H):
        ctx = ctx + ctx_big[h * bs:(h + 1) * bs, :] * hmask[h:h + 1, :]

    attn = jnp.dot(ctx.astype(jnp.bfloat16), wo_ref[0],
                   preferred_element_type=jnp.float32) + vec[VEC_BO:VEC_BO + 1, :]
    eps1 = jnp.where(is_bert == 1, BERT_EPS, ENC_EPS)
    y = _layernorm(x + attn, vec[VEC_LN1G:VEC_LN1G + 1, :],
                   vec[VEC_LN1B:VEC_LN1B + 1, :], eps1)
    y_bf = y.astype(jnp.bfloat16)

    ln2_g = vec[VEC_LN2G:VEC_LN2G + 1, :]
    ln2_b = vec[VEC_LN2B:VEC_LN2B + 1, :]
    b2 = vec[VEC_B2:VEC_B2 + 1, :]

    # ---- FFN, branched on the layer type: erf-gelu only on BERT layers, relu only
    #      on encoder layers; each branch uses its natively-shaped (unpadded) weights.
    @pl.when(is_bert == 1)
    def _():
        h1 = jnp.dot(y_bf, w1b_ref[0], preferred_element_type=jnp.float32) + b1b_ref[0]
        g = 0.5 * h1 * (1.0 + lax.erf(h1 * INV_SQRT2))          # exact erf-gelu (BERT)
        h2 = jnp.dot(g.astype(jnp.bfloat16), w2b_ref[0],
                     preferred_element_type=jnp.float32) + b2
        x_scr[...] = _layernorm(y + h2, ln2_g, ln2_b, BERT_EPS)

    @pl.when(is_bert == 0)
    def _():
        h1 = jnp.dot(y_bf, w1e_ref[0], preferred_element_type=jnp.float32) + b1e_ref[0]
        g = jnp.maximum(h1, 0.0)                                 # relu (encoder layers)
        h2 = jnp.dot(g.astype(jnp.bfloat16), w2e_ref[0],
                     preferred_element_type=jnp.float32) + b2
        x_scr[...] = _layernorm(y + h2, ln2_g, ln2_b, ENC_EPS)

    # ---- last layer: max over sequence + fc, lane-padded unmasked store ----
    @pl.when(l == pl.num_programs(0) - 1)
    def _():
        xf = x_scr[...]
        # torch.max(dim=0) in the reference pools over ALL positions (no padding mask),
        # so no mask is applied here either.
        pooled = jnp.concatenate(
            [jnp.max(xf[b * seq:(b + 1) * seq, :], axis=0, keepdims=True)
             for b in range(batch)], axis=0)                                      # [B, D]
        o_ref[...] = jnp.dot(pooled.astype(jnp.bfloat16), fcw_ref[...],
                             preferred_element_type=jnp.float32) + fcb_ref[...]


# ------------------------------ pallas_call wrapper ------------------------------

def _fused_stack(params, emb_flat, bias_tab, head_mask, batch, seq):
    bs = batch * seq

    def cspec(shape):                  # layer-invariant: whole array, resident across the grid
        n = len(shape)
        return pl.BlockSpec(shape, lambda l, flags, n=n: (0,) * n)

    def lspec(shape):                  # per-layer block of a [L, ...] stacked array
        n = len(shape)
        return pl.BlockSpec((1,) + shape, lambda l, flags, n=n: (l,) + (0,) * n)

    def bert_spec(shape):              # per-layer block of the BERT FFN stack (clamped index)
        n = len(shape)
        return pl.BlockSpec((1,) + shape,
                            lambda l, flags, n=n: (jnp.minimum(l, BERT_LAYERS - 1),) + (0,) * n)

    def enc_spec(shape):               # per-layer block of the encoder FFN stack (clamped index)
        n = len(shape)
        return pl.BlockSpec((1,) + shape,
                            lambda l, flags, n=n: (jnp.maximum(l - BERT_LAYERS, 0),) + (0,) * n)

    grid_spec = pltpu.PrefetchScalarGridSpec(
        num_scalar_prefetch=1,                         # layer_is_bert flags -> SMEM
        grid=(L_TOTAL,),
        in_specs=[
            cspec((bs, D)),                            # embeddings (post-lookup)
            cspec((1, D)), cspec((1, D)),              # embedding LN gamma / beta
            cspec((2, bs * H, bs)),                    # additive score-bias table [enc, bert]
            cspec((H, D)),                             # head lane masks
            lspec((D, 3 * D)),                         # fused QKV weight
            lspec((D, D)),                             # attention output projection
            lspec((NUM_VEC_ROWS, D)),                  # coalesced per-layer biases / LN params
            bert_spec((D, FF_BERT)), bert_spec((1, FF_BERT)), bert_spec((FF_BERT, D)),
            enc_spec((D, FF_ENC)),   enc_spec((1, FF_ENC)),   enc_spec((FF_ENC, D)),
            cspec((D, FC_PAD)), cspec((1, FC_PAD)),    # fc weight / bias (lane-padded)
        ],
        out_specs=pl.BlockSpec((batch, FC_PAD), lambda l, flags: (0, 0)),
        scratch_shapes=[pltpu.VMEM((bs, D), jnp.float32)],
    )
    return pl.pallas_call(
        functools.partial(_stack_kernel, batch=batch, seq=seq),
        out_shape=jax.ShapeDtypeStruct((batch, FC_PAD), jnp.float32),
        grid_spec=grid_spec,
        compiler_params=pltpu.CompilerParams(
            # Layer axis is a sequential dependency chain -> "arbitrary".
            # TODO(synk): at bert-base scale, add a parallel batch-tile axis / core_map
            # for the 2 TensorCores on v7x and tile w1/w2 along FF to respect 64 MiB VMEM.
            dimension_semantics=("arbitrary",)),
    )(params["layer_is_bert"], emb_flat, params["emb_ln_g"], params["emb_ln_b"],
      bias_tab, head_mask,
      params["wqkv"], params["wo"], params["vecs"],
      params["w1_bert"], params["b1_bert"], params["w2_bert"],
      params["w1_enc"], params["b1_enc"], params["w2_enc"],
      params["fc_w"], params["fc_b"])


@jax.jit
def model3_forward(params, input_ids, attention_mask):
    batch, seq = input_ids.shape
    bs = batch * seq

    # Embedding gather (word + position + token-type) in plain JAX; LN is fused in-kernel.
    pos_ids = jnp.arange(seq, dtype=jnp.int32)
    emb = (params["word_emb"][input_ids]
           + params["pos_emb"][pos_ids][None, :, :]
           + params["type_emb"][0][None, None, :])
    emb_flat = emb.reshape(bs, D)

    # Additive score-bias table indexed by the per-layer flag:
    #   [0] encoder layers: block-diagonal mask only (nn.TransformerEncoder has no key-padding mask)
    #   [1] BERT layers   : block-diagonal + key-padding mask from attention_mask
    # q_big rows are ordered (head, batch*seq + pos); key columns are (batch*seq + pos).
    rows = jnp.arange(bs * H)
    cols = jnp.arange(bs)
    row_batch = (rows % bs) // seq
    col_batch = cols // seq
    same_batch = row_batch[:, None] == col_batch[None, :]
    key_valid = attention_mask.reshape(-1) > 0
    neg = jnp.float32(-1e9)
    bias_enc = jnp.where(same_batch, 0.0, neg)
    bias_bert = jnp.where(same_batch & key_valid[None, :], 0.0, neg)
    bias_tab = jnp.stack([bias_enc, bias_bert]).astype(jnp.float32)   # [2, bs*H, bs]

    # Constant per-head lane masks (avoid re-materializing iota/compare each grid step).
    head_mask = (jnp.arange(D)[None, :] // DH == jnp.arange(H)[:, None]).astype(jnp.float32)

    logits_pad = _fused_stack(params, emb_flat, bias_tab, head_mask, batch, seq)  # [B, FC_PAD]
    return logits_pad[:, :NUM_LABELS]


# ------------------------------ parameter init ------------------------------

def init_params(key):
    kw, kp, kt, kq, ko, kb1, kb2, ke1, ke2, kf = jax.random.split(key, 10)

    def nrm(k, shape):
        return jax.random.normal(k, shape, jnp.float32) * 0.02

    # Coalesced per-layer vectors: qkv biases, out-proj bias, LN1, FFN b2, LN2.
    vecs = jnp.zeros((L_TOTAL, NUM_VEC_ROWS, D), jnp.float32)
    vecs = vecs.at[:, VEC_LN1G, :].set(1.0).at[:, VEC_LN2G, :].set(1.0)

    fc_core = nrm(kf, (D, NUM_LABELS))
    fc_w = jnp.zeros((D, FC_PAD), jnp.float32).at[:, :NUM_LABELS].set(fc_core)

    return dict(
        word_emb=nrm(kw, (VOCAB, D)),
        pos_emb=nrm(kp, (MAX_POS, D)),
        type_emb=nrm(kt, (2, D)),
        emb_ln_g=jnp.ones((1, D), jnp.float32),
        emb_ln_b=jnp.zeros((1, D), jnp.float32),
        layer_is_bert=jnp.array([1] * BERT_LAYERS + [0] * ENC_LAYERS, jnp.int32),
        wqkv=nrm(kq, (L_TOTAL, D, 3 * D)).astype(jnp.bfloat16),
        wo=nrm(ko, (L_TOTAL, D, D)).astype(jnp.bfloat16),
        vecs=vecs,
        w1_bert=nrm(kb1, (BERT_LAYERS, D, FF_BERT)).astype(jnp.bfloat16),
        b1_bert=jnp.zeros((BERT_LAYERS, 1, FF_BERT), jnp.float32),
        w2_bert=nrm(kb2, (BERT_LAYERS, FF_BERT, D)).astype(jnp.bfloat16),
        w1_enc=nrm(ke1, (ENC_LAYERS, D, FF_ENC)).astype(jnp.bfloat16),
        b1_enc=jnp.zeros((ENC_LAYERS, 1, FF_ENC), jnp.float32),
        w2_enc=nrm(ke2, (ENC_LAYERS, FF_ENC, D)).astype(jnp.bfloat16),
        fc_w=fc_w.astype(jnp.bfloat16),
        fc_b=jnp.zeros((1, FC_PAD), jnp.float32),
    )


if __name__ == "__main__":
    key = jax.random.PRNGKey(0)
    pkey, ikey = jax.random.split(key)
    params = init_params(pkey)

    B, S = 2, 8
    input_ids = jax.random.randint(ikey, (B, S), 0, VOCAB, dtype=jnp.int32)
    attention_mask = jnp.ones((B, S), jnp.int32).at[1, 6:].set(0)

    logits = model3_forward(params, input_ids, attention_mask)
    logits = jax.block_until_ready(logits)
    assert logits.shape == (B, NUM_LABELS)
    assert bool(jnp.all(jnp.isfinite(logits)))
    print("KERNEL_OK")
</pallas_src>

<mosaic_0001>
module attributes {stable_mosaic.version = 11 : i64} {
  func.func @_stack_kernel(%arg0: i32, %arg1: memref<8xi32, #tpu.memory_space<smem>>, %arg2: memref<16x128xf32, #tpu.memory_space<vmem>>, %arg3: memref<1x128xf32, #tpu.memory_space<vmem>>, %arg4: memref<1x128xf32, #tpu.memory_space<vmem>>, %arg5: memref<2x128x16xf32, #tpu.memory_space<vmem>>, %arg6: memref<8x128xf32, #tpu.memory_space<vmem>>, %arg7: memref<1x128x384xbf16, #tpu.memory_space<vmem>>, %arg8: memref<1x128x128xbf16, #tpu.memory_space<vmem>>, %arg9: memref<1x9x128xf32, #tpu.memory_space<vmem>>, %arg10: memref<1x128x512xbf16, #tpu.memory_space<vmem>>, %arg11: memref<1x1x512xf32, #tpu.memory_space<vmem>>, %arg12: memref<1x512x128xbf16, #tpu.memory_space<vmem>>, %arg13: memref<1x128x256xbf16, #tpu.memory_space<vmem>>, %arg14: memref<1x1x256xf32, #tpu.memory_space<vmem>>, %arg15: memref<1x256x128xbf16, #tpu.memory_space<vmem>>, %arg16: memref<128x128xbf16, #tpu.memory_space<vmem>>, %arg17: memref<1x128xf32, #tpu.memory_space<vmem>>, %arg18: memref<2x128xf32, #tpu.memory_space<vmem>>, %arg19: memref<16x128xf32, #tpu.memory_space<vmem>>) attributes {dimension_semantics = [#tpu.dimension_semantics<arbitrary>], iteration_bounds = array<i64: 8>, scalar_prefetch = 1 : i64, scratch_operands = 1 : i64, tpu.core_type = #tpu.core_type<tc>, window_params = [{pipeline_mode = #tpu.pipeline_mode<synchronous>, transform_indices = @transform_0, window_bounds = array<i64: 16, 128>}, {pipeline_mode = #tpu.pipeline_mode<synchronous>, transform_indices = @transform_1, window_bounds = array<i64: 1, 128>}, {pipeline_mode = #tpu.pipeline_mode<synchronous>, transform_indices = @transform_2, window_bounds = array<i64: 1, 128>}, {pipeline_mode = #tpu.pipeline_mode<synchronous>, transform_indices = @transform_3, window_bounds = array<i64: 2, 128, 16>}, {pipeline_mode = #tpu.pipeline_mode<synchronous>, transform_indices = @transform_4, window_bounds = array<i64: 8, 128>}, {transform_indices = @transform_5, window_bounds = array<i64: 1, 128, 384>}, {transform_indices = @transform_6, window_bounds = array<i64: 1, 128, 128>}, {transform_indices = @transform_7, window_bounds = array<i64: 1, 9, 128>}, {transform_indices = @transform_8, window_bounds = array<i64: 1, 128, 512>}, {transform_indices = @transform_9, window_bounds = array<i64: 1, 1, 512>}, {transform_indices = @transform_10, window_bounds = array<i64: 1, 512, 128>}, {transform_indices = @transform_11, window_bounds = array<i64: 1, 128, 256>}, {transform_indices = @transform_12, window_bounds = array<i64: 1, 1, 256>}, {transform_indices = @transform_13, window_bounds = array<i64: 1, 256, 128>}, {pipeline_mode = #tpu.pipeline_mode<synchronous>, transform_indices = @transform_14, window_bounds = array<i64: 128, 128>}, {pipeline_mode = #tpu.pipeline_mode<synchronous>, transform_indices = @transform_15, window_bounds = array<i64: 1, 128>}, {pipeline_mode = #tpu.pipeline_mode<synchronous>, transform_indices = @transform_16, window_bounds = array<i64: 2, 128>}]} {
    %0 = arith.index_cast %arg0 : i32 to index
    %1 = memref.load %arg1[%0] : memref<8xi32, #tpu.memory_space<smem>>
    %c0_i32 = arith.constant 0 : i32
    %2 = arith.cmpi eq, %arg0, %c0_i32 : i32
    %3 = arith.extui %2 : i1 to i32
    %c0_i32_0 = arith.constant 0 : i32
    %4 = arith.cmpi ne, %3, %c0_i32_0 : i32
    scf.if %4 {
      %c0_32 = arith.constant 0 : index
      %c0_33 = arith.constant 0 : index
      %158 = vector.load %arg2[%c0_32, %c0_33] : memref<16x128xf32, #tpu.memory_space<vmem>>, vector<16x128xf32>
      %c0_34 = arith.constant 0 : index
      %c0_35 = arith.constant 0 : index
      %159 = vector.load %arg3[%c0_34, %c0_35] : memref<1x128xf32, #tpu.memory_space<vmem>>, vector<1x128xf32>
      %c0_36 = arith.constant 0 : index
      %c0_37 = arith.constant 0 : index
      %160 = vector.load %arg4[%c0_36, %c0_37] : memref<1x128xf32, #tpu.memory_space<vmem>>, vector<1x128xf32>
      %cst_38 = arith.constant dense<0.000000e+00> : vector<16xf32>
      %161 = vector.multi_reduction <add>, %158, %cst_38 [1] : vector<16x128xf32> to vector<16xf32>
      %162 = vector.shape_cast %161 : vector<16xf32> to vector<16x1xf32>
      %cst_39 = arith.constant 1.280000e+02 : f32
      %163 = vector.broadcast %cst_39 : f32 to vector<16x1xf32>
      %164 = arith.divf %162, %163 : vector<16x1xf32>
      %165 = vector.broadcast %164 : vector<16x1xf32> to vector<16x128xf32>
      %166 = arith.subf %158, %165 : vector<16x128xf32>
      %167 = arith.mulf %166, %166 : vector<16x128xf32>
      %cst_40 = arith.constant dense<0.000000e+00> : vector<16xf32>
      %168 = vector.multi_reduction <add>, %167, %cst_40 [1] : vector<16x128xf32> to vector<16xf32>
      %169 = vector.shape_cast %168 : vector<16xf32> to vector<16x1xf32>
      %cst_41 = arith.constant 1.280000e+02 : f32
      %170 = vector.broadcast %cst_41 : f32 to vector<16x1xf32>
      %171 = arith.divf %169, %170 : vector<16x1xf32>
      %172 = vector.broadcast %164 : vector<16x1xf32> to vector<16x128xf32>
      %173 = arith.subf %158, %172 : vector<16x128xf32>
      %cst_42 = arith.constant 9.99999996E-13 : f32
      %174 = vector.broadcast %cst_42 : f32 to vector<16x1xf32>
      %175 = arith.addf %171, %174 : vector<16x1xf32>
      %176 = math.rsqrt %175 : vector<16x1xf32>
      %177 = vector.broadcast %176 : vector<16x1xf32> to vector<16x128xf32>
      %178 = arith.mulf %173, %177 : vector<16x128xf32>
      %179 = vector.broadcast %159 : vector<1x128xf32> to vector<16x128xf32>
      %180 = arith.mulf %178, %179 : vector<16x128xf32>
      %181 = vector.broadcast %160 : vector<1x128xf32> to vector<16x128xf32>
      %182 = arith.addf %180, %181 : vector<16x128xf32>
      %c0_43 = arith.constant 0 : index
      %c0_44 = arith.constant 0 : index
      %183 = vector.load %arg19[%c0_43, %c0_44] : memref<16x128xf32, #tpu.memory_space<vmem>>, vector<16x128xf32>
      tpu.vector_store %arg19[%c0_43, %c0_44], %182 {strides = array<i32>} : memref<16x128xf32, #tpu.memory_space<vmem>>, vector<16x128xf32>,
    } else {
    }
    %c0 = arith.constant 0 : index
    %c0_1 = arith.constant 0 : index
    %5 = vector.load %arg19[%c0, %c0_1] : memref<16x128xf32, #tpu.memory_space<vmem>>, vector<16x128xf32>
    %6 = arith.truncf %5 : vector<16x128xf32> to vector<16x128xbf16>
    %c0_2 = arith.constant 0 : index
    %c0_3 = arith.constant 0 : index
    %c0_4 = arith.constant 0 : index
    %7 = vector.load %arg9[%c0_2, %c0_3, %c0_4] : memref<1x9x128xf32, #tpu.memory_space<vmem>>, vector<1x9x128xf32>
    %8 = vector.shape_cast %7 : vector<1x9x128xf32> to vector<9x128xf32>
    %c0_5 = arith.constant 0 : index
    %c0_6 = arith.constant 0 : index
    %9 = vector.load %arg6[%c0_5, %c0_6] : memref<8x128xf32, #tpu.memory_space<vmem>>, vector<8x128xf32>
    %c0_7 = arith.constant 0 : index
    %c0_8 = arith.constant 0 : index
    %c0_9 = arith.constant 0 : index
    %10 = vector.load %arg7[%c0_7, %c0_8, %c0_9] : memref<1x128x384xbf16, #tpu.memory_space<vmem>>, vector<1x128x384xbf16>
    %11 = vector.shape_cast %10 : vector<1x128x384xbf16> to vector<128x384xbf16>
    %cst = arith.constant dense<0.000000e+00> : vector<16x384xf32>
    %12 = tpu.matmul %6, %11, %cst {dimension_numbers = #tpu.dot_dimension_numbers<[1], [0], [0], [1], [0, 0, 1, 1], [], []>} : vector<16x128xbf16>, vector<128x384xbf16>, vector<16x384xf32> -> vector<16x384xf32>
    %13 = vector.extract_strided_slice %12 {offsets = [0, 0], sizes = [16, 128], strides = [1, 1]} : vector<16x384xf32> to vector<16x128xf32>
    %14 = vector.extract_strided_slice %8 {offsets = [0, 0], sizes = [1, 128], strides = [1, 1]} : vector<9x128xf32> to vector<1x128xf32>
    %15 = vector.broadcast %14 : vector<1x128xf32> to vector<16x128xf32>
    %16 = arith.addf %13, %15 : vector<16x128xf32>
    %cst_10 = arith.constant 2.500000e-01 : f32
    %17 = vector.broadcast %cst_10 : f32 to vector<16x128xf32>
    %18 = arith.mulf %16, %17 : vector<16x128xf32>
    %19 = vector.extract_strided_slice %12 {offsets = [0, 128], sizes = [16, 128], strides = [1, 1]} : vector<16x384xf32> to vector<16x128xf32>
    %20 = vector.extract_strided_slice %8 {offsets = [1, 0], sizes = [1, 128], strides = [1, 1]} : vector<9x128xf32> to vector<1x128xf32>
    %21 = vector.broadcast %20 : vector<1x128xf32> to vector<16x128xf32>
    %22 = arith.addf %19, %21 : vector<16x128xf32>
    %23 = vector.extract_strided_slice %12 {offsets = [0, 256], sizes = [16, 128], strides = [1, 1]} : vector<16x384xf32> to vector<16x128xf32>
    %24 = vector.extract_strided_slice %8 {offsets = [2, 0], sizes = [1, 128], strides = [1, 1]} : vector<9x128xf32> to vector<1x128xf32>
    %25 = vector.broadcast %24 : vector<1x128xf32> to vector<16x128xf32>
    %26 = arith.addf %23, %25 : vector<16x128xf32>
    %27 = vector.extract_strided_slice %9 {offsets = [0, 0], sizes = [1, 128], strides = [1, 1]} : vector<8x128xf32> to vector<1x128xf32>
    %28 = vector.broadcast %27 : vector<1x128xf32> to vector<16x128xf32>
    %29 = arith.mulf %18, %28 : vector<16x128xf32>
    %30 = vector.extract_strided_slice %9 {offsets = [1, 0], sizes = [1, 128], strides = [1, 1]} : vector<8x128xf32> to vector<1x128xf32>
    %31 = vector.broadcast %30 : vector<1x128xf32> to vector<16x128xf32>
    %32 = arith.mulf %18, %31 : vector<16x128xf32>
    %33 = vector.extract_strided_slice %9 {offsets = [2, 0], sizes = [1, 128], strides = [1, 1]} : vector<8x128xf32> to vector<1x128xf32>
    %34 = vector.broadcast %33 : vector<1x128xf32> to vector<16x128xf32>
    %35 = arith.mulf %18, %34 : vector<16x128xf32>
    %36 = vector.extract_strided_slice %9 {offsets = [3, 0], sizes = [1, 128], strides = [1, 1]} : vector<8x128xf32> to vector<1x128xf32>
    %37 = vector.broadcast %36 : vector<1x128xf32> to vector<16x128xf32>
    %38 = arith.mulf %18, %37 : vector<16x128xf32>
    %39 = vector.extract_strided_slice %9 {offsets = [4, 0], sizes = [1, 128], strides = [1, 1]} : vector<8x128xf32> to vector<1x128xf32>
    %40 = vector.broadcast %39 : vector<1x128xf32> to vector<16x128xf32>
    %41 = arith.mulf %18, %40 : vector<16x128xf32>
    %42 = vector.extract_strided_slice %9 {offsets = [5, 0], sizes = [1, 128], strides = [1, 1]} : vector<8x128xf32> to vector<1x128xf32>
    %43 = vector.broadcast %42 : vector<1x128xf32> to vector<16x128xf32>
    %44 = arith.mulf %18, %43 : vector<16x128xf32>
    %45 = vector.extract_strided_slice %9 {offsets = [6, 0], sizes = [1, 128], strides = [1, 1]} : vector<8x128xf32> to vector<1x128xf32>
    %46 = vector.broadcast %45 : vector<1x128xf32> to vector<16x128xf32>
    %47 = arith.mulf %18, %46 : vector<16x128xf32>
    %48 = vector.extract_strided_slice %9 {offsets = [7, 0], sizes = [1, 128], strides = [1, 1]} : vector<8x128xf32> to vector<1x128xf32>
    %49 = vector.broadcast %48 : vector<1x128xf32> to vector<16x128xf32>
    %50 = arith.mulf %18, %49 : vector<16x128xf32>
    %51 = tpu.concatenate %29, %32, %35, %38, %41, %44, %47, %50 in 0 : vector<16x128xf32>, vector<16x128xf32>, vector<16x128xf32>, vector<16x128xf32>, vector<16x128xf32>, vector<16x128xf32>, vector<16x128xf32>, vector<16x128xf32> -> vector<128x128xf32>
    %52 = arith.truncf %51 : vector<128x128xf32> to vector<128x128xbf16>
    %53 = arith.truncf %22 : vector<16x128xf32> to vector<16x128xbf16>
    %cst_11 = arith.constant dense<0.000000e+00> : vector<128x16xf32>
    %54 = tpu.matmul %52, %53, %cst_11 {dimension_numbers = #tpu.dot_dimension_numbers<[1], [1], [0], [0], [0, 0, 1, 0], [], []>} : vector<128x128xbf16>, vector<16x128xbf16>, vector<128x16xf32> -> vector<128x16xf32>
    %55 = arith.index_cast %1 : i32 to index
    %c0_12 = arith.constant 0 : index
    %c0_13 = arith.constant 0 : index
    %56 = vector.load %arg5[%55, %c0_12, %c0_13] : memref<2x128x16xf32, #tpu.memory_space<vmem>>, vector<1x128x16xf32>
    %57 = vector.shape_cast %56 : vector<1x128x16xf32> to vector<128x16xf32>
    %58 = arith.addf %54, %57 : vector<128x16xf32>
    %cst_14 = arith.constant dense<0xFF800000> : vector<128xf32>
    %59 = vector.multi_reduction <maximumf>, %58, %cst_14 [1] : vector<128x16xf32> to vector<128xf32>
    %60 = vector.shape_cast %59 : vector<128xf32> to vector<128x1xf32>
    %61 = vector.broadcast %60 : vector<128x1xf32> to vector<128x16xf32>
    %62 = arith.subf %58, %61 : vector<128x16xf32>
    %63 = math.exp %62 : vector<128x16xf32>
    %cst_15 = arith.constant dense<0.000000e+00> : vector<128xf32>
    %64 = vector.multi_reduction <add>, %63, %cst_15 [1] : vector<128x16xf32> to vector<128xf32>
    %65 = vector.shape_cast %64 : vector<128xf32> to vector<128x1xf32>
    %66 = tpu.reciprocal %65 {approx = true} : vector<128x1xf32> -> vector<128x1xf32>
    %67 = vector.broadcast %66 : vector<128x1xf32> to vector<128x16xf32>
    %68 = arith.mulf %63, %67 : vector<128x16xf32>
    %69 = arith.truncf %68 : vector<128x16xf32> to vector<128x16xbf16>
    %70 = arith.truncf %26 : vector<16x128xf32> to vector<16x128xbf16>
    %cst_16 = arith.constant dense<0.000000e+00> : vector<128x128xf32>
    %71 = tpu.matmul %69, %70, %cst_16 {dimension_numbers = #tpu.dot_dimension_numbers<[1], [0], [0], [1], [0, 0, 1, 1], [], []>} : vector<128x16xbf16>, vector<16x128xbf16>, vector<128x128xf32> -> vector<128x128xf32>
    %72 = vector.extract_strided_slice %71 {offsets = [0, 0], sizes = [16, 128], strides = [1, 1]} : vector<128x128xf32> to vector<16x128xf32>
    %73 = vector.extract_strided_slice %9 {offsets = [0, 0], sizes = [1, 128], strides = [1, 1]} : vector<8x128xf32> to vector<1x128xf32>
    %74 = vector.broadcast %73 : vector<1x128xf32> to vector<16x128xf32>
    %75 = arith.mulf %72, %74 : vector<16x128xf32>
    %76 = vector.extract_strided_slice %71 {offsets = [16, 0], sizes = [16, 128], strides = [1, 1]} : vector<128x128xf32> to vector<16x128xf32>
    %77 = vector.extract_strided_slice %9 {offsets = [1, 0], sizes = [1, 128], strides = [1, 1]} : vector<8x128xf32> to vector<1x128xf32>
    %78 = vector.broadcast %77 : vector<1x128xf32> to vector<16x128xf32>
    %79 = arith.mulf %76, %78 : vector<16x128xf32>
    %80 = arith.addf %75, %79 : vector<16x128xf32>
    %81 = vector.extract_strided_slice %71 {offsets = [32, 0], sizes = [16, 128], strides = [1, 1]} : vector<128x128xf32> to vector<16x128xf32>
    %82 = vector.extract_strided_slice %9 {offsets = [2, 0], sizes = [1, 128], strides = [1, 1]} : vector<8x128xf32> to vector<1x128xf32>
    %83 = vector.broadcast %82 : vector<1x128xf32> to vector<16x128xf32>
    %84 = arith.mulf %81, %83 : vector<16x128xf32>
    %85 = arith.addf %80, %84 : vector<16x128xf32>
    %86 = vector.extract_strided_slice %71 {offsets = [48, 0], sizes = [16, 128], strides = [1, 1]} : vector<128x128xf32> to vector<16x128xf32>
    %87 = vector.extract_strided_slice %9 {offsets = [3, 0], sizes = [1, 128], strides = [1, 1]} : vector<8x128xf32> to vector<1x128xf32>
    %88 = vector.broadcast %87 : vector<1x128xf32> to vector<16x128xf32>
    %89 = arith.mulf %86, %88 : vector<16x128xf32>
    %90 = arith.addf %85, %89 : vector<16x128xf32>
    %91 = vector.extract_strided_slice %71 {offsets = [64, 0], sizes = [16, 128], strides = [1, 1]} : vector<128x128xf32> to vector<16x128xf32>
    %92 = vector.extract_strided_slice %9 {offsets = [4, 0], sizes = [1, 128], strides = [1, 1]} : vector<8x128xf32> to vector<1x128xf32>
    %93 = vector.broadcast %92 : vector<1x128xf32> to vector<16x128xf32>
    %94 = arith.mulf %91, %93 : vector<16x128xf32>
    %95 = arith.addf %90, %94 : vector<16x128xf32>
    %96 = vector.extract_strided_slice %71 {offsets = [80, 0], sizes = [16, 128], strides = [1, 1]} : vector<128x128xf32> to vector<16x128xf32>
    %97 = vector.extract_strided_slice %9 {offsets = [5, 0], sizes = [1, 128], strides = [1, 1]} : vector<8x128xf32> to vector<1x128xf32>
    %98 = vector.broadcast %97 : vector<1x128xf32> to vector<16x128xf32>
    %99 = arith.mulf %96, %98 : vector<16x128xf32>
    %100 = arith.addf %95, %99 : vector<16x128xf32>
    %101 = vector.extract_strided_slice %71 {offsets = [96, 0], sizes = [16, 128], strides = [1, 1]} : vector<128x128xf32> to vector<16x128xf32>
    %102 = vector.extract_strided_slice %9 {offsets = [6, 0], sizes = [1, 128], strides = [1, 1]} : vector<8x128xf32> to vector<1x128xf32>
    %103 = vector.broadcast %102 : vector<1x128xf32> to vector<16x128xf32>
    %104 = arith.mulf %101, %103 : vector<16x128xf32>
    %105 = arith.addf %100, %104 : vector<16x128xf32>
    %106 = vector.extract_strided_slice %71 {offsets = [112, 0], sizes = [16, 128], strides = [1, 1]} : vector<128x128xf32> to vector<16x128xf32>
    %107 = vector.extract_strided_slice %9 {offsets = [7, 0], sizes = [1, 128], strides = [1, 1]} : vector<8x128xf32> to vector<1x128xf32>
    %108 = vector.broadcast %107 : vector<1x128xf32> to vector<16x128xf32>
    %109 = arith.mulf %106, %108 : vector<16x128xf32>
    %110 = arith.addf %105, %109 : vector<16x128xf32>
    %111 = arith.truncf %110 : vector<16x128xf32> to vector<16x128xbf16>
    %c0_17 = arith.constant 0 : index
    %c0_18 = arith.constant 0 : index
    %c0_19 = arith.constant 0 : index
    %112 = vector.load %arg8[%c0_17, %c0_18, %c0_19] : memref<1x128x128xbf16, #tpu.memory_space<vmem>>, vector<1x128x128xbf16>
    %113 = vector.shape_cast %112 : vector<1x128x128xbf16> to vector<128x128xbf16>
    %cst_20 = arith.constant dense<0.000000e+00> : vector<16x128xf32>
    %114 = tpu.matmul %111, %113, %cst_20 {dimension_numbers = #tpu.dot_dimension_numbers<[1], [0], [0], [1], [0, 0, 1, 1], [], []>} : vector<16x128xbf16>, vector<128x128xbf16>, vector<16x128xf32> -> vector<16x128xf32>
    %115 = vector.extract_strided_slice %8 {offsets = [3, 0], sizes = [1, 128], strides = [1, 1]} : vector<9x128xf32> to vector<1x128xf32>
    %116 = vector.broadcast %115 : vector<1x128xf32> to vector<16x128xf32>
    %117 = arith.addf %114, %116 : vector<16x128xf32>
    %c1_i32 = arith.constant 1 : i32
    %118 = arith.cmpi eq, %1, %c1_i32 : i32
    %cst_21 = arith.constant 9.99999996E-13 : f32
    %cst_22 = arith.constant 9.99999974E-6 : f32
    %119 = arith.select %118, %cst_21, %cst_22 : f32
    %120 = arith.addf %5, %117 : vector<16x128xf32>
    %121 = vector.extract_strided_slice %8 {offsets = [4, 0], sizes = [1, 128], strides = [1, 1]} : vector<9x128xf32> to vector<1x128xf32>
    %122 = vector.extract_strided_slice %8 {offsets = [5, 0], sizes = [1, 128], strides = [1, 1]} : vector<9x128xf32> to vector<1x128xf32>
    %cst_23 = arith.constant dense<0.000000e+00> : vector<16xf32>
    %123 = vector.multi_reduction <add>, %120, %cst_23 [1] : vector<16x128xf32> to vector<16xf32>
    %124 = vector.shape_cast %123 : vector<16xf32> to vector<16x1xf32>
    %cst_24 = arith.constant 1.280000e+02 : f32
    %125 = vector.broadcast %cst_24 : f32 to vector<16x1xf32>
    %126 = arith.divf %124, %125 : vector<16x1xf32>
    %127 = vector.broadcast %126 : vector<16x1xf32> to vector<16x128xf32>
    %128 = arith.subf %120, %127 : vector<16x128xf32>
    %129 = arith.mulf %128, %128 : vector<16x128xf32>
    %cst_25 = arith.constant dense<0.000000e+00> : vector<16xf32>
    %130 = vector.multi_reduction <add>, %129, %cst_25 [1] : vector<16x128xf32> to vector<16xf32>
    %131 = vector.shape_cast %130 : vector<16xf32> to vector<16x1xf32>
    %cst_26 = arith.constant 1.280000e+02 : f32
    %132 = vector.broadcast %cst_26 : f32 to vector<16x1xf32>
    %133 = arith.divf %131, %132 : vector<16x1xf32>
    %134 = vector.broadcast %126 : vector<16x1xf32> to vector<16x128xf32>
    %135 = arith.subf %120, %134 : vector<16x128xf32>
    %136 = vector.broadcast %119 : f32 to vector<16x1xf32>
    %137 = arith.addf %133, %136 : vector<16x1xf32>
    %138 = math.rsqrt %137 : vector<16x1xf32>
    %139 = vector.broadcast %138 : vector<16x1xf32> to vector<16x128xf32>
    %140 = arith.mulf %135, %139 : vector<16x128xf32>
    %141 = vector.broadcast %121 : vector<1x128xf32> to vector<16x128xf32>
    %142 = arith.mulf %140, %141 : vector<16x128xf32>
    %143 = vector.broadcast %122 : vector<1x128xf32> to vector<16x128xf32>
    %144 = arith.addf %142, %143 : vector<16x128xf32>
    %145 = arith.truncf %144 : vector<16x128xf32> to vector<16x128xbf16>
    %146 = vector.extract_strided_slice %8 {offsets = [7, 0], sizes = [1, 128], strides = [1, 1]} : vector<9x128xf32> to vector<1x128xf32>
    %147 = vector.extract_strided_slice %8 {offsets = [8, 0], sizes = [1, 128], strides = [1, 1]} : vector<9x128xf32> to vector<1x128xf32>
    %148 = vector.extract_strided_slice %8 {offsets = [6, 0], sizes = [1, 128], strides = [1, 1]} : vector<9x128xf32> to vector<1x128xf32>
    %c1_i32_27 = arith.constant 1 : i32
    %149 = arith.cmpi eq, %1, %c1_i32_27 : i32
    %150 = arith.extui %149 : i1 to i32
    %c0_i32_28 = arith.constant 0 : i32
    %151 = arith.cmpi ne, %150, %c0_i32_28 : i32
    scf.if %151 {
      %c0_32 = arith.constant 0 : index
      %c0_33 = arith.constant 0 : index
      %c0_34 = arith.constant 0 : index
      %158 = vector.load %arg10[%c0_32, %c0_33, %c0_34] : memref<1x128x512xbf16, #tpu.memory_space<vmem>>, vector<1x128x512xbf16>
      %159 = vector.shape_cast %158 : vector<1x128x512xbf16> to vector<128x512xbf16>
      %cst_35 = arith.constant dense<0.000000e+00> : vector<16x512xf32>
      %160 = tpu.matmul %145, %159, %cst_35 {dimension_numbers = #tpu.dot_dimension_numbers<[1], [0], [0], [1], [0, 0, 1, 1], [], []>} : vector<16x128xbf16>, vector<128x512xbf16>, vector<16x512xf32> -> vector<16x512xf32>
      %c0_36 = arith.constant 0 : index
      %c0_37 = arith.constant 0 : index
      %c0_38 = arith.constant 0 : index
      %161 = vector.load %arg11[%c0_36, %c0_37, %c0_38] : memref<1x1x512xf32, #tpu.memory_space<vmem>>, vector<1x1x512xf32>
      %162 = vector.shape_cast %161 : vector<1x1x512xf32> to vector<1x512xf32>
      %163 = vector.broadcast %162 : vector<1x512xf32> to vector<16x512xf32>
      %164 = arith.addf %160, %163 : vector<16x512xf32>
      %cst_39 = arith.constant 5.000000e-01 : f32
      %165 = vector.broadcast %cst_39 : f32 to vector<16x512xf32>
      %166 = arith.mulf %165, %164 : vector<16x512xf32>
      %cst_40 = arith.constant 0.707106769 : f32
      %167 = vector.broadcast %cst_40 : f32 to vector<16x512xf32>
      %168 = arith.mulf %164, %167 : vector<16x512xf32>
      %169 = math.erf %168 : vector<16x512xf32>
      %cst_41 = arith.constant 1.000000e+00 : f32
      %170 = vector.broadcast %cst_41 : f32 to vector<16x512xf32>
      %171 = arith.addf %170, %169 : vector<16x512xf32>
      %172 = arith.mulf %166, %171 : vector<16x512xf32>
      %173 = arith.truncf %172 : vector<16x512xf32> to vector<16x512xbf16>
      %c0_42 = arith.constant 0 : index
      %c0_43 = arith.constant 0 : index
      %c0_44 = arith.constant 0 : index
      %174 = vector.load %arg12[%c0_42, %c0_43, %c0_44] : memref<1x512x128xbf16, #tpu.memory_space<vmem>>, vector<1x512x128xbf16>
      %175 = vector.shape_cast %174 : vector<1x512x128xbf16> to vector<512x128xbf16>
      %cst_45 = arith.constant dense<0.000000e+00> : vector<16x128xf32>
      %176 = tpu.matmul %173, %175, %cst_45 {dimension_numbers = #tpu.dot_dimension_numbers<[1], [0], [0], [1], [0, 0, 1, 1], [], []>} : vector<16x512xbf16>, vector<512x128xbf16>, vector<16x128xf32> -> vector<16x128xf32>
      %177 = vector.broadcast %148 : vector<1x128xf32> to vector<16x128xf32>
      %178 = arith.addf %176, %177 : vector<16x128xf32>
      %179 = arith.addf %144, %178 : vector<16x128xf32>
      %cst_46 = arith.constant dense<0.000000e+00> : vector<16xf32>
      %180 = vector.multi_reduction <add>, %179, %cst_46 [1] : vector<16x128xf32> to vector<16xf32>
      %181 = vector.shape_cast %180 : vector<16xf32> to vector<16x1xf32>
      %cst_47 = arith.constant 1.280000e+02 : f32
      %182 = vector.broadcast %cst_47 : f32 to vector<16x1xf32>
      %183 = arith.divf %181, %182 : vector<16x1xf32>
      %184 = vector.broadcast %183 : vector<16x1xf32> to vector<16x128xf32>
      %185 = arith.subf %179, %184 : vector<16x128xf32>
      %186 = arith.mulf %185, %185 : vector<16x128xf32>
      %cst_48 = arith.constant dense<0.000000e+00> : vector<16xf32>
      %187 = vector.multi_reduction <add>, %186, %cst_48 [1] : vector<16x128xf32> to vector<16xf32>
      %188 = vector.shape_cast %187 : vector<16xf32> to vector<16x1xf32>
      %cst_49 = arith.constant 1.280000e+02 : f32
      %189 = vector.broadcast %cst_49 : f32 to vector<16x1xf32>
      %190 = arith.divf %188, %189 : vector<16x1xf32>
      %191 = vector.broadcast %183 : vector<16x1xf32> to vector<16x128xf32>
      %192 = arith.subf %179, %191 : vector<16x128xf32>
      %cst_50 = arith.constant 9.99999996E-13 : f32
      %193 = vector.broadcast %cst_50 : f32 to vector<16x1xf32>
      %194 = arith.addf %190, %193 : vector<16x1xf32>
      %195 = math.rsqrt %194 : vector<16x1xf32>
      %196 = vector.broadcast %195 : vector<16x1xf32> to vector<16x128xf32>
      %197 = arith.mulf %192, %196 : vector<16x128xf32>
      %198 = vector.broadcast %146 : vector<1x128xf32> to vector<16x128xf32>
      %199 = arith.mulf %197, %198 : vector<16x128xf32>
      %200 = vector.broadcast %147 : vector<1x128xf32> to vector<16x128xf32>
      %201 = arith.addf %199, %200 : vector<16x128xf32>
      %c0_51 = arith.constant 0 : index
      %c0_52 = arith.constant 0 : index
      %202 = vector.load %arg19[%c0_51, %c0_52] : memref<16x128xf32, #tpu.memory_space<vmem>>, vector<16x128xf32>
      tpu.vector_store %arg19[%c0_51, %c0_52], %201 {strides = array<i32>} : memref<16x128xf32, #tpu.memory_space<vmem>>, vector<16x128xf32>,
    } else {
    }
    %c0_i32_29 = arith.constant 0 : i32
    %152 = arith.cmpi eq, %1, %c0_i32_29 : i32
    %153 = arith.extui %152 : i1 to i32
    %c0_i32_30 = arith.constant 0 : i32
    %154 = arith.cmpi ne, %153, %c0_i32_30 : i32
    scf.if %154 {
      %c0_32 = arith.constant 0 : index
      %c0_33 = arith.constant 0 : index
      %c0_34 = arith.constant 0 : index
      %158 = vector.load %arg13[%c0_32, %c0_33, %c0_34] : memref<1x128x256xbf16, #tpu.memory_space<vmem>>, vector<1x128x256xbf16>
      %159 = vector.shape_cast %158 : vector<1x128x256xbf16> to vector<128x256xbf16>
      %cst_35 = arith.constant dense<0.000000e+00> : vector<16x256xf32>
      %160 = tpu.matmul %145, %159, %cst_35 {dimension_numbers = #tpu.dot_dimension_numbers<[1], [0], [0], [1], [0, 0, 1, 1], [], []>} : vector<16x128xbf16>, vector<128x256xbf16>, vector<16x256xf32> -> vector<16x256xf32>
      %c0_36 = arith.constant 0 : index
      %c0_37 = arith.constant 0 : index
      %c0_38 = arith.constant 0 : index
      %161 = vector.load %arg14[%c0_36, %c0_37, %c0_38] : memref<1x1x256xf32, #tpu.memory_space<vmem>>, vector<1x1x256xf32>
      %162 = vector.shape_cast %161 : vector<1x1x256xf32> to vector<1x256xf32>
      %163 = vector.broadcast %162 : vector<1x256xf32> to vector<16x256xf32>
      %164 = arith.addf %160, %163 : vector<16x256xf32>
      %cst_39 = arith.constant 0.000000e+00 : f32
      %165 = vector.broadcast %cst_39 : f32 to vector<16x256xf32>
      %166 = arith.maximumf %164, %165 : vector<16x256xf32>
      %167 = arith.truncf %166 : vector<16x256xf32> to vector<16x256xbf16>
      %c0_40 = arith.constant 0 : index
      %c0_41 = arith.constant 0 : index
      %c0_42 = arith.constant 0 : index
      %168 = vector.load %arg15[%c0_40, %c0_41, %c0_42] : memref<1x256x128xbf16, #tpu.memory_space<vmem>>, vector<1x256x128xbf16>
      %169 = vector.shape_cast %168 : vector<1x256x128xbf16> to vector<256x128xbf16>
      %cst_43 = arith.constant dense<0.000000e+00> : vector<16x128xf32>
      %170 = tpu.matmul %167, %169, %cst_43 {dimension_numbers = #tpu.dot_dimension_numbers<[1], [0], [0], [1], [0, 0, 1, 1], [], []>} : vector<16x256xbf16>, vector<256x128xbf16>, vector<16x128xf32> -> vector<16x128xf32>
      %171 = vector.broadcast %148 : vector<1x128xf32> to vector<16x128xf32>
      %172 = arith.addf %170, %171 : vector<16x128xf32>
      %173 = arith.addf %144, %172 : vector<16x128xf32>
      %cst_44 = arith.constant dense<0.000000e+00> : vector<16xf32>
      %174 = vector.multi_reduction <add>, %173, %cst_44 [1] : vector<16x128xf32> to vector<16xf32>
      %175 = vector.shape_cast %174 : vector<16xf32> to vector<16x1xf32>
      %cst_45 = arith.constant 1.280000e+02 : f32
      %176 = vector.broadcast %cst_45 : f32 to vector<16x1xf32>
      %177 = arith.divf %175, %176 : vector<16x1xf32>
      %178 = vector.broadcast %177 : vector<16x1xf32> to vector<16x128xf32>
      %179 = arith.subf %173, %178 : vector<16x128xf32>
      %180 = arith.mulf %179, %179 : vector<16x128xf32>
      %cst_46 = arith.constant dense<0.000000e+00> : vector<16xf32>
      %181 = vector.multi_reduction <add>, %180, %cst_46 [1] : vector<16x128xf32> to vector<16xf32>
      %182 = vector.shape_cast %181 : vector<16xf32> to vector<16x1xf32>
      %cst_47 = arith.constant 1.280000e+02 : f32
      %183 = vector.broadcast %cst_47 : f32 to vector<16x1xf32>
      %184 = arith.divf %182, %183 : vector<16x1xf32>
      %185 = vector.broadcast %177 : vector<16x1xf32> to vector<16x128xf32>
      %186 = arith.subf %173, %185 : vector<16x128xf32>
      %cst_48 = arith.constant 9.99999974E-6 : f32
      %187 = vector.broadcast %cst_48 : f32 to vector<16x1xf32>
      %188 = arith.addf %184, %187 : vector<16x1xf32>
      %189 = math.rsqrt %188 : vector<16x1xf32>
      %190 = vector.broadcast %189 : vector<16x1xf32> to vector<16x128xf32>
      %191 = arith.mulf %186, %190 : vector<16x128xf32>
      %192 = vector.broadcast %146 : vector<1x128xf32> to vector<16x128xf32>
      %193 = arith.mulf %191, %192 : vector<16x128xf32>
      %194 = vector.broadcast %147 : vector<1x128xf32> to vector<16x128xf32>
      %195 = arith.addf %193, %194 : vector<16x128xf32>
      %c0_49 = arith.constant 0 : index
      %c0_50 = arith.constant 0 : index
      %196 = vector.load %arg19[%c0_49, %c0_50] : memref<16x128xf32, #tpu.memory_space<vmem>>, vector<16x128xf32>
      tpu.vector_store %arg19[%c0_49, %c0_50], %195 {strides = array<i32>} : memref<16x128xf32, #tpu.memory_space<vmem>>, vector<16x128xf32>,
    } else {
    }
    %c7_i32 = arith.constant 7 : i32
    %155 = arith.cmpi eq, %arg0, %c7_i32 : i32
    %156 = arith.extui %155 : i1 to i32
    %c0_i32_31 = arith.constant 0 : i32
    %157 = arith.cmpi ne, %156, %c0_i32_31 : i32
    scf.if %157 {
      %c0_32 = arith.constant 0 : index
      %c0_33 = arith.constant 0 : index
      %158 = vector.load %arg19[%c0_32, %c0_33] : memref<16x128xf32, #tpu.memory_space<vmem>>, vector<16x128xf32>
      %159 = vector.extract_strided_slice %158 {offsets = [0, 0], sizes = [8, 128], strides = [1, 1]} : vector<16x128xf32> to vector<8x128xf32>
      %cst_34 = arith.constant dense<0xFF800000> : vector<128xf32>
      %160 = vector.multi_reduction <maximumf>, %159, %cst_34 [0] : vector<8x128xf32> to vector<128xf32>
      %161 = vector.shape_cast %160 : vector<128xf32> to vector<1x128xf32>
      %162 = vector.extract_strided_slice %158 {offsets = [8, 0], sizes = [8, 128], strides = [1, 1]} : vector<16x128xf32> to vector<8x128xf32>
      %cst_35 = arith.constant dense<0xFF800000> : vector<128xf32>
      %163 = vector.multi_reduction <maximumf>, %162, %cst_35 [0] : vector<8x128xf32> to vector<128xf32>
      %164 = vector.shape_cast %163 : vector<128xf32> to vector<1x128xf32>
      %165 = tpu.concatenate %161, %164 in 0 : vector<1x128xf32>, vector<1x128xf32> -> vector<2x128xf32>
      %166 = arith.truncf %165 : vector<2x128xf32> to vector<2x128xbf16>
      %c0_36 = arith.constant 0 : index
      %c0_37 = arith.constant 0 : index
      %167 = vector.load %arg16[%c0_36, %c0_37] : memref<128x128xbf16, #tpu.memory_space<vmem>>, vector<128x128xbf16>
      %cst_38 = arith.constant dense<0.000000e+00> : vector<2x128xf32>
      %168 = tpu.matmul %166, %167, %cst_38 {dimension_numbers = #tpu.dot_dimension_numbers<[1], [0], [0], [1], [0, 0, 1, 1], [], []>} : vector<2x128xbf16>, vector<128x128xbf16>, vector<2x128xf32> -> vector<2x128xf32>
      %c0_39 = arith.constant 0 : index
      %c0_40 = arith.constant 0 : index
      %169 = vector.load %arg17[%c0_39, %c0_40] : memref<1x128xf32, #tpu.memory_space<vmem>>, vector<1x128xf32>
      %170 = vector.broadcast %169 : vector<1x128xf32> to vector<2x128xf32>
      %171 = arith.addf %168, %170 : vector<2x128xf32>
      %c0_41 = arith.constant 0 : index
      %c0_42 = arith.constant 0 : index
      %172 = vector.load %arg18[%c0_41, %c0_42] : memref<2x128xf32, #tpu.memory_space<vmem>>, vector<2x128xf32>
      tpu.vector_store %arg18[%c0_41, %c0_42], %171 {strides = array<i32>} : memref<2x128xf32, #tpu.memory_space<vmem>>, vector<2x128xf32>,
    } else {
    }
    return
  }
  func.func @transform_0(%arg0: i32, %arg1: memref<8xi32, #tpu.memory_space<smem>>) -> (i32, i32) {
    %c0_i32 = arith.constant 0 : i32
    %c0_i32_0 = arith.constant 0 : i32
    %c0_i32_1 = arith.constant 0 : i32
    return %c0_i32, %c0_i32_0 : i32, i32
  }
  func.func @transform_1(%arg0: i32, %arg1: memref<8xi32, #tpu.memory_space<smem>>) -> (i32, i32) {
    %c0_i32 = arith.constant 0 : i32
    %c0_i32_0 = arith.constant 0 : i32
    %c0_i32_1 = arith.constant 0 : i32
    return %c0_i32, %c0_i32_0 : i32, i32
  }
  func.func @transform_2(%arg0: i32, %arg1: memref<8xi32, #tpu.memory_space<smem>>) -> (i32, i32) {
    %c0_i32 = arith.constant 0 : i32
    %c0_i32_0 = arith.constant 0 : i32
    %c0_i32_1 = arith.constant 0 : i32
    return %c0_i32, %c0_i32_0 : i32, i32
  }
  func.func @transform_3(%arg0: i32, %arg1: memref<8xi32, #tpu.memory_space<smem>>) -> (i32, i32, i32) {
    %c0_i32 = arith.constant 0 : i32
    %c0_i32_0 = arith.constant 0 : i32
    %c0_i32_1 = arith.constant 0 : i32
    %c0_i32_2 = arith.constant 0 : i32
    return %c0_i32, %c0_i32_0, %c0_i32_1 : i32, i32, i32
  }
  func.func @transform_4(%arg0: i32, %arg1: memref<8xi32, #tpu.memory_space<smem>>) -> (i32, i32) {
    %c0_i32 = arith.constant 0 : i32
    %c0_i32_0 = arith.constant 0 : i32
    %c0_i32_1 = arith.constant 0 : i32
    return %c0_i32, %c0_i32_0 : i32, i32
  }
  func.func @transform_5(%arg0: i32, %arg1: memref<8xi32, #tpu.memory_space<smem>>) -> (i32, i32, i32) {
    %c0_i32 = arith.constant 0 : i32
    %c0_i32_0 = arith.constant 0 : i32
    %c0_i32_1 = arith.constant 0 : i32
    return %arg0, %c0_i32, %c0_i32_0 : i32, i32, i32
  }
  func.func @transform_6(%arg0: i32, %arg1: memref<8xi32, #tpu.memory_space<smem>>) -> (i32, i32, i32) {
    %c0_i32 = arith.constant 0 : i32
    %c0_i32_0 = arith.constant 0 : i32
    %c0_i32_1 = arith.constant 0 : i32
    return %arg0, %c0_i32, %c0_i32_0 : i32, i32, i32
  }
  func.func @transform_7(%arg0: i32, %arg1: memref<8xi32, #tpu.memory_space<smem>>) -> (i32, i32, i32) {
    %c0_i32 = arith.constant 0 : i32
    %c0_i32_0 = arith.constant 0 : i32
    %c0_i32_1 = arith.constant 0 : i32
    return %arg0, %c0_i32, %c0_i32_0 : i32, i32, i32
  }
  func.func @transform_8(%arg0: i32, %arg1: memref<8xi32, #tpu.memory_space<smem>>) -> (i32, i32, i32) {
    %c1_i32 = arith.constant 1 : i32
    %0 = arith.minsi %arg0, %c1_i32 : i32
    %c0_i32 = arith.constant 0 : i32
    %c0_i32_0 = arith.constant 0 : i32
    %c0_i32_1 = arith.constant 0 : i32
    return %0, %c0_i32, %c0_i32_0 : i32, i32, i32
  }
  func.func @transform_9(%arg0: i32, %arg1: memref<8xi32, #tpu.memory_space<smem>>) -> (i32, i32, i32) {
    %c1_i32 = arith.constant 1 : i32
    %0 = arith.minsi %arg0, %c1_i32 : i32
    %c0_i32 = arith.constant 0 : i32
    %c0_i32_0 = arith.constant 0 : i32
    %c0_i32_1 = arith.constant 0 : i32
    return %0, %c0_i32, %c0_i32_0 : i32, i32, i32
  }
  func.func @transform_10(%arg0: i32, %arg1: memref<8xi32, #tpu.memory_space<smem>>) -> (i32, i32, i32) {
    %c1_i32 = arith.constant 1 : i32
    %0 = arith.minsi %arg0, %c1_i32 : i32
    %c0_i32 = arith.constant 0 : i32
    %c0_i32_0 = arith.constant 0 : i32
    %c0_i32_1 = arith.constant 0 : i32
    return %0, %c0_i32, %c0_i32_0 : i32, i32, i32
  }
  func.func @transform_11(%arg0: i32, %arg1: memref<8xi32, #tpu.memory_space<smem>>) -> (i32, i32, i32) {
    %c2_i32 = arith.constant 2 : i32
    %0 = arith.subi %arg0, %c2_i32 : i32
    %c0_i32 = arith.constant 0 : i32
    %1 = arith.maxsi %0, %c0_i32 : i32
    %c0_i32_0 = arith.constant 0 : i32
    %c0_i32_1 = arith.constant 0 : i32
    %c0_i32_2 = arith.constant 0 : i32
    return %1, %c0_i32_0, %c0_i32_1 : i32, i32, i32
  }
  func.func @transform_12(%arg0: i32, %arg1: memref<8xi32, #tpu.memory_space<smem>>) -> (i32, i32, i32) {
    %c2_i32 = arith.constant 2 : i32
    %0 = arith.subi %arg0, %c2_i32 : i32
    %c0_i32 = arith.constant 0 : i32
    %1 = arith.maxsi %0, %c0_i32 : i32
    %c0_i32_0 = arith.constant 0 : i32
    %c0_i32_1 = arith.constant 0 : i32
    %c0_i32_2 = arith.constant 0 : i32
    return %1, %c0_i32_0, %c0_i32_1 : i32, i32, i32
  }
  func.func @transform_13(%arg0: i32, %arg1: memref<8xi32, #tpu.memory_space<smem>>) -> (i32, i32, i32) {
    %c2_i32 = arith.constant 2 : i32
    %0 = arith.subi %arg0, %c2_i32 : i32
    %c0_i32 = arith.constant 0 : i32
    %1 = arith.maxsi %0, %c0_i32 : i32
    %c0_i32_0 = arith.constant 0 : i32
    %c0_i32_1 = arith.constant 0 : i32
    %c0_i32_2 = arith.constant 0 : i32
    return %1, %c0_i32_0, %c0_i32_1 : i32, i32, i32
  }
  func.func @transform_14(%arg0: i32, %arg1: memref<8xi32, #tpu.memory_space<smem>>) -> (i32, i32) {
    %c0_i32 = arith.constant 0 : i32
    %c0_i32_0 = arith.constant 0 : i32
    %c0_i32_1 = arith.constant 0 : i32
    return %c0_i32, %c0_i32_0 : i32, i32
  }
  func.func @transform_15(%arg0: i32, %arg1: memref<8xi32, #tpu.memory_space<smem>>) -> (i32, i32) {
    %c0_i32 = arith.constant 0 : i32
    %c0_i32_0 = arith.constant 0 : i32
    %c0_i32_1 = arith.constant 0 : i32
    return %c0_i32, %c0_i32_0 : i32, i32
  }
  func.func @transform_16(%arg0: i32, %arg1: memref<8xi32, #tpu.memory_space<smem>>) -> (i32, i32) {
    %c0_i32 = arith.constant 0 : i32
    %c0_i32_0 = arith.constant 0 : i32
    %c0_i32_1 = arith.constant 0 : i32
    return %c0_i32, %c0_i32_0 : i32, i32
  }
}

</mosaic_0001>

<bundles_post_ra>
// kernel: model3_forward.1
= control target key start
LH: loop header
LB: loop body
LE: loop exit
PB: predicated region body
PF: predicated region fallthrough
CT: control target
= control target key end

     0   :  { %s4650_s27 = smov [#allocation4]   ;;  %s6044_s0 = inlined_call_operand.vmem [shape: s32[8], index: 0, kind: input, shape index: {}]   ;;  %s6045_s1 = inlined_call_operand.vmem [shape: f32[16,128], index: 1, kind: input, shape index: {}]   ;;  %s6046_s2 = inlined_call_operand.vmem [shape: f32[1,128], index: 2, kind: input, shape index: {}]   ;;  %s6047_s3 = inlined_call_operand.vmem [shape: f32[1,128], index: 3, kind: input, shape index: {}]   ;;  %s6048_s4 = inlined_call_operand.vmem [shape: f32[2,128,16], index: 4, kind: input, shape index: {}]   ;;  %s6049_s5 = inlined_call_operand.vmem [shape: f32[8,128], index: 5, kind: input, shape index: {}]   ;;  %s6050_s6 = inlined_call_operand.hbm [shape: bf16[8,128,384], index: 6, kind: input, shape index: {}]   ;;  %s6051_s7 = inlined_call_operand.hbm [shape: bf16[8,128,128], index: 7, kind: input, shape index: {}]   ;;  %s6052_s8 = inlined_call_operand.vmem [shape: f32[8,9,128], index: 8, kind: input, shape index: {}]   ;;  %s6053_s9 = inlined_call_operand.hbm [shape: bf16[2,128,512], index: 9, kind: input, shape index: {}]   ;;  %s6054_s10 = inlined_call_operand.vmem [shape: f32[2,1,512], index: 10, kind: input, shape index: {}]   ;;  %s6055_s11 = inlined_call_operand.hbm [shape: bf16[2,512,128], index: 11, kind: input, shape index: {}]   ;;  %s6056_s12 = inlined_call_operand.hbm [shape: bf16[6,128,256], index: 12, kind: input, shape index: {}]   ;;  %s6057_s13 = inlined_call_operand.vmem [shape: f32[6,1,256], index: 13, kind: input, shape index: {}]   ;;  %s6058_s14 = inlined_call_operand.hbm [shape: bf16[6,256,128], index: 14, kind: input, shape index: {}]   ;;  %s6059_s15 = inlined_call_operand.vmem [shape: bf16[128,128], index: 15, kind: input, shape index: {}]   ;;  %s6060_s16 = inlined_call_operand.vmem [shape: f32[1,128], index: 16, kind: input, shape index: {}]   ;;  %s6061_s17 = inlined_call_operand.hbm [shape: f32[2,128], index: 17, kind: output, shape index: {}]  }
   0x1   :  { %6083 = sst [smem:[#allocation35_spill]] %s6044_s0 }
   0x2   :  { %6084 = sst [smem:[#allocation36_spill]] %s6045_s1 }
   0x3   :  { %6085 = sst [smem:[#allocation37_spill]] %s6046_s2 }
   0x4   :  { %6086 = sst [smem:[#allocation38_spill]] %s6047_s3 }
   0x5   :  { %6087 = sst [smem:[#allocation39_spill]] %s6048_s4 }
   0x6   :  { %6088 = sst [smem:[#allocation40_spill]] %s6049_s5 }
   0x7   :  { %6089 = sst [smem:[#allocation41_spill]] %s6050_s6 }
   0x8   :  { %6090 = sst [smem:[#allocation42_spill]] %s6051_s7 }
   0x9   :  { %6091 = sst [smem:[#allocation43_spill]] %s6052_s8 }
   0xa   :  { %6092 = sst [smem:[#allocation44_spill]] %s6053_s9 }
   0xb   :  { %6093 = sst [smem:[#allocation45_spill]] %s6054_s10 }
   0xc   :  { %6094 = sst [smem:[#allocation46_spill]] %s6055_s11 }
   0xd   :  { %6095 = sst [smem:[#allocation47_spill]] %s6057_s13 }
   0xe   :  { %6096 = sst [smem:[#allocation48_spill]] %s6059_s15 }
   0xf   :  { %6097 = sst [smem:[#allocation49_spill]] %s6060_s16 }
  0x10   :  { %6098 = sst [smem:[#allocation50_spill]] %s6061_s17 }
  0x11   :  { %s6099_s26 = sld [smem:[#allocation35_spill]] }
  0x17   :  { %s23_s4 = sshll.u32 %s6099_s26, 4  ;;  %s24_s4 = int_to_ptr.vmem [resolvable:$true] %s23_s4 }
  0x18   :  { %26 = dma.vmem_to_smem %s24_s4, 16, %s4650_s27, [#allocation3] }
  0x19   :  { %4580 = dma.done.wait [#allocation3], 16 }
  0x1a   :  { %4581 = vsyncadd [#allocation3], 4294967280 }
  0x1b   :  { %29 = sfence }
  0x1c   :  { %30 = vsyncpa [#allocation6], 0 }
  0x1d   :  { %32 = vsyncpa [#allocation6 + $0x1], 0 }
  0x1e   :  { %33 = vsyncpa [#allocation9], 0 }
  0x1f   :  { %35 = vsyncpa [#allocation9 + $0x1], 0 }
  0x20   :  { %36 = vsyncpa [#allocation12], 0 }
  0x21   :  { %38 = vsyncpa [#allocation12 + $0x1], 0 }
  0x22   :  { %39 = vsyncpa [#allocation15], 0 }
  0x23   :  { %41 = vsyncpa [#allocation15 + $0x1], 0 }
  0x24   :  { %42 = vsyncpa [#allocation7], 0  ;;  %s4755_s28 = smov 0   ;;  %s4757_s29 = smov 0  }
  0x25   :  { %s4759_s0 = smov 0   ;;  %s4761_s30 = smov 0  }
  0x26   :  { %s4763_s4 = smov 0   ;;  %s4765_s18 = smov 0  }
  0x27   :  { %s4767_s19 = smov 0   ;;  %s4769_s1 = smov 0  }
  0x28   :  { %s4771_s20 = smov 0   ;;  %s4773_s21 = smov 0  }
  0x29 LB: > { %6100 = sst [smem:[#allocation25_spill]] %s4628_s4  ;;  %s4804_s22 = sadd.s32 4294967295, %s4648_s21   ;;  %s4648_s21 = sphi %s4773_s21, %s6169_s21   ;;  %s4644_s20 = sphi %s4771_s20, %s6165_s20   ;;  %s4640_s1 = sphi %s4769_s1, %s6164_s1   ;;  %s4636_s19 = sphi %s4767_s19, %s6163_s19   ;;  %s4632_s18 = sphi %s4765_s18, %s6162_s18   ;;  %s4628_s4 = sphi %s4763_s4, %s6161_s4   ;;  %s4624_s30 = sphi %s4761_s30, %s6160_s30   ;;  %s4620_s0 = sphi %s4759_s0, %s6168_s0   ;;  %s4616_s29 = sphi %s4757_s29, %s6167_s29   ;;  %s4612_s28 = sphi %s4755_s28, %s6166_s28  }
  0x2a   : > { %6101 = sst [smem:[#allocation26_spill]] %s4632_s18  ;;  %s4807_s23 = sadd.s32 1, %s4648_s21  }
  0x2b   : > { %6102 = sst [smem:[#allocation27_spill]] %s4640_s1  ;;  %s157_s24 = ssub.s32 %s4648_s21, %s4807_s23 }
  0x2c   : > { %6103 = sst [smem:[#allocation28_spill]] %s4644_s20  ;;  %s160_s25 = sadd.s32 1, %s4644_s20 }
  0x2d   : > { %p158_p0 = scmp.eq.s32.totalorder %s157_s24, 0  ;;  %p167_p1 = scmp.ne.s32.totalorder %s4644_s20, %s4640_s1 }
  0x2e   : > { %p6082_p2 = scmp.eq.s32.totalorder %s4648_s21, 0  ;;  %p173_p3 = scmp.ne.s32.totalorder %s4640_s1, %s4636_s19 }
  0x2f   : > { %s4817_s26 = scalar_select %p158_p0, %s4644_s20, %s160_s25  }
  0x30   : > { %p169_p4 = por %p6082_p2, %p167_p1  ;;  %p6078_p5 = scmp.eq.s32.totalorder %s4804_s22, 0 }
  0x31   : > { %6104 = sst [smem:[#allocation29_spill]] %s4817_s26  ;;  %p6066_p6 = scmp.lt.s32.totalorder %s4648_s21, 8 }
  0x32   : > { %p4825_p7 = por %p6078_p5, %p173_p3  ;;  %s4830_s17 = sand.u32 1, %s4644_s20  }
  0x33   : > { %p4834_p8 = pnand %p6066_p6, %p169_p4  ;;  %s6071_s19 = sand.u32 1, %s4648_s21  }
  0x34   : > { %s6105_s27 = scalar_select %p4825_p7, 1, 0 }
  0x35   : > { %s3334_s25 = sshll.u32 %s4830_s17, 6  ;;  %s3939_s26 = sshll.u32 %s4648_s21, 6 }
  0x36   : > { %6106 = sst [smem:[#allocation30_spill]] %s6105_s27  ;;  %s545_s16 = scalar_lea.vmem [#allocation8], %s3334_s25 }
  0x37   : > { %s553_s15 = sshll.u32 %s545_s16, 4  ;;  %s6108_s7 = sld [smem:[#allocation42_spill]]  ;;  %s554_s15 = int_to_ptr.vmem [resolvable:$true] %s553_s15 }
  0x38   : > { %s4846_s13 = scalar_lea.sflag [#allocation9], %s6071_s19  ;;  %p6065_p10 = pneg %p4834_p8 }
  0x3d   : > { %s550_s2 = scalar_lea.hbm %s6108_s7, %s3939_s26  ;;  %s4339_s3 = scalar_lea.hbm %s6108_s7, 512 }
  0x3e   : > { %s551_s20 = sshll.u32 %s550_s2, 4  ;;  %s552_s20 = int_to_ptr.hbm [resolvable:$true] %s551_s20 }
  0x3f   : > { %s4332_s10 = sshra.s32 %s552_s20, 4  ;;  %s4333_s10 = int_to_ptr.hbm [resolvable:$true] %s4332_s10 }
  0x40   : > { %s4334_s8 = scalar_lea.hbm %s4333_s10, 64  ;;  %p4340_p13 = scmp.lt.s32.totalorder %s4333_s10, %s6108_s7 }
  0x41   : > { %p4335_p9 = scmp.ne.s32.totalorder %s4333_s10, %s4334_s8  ;;  %p4341_p0 = scmp.lt.s32.totalorder %s4339_s3, %s4334_s8 }
  0x43   : > { %p4337_p11 = pnand %p6065_p10, %p4335_p9  ;;  %p4342_p1 = por %p4341_p0, %p4340_p13 }
  0x45   : > { %p4338_p12 = pneg %p4337_p11 }
  0x47   : > { %p4343_p3 = pnand %p4342_p1, %p4338_p12 }
  0x49   : > { %4346 = shalt.err (!%p4343_p3)
}
  0x4a   : > { %s6067_s26 = smov 64   ;;  %s6069_s8 = smov 4  }
  0x4b   : > { %4109 = dma.hbm_to_vmem [thread:$0]  (!%p4834_p8), %s552_s20, 1024, %s554_s15, %s4846_s13, %s6067_s26, %s6067_s26, %s6069_s8  }
  0x4c   : > { %p3351_p4 = scmp.ge.s32.totalorder %s4648_s21, 1  ;;  %p691_p9 = scmp.lt.s32.totalorder %s4648_s21, 9 }
  0x4d   : > { %p235_p12 = scmp.lt.s32.totalorder %s4648_s21, 1  ;;  %p237_p13 = scmp.lt.s32.totalorder %s4807_s23, 1 }
  0x4e   : > { %p4867_p11 = pnand %p3351_p4, %p691_p9  ;;  %s242_s16 = sadd.s32 1, %s4632_s18 }
  0x4f   : > { %s236_s25 = scalar_select %p235_p12, %s4648_s21, 1 }
  0x50   : > { %s6109_s10 = scalar_select %p4867_p11, 1, 0 }
  0x51   : > { %s238_s3 = scalar_select %p237_p13, %s4807_s23, 1 }
  0x52   : > { %6110 = sst [smem:[#allocation31_spill]] %s6109_s10  ;;  %p249_p0 = scmp.ne.s32.totalorder %s4632_s18, %s4628_s4 }
  0x53   : > { %p255_p1 = scmp.ne.s32.totalorder %s4628_s4, %s4624_s30  ;;  %s239_s5 = ssub.s32 %s236_s25, %s238_s3 }
  0x54   : > { %s573_s2 = sand.u32 1, %s4632_s18   ;;  %p240_p3 = scmp.eq.s32.totalorder %s239_s5, 0 }
  0x55   : > { %p251_p10 = por %p249_p0, %p6082_p2  ;;  %p4885_p6 = por %p255_p1, %p6078_p5 }
  0x56   : > { %s3337_s20 = sshll.u32 %s573_s2, 8  ;;  %s3940_s8 = sshll.u32 %s236_s25, 8 }
  0x57   : > { %s6111_s15 = scalar_select %p4885_p6, 1, 0 }
  0x58   : > { %s4890_s26 = scalar_select %p240_p3, %s4632_s18, %s242_s16  }
  0x59   : > { %6112 = sst [smem:[#allocation32_spill]] %s6111_s15  ;;  %s575_s30 = scalar_lea.vmem [#allocation10], %s3337_s20 }
  0x5a   : > { %6113 = sst [smem:[#allocation33_spill]] %s4890_s26  ;;  %s4895_s3 = sshll.u32 %s575_s30, 4 }
  0x5b   : > { %s6114_s9 = sld [smem:[#allocation44_spill]]  ;;  %p6116_p4 = scmp.lt.s32.totalorder %s4648_s21, 8 }
  0x5c   : > { %6115 = sst [smem:[#allocation34_spill]] %s4895_s3  ;;  %s610_s25 = scalar_lea.vmem [#allocation11], %s3337_s20 }
  0x5d   : > { %p4902_p9 = pnand %p6116_p4, %p251_p10  ;;  %s6118_s11 = sld [smem:[#allocation46_spill]] }
  0x5e   : > { %s620_s30 = sshll.u32 %s610_s25, 4  ;;  %s621_s30 = int_to_ptr.vmem [resolvable:$true] %s620_s30 }
  0x5f   : > { %p4366_p12 = pneg %p4902_p9 }
  0x61   : > { %s582_s27 = scalar_lea.hbm %s6114_s9, %s3940_s8 }
  0x62   : > { %s583_s5 = sshll.u32 %s582_s27, 4  ;;  %s6119_s27 = sand.u32 1, %s4648_s21   ;;  %s4898_s5 = int_to_ptr.hbm [resolvable:$true] %s583_s5 }
  0x63   : > { %s617_s7 = scalar_lea.hbm %s6118_s11, %s3940_s8  ;;  %s4911_s3 = scalar_lea.sflag [#allocation12], %s6119_s27 }
  0x64   : > { %s618_s19 = sshll.u32 %s617_s7, 4  ;;  %s4369_s20 = scalar_lea.hbm %s6118_s11, 512  ;;  %s619_s19 = int_to_ptr.hbm [resolvable:$true] %s618_s19 }
  0x65   : > { %s4362_s26 = sshra.s32 %s619_s19, 4  ;;  %s4363_s26 = int_to_ptr.hbm [resolvable:$true] %s4362_s26 }
  0x66   : > { %s4364_s18 = scalar_lea.hbm %s4363_s26, 256  ;;  %p4370_p1 = scmp.lt.s32.totalorder %s4363_s26, %s6118_s11 }
  0x67   : > { %p4365_p10 = scmp.ne.s32.totalorder %s4363_s26, %s4364_s18  ;;  %p4371_p3 = scmp.lt.s32.totalorder %s4369_s20, %s4364_s18 }
  0x69   : > { %p4367_p13 = pnand %p4366_p12, %p4365_p10  ;;  %p4372_p4 = por %p4371_p3, %p4370_p1 }
  0x6b   : > { %p4368_p0 = pneg %p4367_p13 }
  0x6d   : > { %p4373_p5 = pnand %p4372_p4, %p4368_p0 }
  0x6f   : > { %4376 = shalt.err (!%p4373_p5)
}
  0x70   : > { %s6120_s25 = smov 4   ;;  %s6121_s27 = smov 64  }
  0x71   : > { %4115 = dma.hbm_to_vmem [thread:$0]  (!%p4902_p9), %s619_s19, 4096, %s621_s30, %s4911_s3, %s6121_s27, %s6121_s27, %s6120_s25  }
  0x72   : > { %s4084_s16 = smul.u32 192, %s4830_s17  ;;  %s6122_s6 = sld [smem:[#allocation41_spill]] }
  0x73   : > { %s4085_s8 = smul.u32 192, %s4648_s21  ;;  %s520_s11 = scalar_lea.sflag [#allocation6], %s4830_s17 }
  0x74   : > { %s523_s26 = scalar_lea.vmem [#allocation5], %s4084_s16  ;;  %p6123_p10 = pneg %p4834_p8 }
  0x75   : > { %s531_s20 = sshll.u32 %s523_s26, 4  ;;  %s532_s20 = int_to_ptr.vmem [resolvable:$true] %s531_s20 }
  0x78   : > { %s528_s18 = scalar_lea.hbm %s6122_s6, %s4085_s8  ;;  %s4399_s27 = scalar_lea.hbm %s6122_s6, 1536 }
  0x79   : > { %s529_s7 = sshll.u32 %s528_s18, 4  ;;  %s530_s7 = int_to_ptr.hbm [resolvable:$true] %s529_s7 }
  0x7a   : > { %s4392_s1 = sshra.s32 %s530_s7, 4  ;;  %s4393_s1 = int_to_ptr.hbm [resolvable:$true] %s4392_s1 }
  0x7b   : > { %s4394_s10 = scalar_lea.hbm %s4393_s1, 192  ;;  %p4400_p1 = scmp.lt.s32.totalorder %s4393_s1, %s6122_s6 }
  0x7c   : > { %p4395_p5 = scmp.ne.s32.totalorder %s4393_s1, %s4394_s10  ;;  %p4401_p3 = scmp.lt.s32.totalorder %s4399_s27, %s4394_s10 }
  0x7e   : > { %p4397_p13 = pnand %p4395_p5, %p6123_p10  ;;  %p4402_p4 = por %p4401_p3, %p4400_p1 }
  0x80   : > { %p4398_p0 = pneg %p4397_p13 }
  0x82   : > { %p4403_p2 = pnand %p4402_p4, %p4398_p0 }
  0x84   : > { %4406 = shalt.err (!%p4403_p2)
}
  0x85   : > { %s4653_s17 = smov 192   ;;  %s4654_s16 = smov 12  }
  0x86   : > { %4106 = dma.hbm_to_vmem [thread:$0]  (!%p4834_p8), %s530_s7, 3072, %s532_s20, %s520_s11, %s4653_s17, %s4653_s17, %s4654_s16  }
  0x87   : > { %s4422_s2 = sshra.s32 %s4898_s5, 4  ;;  %s4429_s27 = scalar_lea.hbm %s6114_s9, 512  ;;  %s4423_s2 = int_to_ptr.hbm [resolvable:$true] %s4422_s2 }
  0x88   : > { %s4424_s18 = scalar_lea.hbm %s4423_s2, 256  ;;  %p4430_p2 = scmp.lt.s32.totalorder %s4423_s2, %s6114_s9 }
  0x89   : > { %p4425_p5 = scmp.ne.s32.totalorder %s4423_s2, %s4424_s18  ;;  %p4431_p0 = scmp.lt.s32.totalorder %s4429_s27, %s4424_s18 }
  0x8b   : > { %p4427_p10 = pnand %p4425_p5, %p4366_p12  ;;  %p4432_p1 = por %p4431_p0, %p4430_p2 }
  0x8d   : > { %p4428_p13 = pneg %p4427_p10 }
  0x8f   : > { %p4433_p3 = pnand %p4432_p1, %p4428_p13 }
  0x91   : > { %4436 = shalt.err (!%p4433_p3)
}
  0x92   : > { %s4655_s11 = smov 256   ;;  %s6124_s24 = sld [smem:[#allocation34_spill]] }
  0x93   : > { %s4656_s20 = smov 16   ;;  %s3325_s30 = sadd.s32 4294967294, %s4648_s21 }
  0x94   : > { %p326_p8 = scmp.gt.s32.totalorder %s3325_s30, 0  ;;  %s3326_s4 = sadd.s32 4294967294, %s4807_s23 }
  0x95   : > { %p329_p12 = scmp.gt.s32.totalorder %s3326_s4, 0  ;;  %s334_s8 = sadd.s32 1, %s4620_s0 }
  0x96   : > { %s6171_s30 = smov (!%p326_p8, %s3325_s30), 0  ;;  %p341_p4 = scmp.ne.s32.totalorder %s4620_s0, %s4616_s29 }
  0x97   : > { %s6173_s4 = smov (!%p329_p12, %s3326_s4), 0  ;;  %p347_p5 = scmp.ne.s32.totalorder %s4616_s29, %s4612_s28 }
  0x98   : > { %s6125_s7 = int_to_ptr.vmem [resolvable:$true] %s6124_s24  ;;  %s331_s17 = ssub.s32 %s6171_s30, %s6173_s4 }
  0x99   : > { %4112 = dma.hbm_to_vmem [thread:$0]  (!%p4902_p9), %s4898_s5, 4096, %s6125_s7, %s4846_s13, %s4655_s11, %s4655_s11, %s4656_s20  }
  0x9a   : > { %s632_s16 = sand.u32 1, %s4620_s0   ;;  %p332_p10 = scmp.eq.s32.totalorder %s331_s17, 0 }
  0x9b   : > { %p6126_p13 = scmp.eq.s32.totalorder %s4648_s21, 0  ;;  %p6127_p9 = scmp.eq.s32.totalorder %s4804_s22, 0 }
  0x9c   : > { %s4984_s15 = sshll.u32 %s632_s16, 7  ;;  %s3942_s2 = sshll.u32 %s6171_s30, 7 }
  0x9d   : > { %p343_p2 = por %p341_p4, %p6126_p13  ;;  %p4978_p0 = por %p347_p5, %p6127_p9 }
  0x9e   : > { %s4987_s5 = scalar_select %p332_p10, %s4620_s0, %s334_s8  }
  0x9f   : > { %s642_s28 = scalar_lea.hbm %s6056_s12, %s3942_s2  ;;  %s634_s10 = scalar_lea.vmem [#allocation13], %s4984_s15 }
  0xa0   : > { %s645_s27 = sshll.u32 %s634_s10, 4  ;;  %s643_s26 = sshll.u32 %s642_s28, 4  ;;  %s646_s27 = int_to_ptr.vmem [resolvable:$true] %s645_s27  ;;  %s644_s26 = int_to_ptr.hbm [resolvable:$true] %s643_s26 }
  0xa1   : > { %p6129_p1 = scmp.lt.s32.totalorder %s4648_s21, 8  ;;  %s4452_s11 = sshra.s32 %s644_s26, 4  ;;  %s4453_s11 = int_to_ptr.hbm [resolvable:$true] %s4452_s11 }
  0xa2   : > { %s4454_s24 = scalar_lea.hbm %s4453_s11, 128  ;;  %s4459_s21 = scalar_lea.hbm %s6056_s12, 768 }
  0xa3   : > { %p4996_p3 = pnand %p6129_p1, %p343_p2  ;;  %p4455_p8 = scmp.ne.s32.totalorder %s4453_s11, %s4454_s24 }
  0xa4   : > { %p4460_p10 = scmp.lt.s32.totalorder %s4453_s11, %s6056_s12  ;;  %p4461_p13 = scmp.lt.s32.totalorder %s4459_s21, %s4454_s24 }
  0xa5   : > { %p4456_p12 = pneg %p4996_p3 }
  0xa6   : > { %p4462_p2 = por %p4461_p13, %p4460_p10 }
  0xa7   : > { %p4457_p4 = pnand %p4456_p12, %p4455_p8 }
  0xa9   : > { %p4458_p5 = pneg %p4457_p4 }
  0xab   : > { %p4463_p9 = pnand %p4462_p2, %p4458_p5 }
  0xad   : > { %4466 = shalt.err (!%p4463_p9)
}
  0xae   : > { %s4657_s8 = smov 128   ;;  %s4658_s17 = smov 8  }
  0xaf   : > { %4118 = dma.hbm_to_vmem [thread:$0]  (!%p4996_p3), %s644_s26, 2048, %s646_s27, %s4911_s3, %s4657_s8, %s4657_s8, %s4658_s17  }
  0xb0   : > { %s680_s28 = scalar_lea.hbm %s6058_s14, %s3942_s2  ;;  %s672_s20 = scalar_lea.vmem [#allocation14], %s4984_s15 }
  0xb1   : > { %s681_s10 = sshll.u32 %s680_s28, 4  ;;  %s683_s11 = sshll.u32 %s672_s20, 4  ;;  %s682_s10 = int_to_ptr.hbm [resolvable:$true] %s681_s10  ;;  %s684_s11 = int_to_ptr.vmem [resolvable:$true] %s683_s11 }
  0xb2   : > { %s669_s24 = scalar_lea.sflag [#allocation15], %s632_s16  ;;  %s4482_s7 = sshra.s32 %s682_s10, 4  ;;  %s4483_s7 = int_to_ptr.hbm [resolvable:$true] %s4482_s7 }
  0xb3   : > { %s4484_s21 = scalar_lea.hbm %s4483_s7, 128  ;;  %s4489_s26 = scalar_lea.hbm %s6058_s14, 768 }
  0xb4   : > { %p4485_p1 = scmp.ne.s32.totalorder %s4483_s7, %s4484_s21  ;;  %p4490_p5 = scmp.lt.s32.totalorder %s4483_s7, %s6058_s14 }
  0xb5   : > { %p4491_p10 = scmp.lt.s32.totalorder %s4489_s26, %s4484_s21 }
  0xb6   : > { %p4487_p8 = pnand %p4485_p1, %p4456_p12 }
  0xb7   : > { %p4492_p13 = por %p4491_p10, %p4490_p5 }
  0xb8   : > { %p4488_p4 = pneg %p4487_p8 }
  0xba   : > { %p4493_p2 = pnand %p4492_p13, %p4488_p4 }
  0xbc   : > { %4496 = shalt.err (!%p4493_p2)
}
  0xbd   : > { %s6131_s16 = smov 64   ;;  %695 = sbr.rel (%p4867_p11) target bundleno = 3212 (0xc8c), region = 84 }
  0xbe   : > { %4121 = dma.hbm_to_vmem [thread:$0]  (!%p4996_p3), %s682_s10, 2048, %s684_s11, %s669_s24, %s6131_s16, %s6131_s16, %s6120_s25  }
  0xbf   : > { %s6133_s4 = sld [smem:[#allocation27_spill]] (!%p4867_p11) }
  0xc5   : > { %s697_s17 = sand.u32 1, %s6133_s4  }
  0xc6   : > { %s4086_s18 = smul.u32 192, %s697_s17  ;;  %s698_s1 = scalar_lea.sflag [#allocation6], %s697_s17 }
  0xc8   : > { %s5037_s28 = scalar_lea.vmem [#allocation5], %s4086_s18 }
  0xc9   : > { %4583 = dma.done.wait (%p4825_p7), %s698_s1, 3072  }
  0xca   : > { %4585 = vsyncadd (%p4825_p7), %s698_s1, 4294964224  ;;  %s707_s19 = sand.u32 1, %s4804_s22   ;;  %s3352_s20 = sshll.u32 %s697_s17, 6 }
  0xcb   : > { %s708_s25 = scalar_lea.sflag [#allocation9], %s707_s19  ;;  %s5044_s10 = scalar_lea.vmem [#allocation8], %s3352_s20 }
  0xcc   : > { %4587 = dma.done.wait (%p4825_p7), %s708_s25, 1024  }
  0xcd   : > { %4589 = vsyncadd (%p4825_p7), %s708_s25, 4294966272  ;;  %s6135_s11 = sld [smem:[#allocation25_spill]] }
  0xd3   : > { %s719_s7 = sand.u32 1, %s6135_s11  }
  0xd4   : > { %s3353_s21 = sshll.u32 %s719_s7, 8 }
  0xd5   : > { %s5051_s3 = scalar_lea.vmem [#allocation10], %s3353_s21 }
  0xd6   : > { %4591 = dma.done.wait (%p4885_p6), %s708_s25, 4096  }
  0xd7   : > { %4593 = vsyncadd (%p4885_p6), %s708_s25, 4294963200  ;;  %s728_s27 = scalar_lea.sflag [#allocation12], %s707_s19  ;;  %s5057_s26 = scalar_lea.vmem [#allocation11], %s3353_s21 }
  0xd8   : > { %4595 = dma.done.wait (%p4885_p6), %s728_s27, 4096  }
  0xd9   : > { %4597 = vsyncadd (%p4885_p6), %s728_s27, 4294963200  ;;  %s739_s2 = sand.u32 1, %s4616_s29  }
  0xda   : > { %s3355_s30 = sshll.u32 %s739_s2, 7 }
  0xdb   : > { %s5064_s16 = scalar_lea.vmem [#allocation13], %s3355_s30 }
  0xdc   : > { %4599 = dma.done.wait (%p4978_p0), %s728_s27, 2048  }
  0xdd   : > { %4601 = vsyncadd (%p4978_p0), %s728_s27, 4294965248  ;;  %s748_s15 = scalar_lea.sflag [#allocation15], %s739_s2  ;;  %s5070_s4 = scalar_lea.vmem [#allocation14], %s3355_s30 }
  0xde   : > { %4603 = dma.done.wait (%p4978_p0), %s748_s15, 2048  }
  0xdf   : > { %4605 = vsyncadd (%p4978_p0), %s748_s15, 4294965248  ;;  %p839_p6 = scmp.lt.s32.totalorder %s4804_s22, 7  ;;  %p846_p7 = scmp.lt.s32.totalorder %s4804_s22, 1 }
  0xe0   : > { %s5079_s8 = sld [smem:[#allocation4 + %s4804_s22]]  ;;  %s3363_s17 = sadd.s32 4294967294, %s4804_s22 }
  0xe1   : > { %s840_s18 = scalar_select %p839_p6, %s4804_s22, 7 }
  0xe2   : > { %s847_s1 = scalar_select %p846_p7, %s4804_s22, 1 }
  0xe3   : > { %s3944_s19 = sshll.u32 %s840_s18, 4  ;;  %p860_p11 = scmp.gt.s32.totalorder %s3363_s17, 0 }
  0xe4   : > { %s6137_s11 = sld [smem:[#allocation43_spill]]  ;;  %p3364_p0 = scmp.lt.s32.totalorder %s3363_s17, 5 }
  0xe5   : > { %s6175_s1 = smov (!%p846_p7, %s847_s1), 1  ;;  %s6177_s17 = smov (!%p860_p11, %s3363_s17), 0 }
  0xe6   : > { %s3362_s24 = sshll.u32 %s6175_s1, 2  ;;  %s6138_s27 = sld [smem:[#allocation45_spill]] }
  0xe7   : > { %s6179_s17 = smov (!%p3364_p0, %s6177_s17), 5  ;;  %s6139_s18 = sld [smem:[#allocation47_spill]] }
  0xe8   : > { %s3369_s30 = sshll.u32 %s6179_s17, 1  ;;  %p3370_p3 = scmp.ne.s32.totalorder %s4804_s22, 0 }
  0xe9   : > { %s6140_s25 = sld [smem:[#allocation36_spill]] (!%p3370_p3) }
  0xea   : > { %s5087_s13 = scalar_lea.vmem %s6137_s11, %s3944_s19  ;;  %877 = sbr.rel (%p3370_p3) target bundleno = 515 (0x203), region = 112 }
  0xec   : > { %s5092_s2 = scalar_lea.vmem %s6138_s27, %s3362_s24  ;;  %s6141_s24 = sld [smem:[#allocation37_spill]] (!%p3370_p3) }
  0xed   : > { %s5097_s9 = scalar_lea.vmem %s6139_s18, %s3369_s30  ;;  %s6142_s27 = sld [smem:[#allocation38_spill]] (!%p3370_p3) }
  0xef   : > { %v878_v0 = vld [vmem:[%s6140_s25] sm:$0xff]  ;;  %v879_v1 = vld [vmem:[%s6140_s25 + $0x8] sm:$0xff]  ;;  %v4659_v2 = vmov 128.0  }
  0xf0   : > { %882 = vadd.xlane.f32.xlu0 %v878_v0  ;;  %4219 = vrcp.f32 %v4659_v2 }
  0xf2   : > { %v4217_v31 = vld [vmem:[%s6141_s24] ss:$0 sm:$0xff] }
  0xf3   : > { %v4218_v34 = vld [vmem:[%s6142_s27] ss:$0 sm:$0xff] }
  0xf6   : > { %v4220_v3 = vpop.eup %4219 }
  0xf7   : > { %v887_v4 = vmul.f32 128.0, %v4220_v3  ;;  %vm891_vm0 = vweird.f32 %v4220_v3 }
  0xf8   : > { %884 = vadd.xlane.f32.xlu0 %v879_v1 }
  0xf9   : > { %v888_v5 = vsub.f32 1.0, %v887_v4 }
  0xfb   : > { %v889_v6 = vmul.f32 %v4220_v3, %v888_v5 }
  0xfd   : > { %v890_v7 = vadd.f32 %v4220_v3, %v889_v6 }
  0xff   : > { %v892_v8 = vsel %vm891_vm0, %v4220_v3, %v890_v7 }
 0x163   : > { %v883_v9 = vpop.xlane.xlu0 %882 }
 0x164   : > { %v893_v10 = vmul.f32 %v892_v8, %v883_v9 }
 0x166   : > { %v895_v11 = vsub.f32 %v878_v0, %v893_v10 }
 0x168   : > { %v897_v12 = vmul.f32 %v895_v11, %v895_v11 }
 0x16a   : > { %899 = vadd.xlane.f32.xlu1 %v897_v12 }
 0x16b   : > { %v885_v13 = vpop.xlane.xlu0 %884 }
 0x16c   : > { %v894_v14 = vmul.f32 %v892_v8, %v885_v13 }
 0x16e   : > { %v896_v15 = vsub.f32 %v879_v1, %v894_v14 }
 0x170   : > { %v898_v16 = vmul.f32 %v896_v15, %v896_v15 }
 0x172   : > { %901 = vadd.xlane.f32.xlu1 %v898_v16 }
 0x1dd   : > { %v900_v17 = vpop.xlane.xlu1 %899 }
 0x1de   : > { %v903_v18 = vmul.f32 %v900_v17, %v892_v8 }
 0x1e0   : > { %v905_v19 = vadd.f32 1e-12, %v903_v18 }
 0x1e2   : > { %4221 = vrsqrt.f32 %v905_v19  ;;  %vm913_vm2 = vweird.f32 %v905_v19 }
 0x1e5   : > { %v902_v20 = vpop.xlane.xlu1 %901 }
 0x1e6   : > { %v904_v21 = vmul.f32 %v902_v20, %v892_v8 }
 0x1e8   : > { %v4222_v22 = vpop.eup %4221  ;;  %v906_v23 = vadd.f32 1e-12, %v904_v21 }
 0x1e9   : > { %v908_v24 = vmul.f32 %v4222_v22, %v905_v19  ;;  %vm914_vm1 = vweird.f32 %v4222_v22 }
 0x1ea   : > { %4223 = vrsqrt.f32 %v906_v23  ;;  %vm915_vm3 = vmor %vm913_vm2, %vm914_vm1  ;;  %vm923_vm5 = vweird.f32 %v906_v23 }
 0x1eb   : > { %v909_v25 = vmul.f32 %v4222_v22, %v908_v24 }
 0x1ed   : > { %v910_v26 = vmul.f32 0.5, %v909_v25 }
 0x1ef   : > { %v911_v27 = vsub.f32 1.5, %v910_v26 }
 0x1f0   : > { %v4224_v28 = vpop.eup %4223 }
 0x1f1   : > { %v912_v29 = vmul.f32 %v4222_v22, %v911_v27  ;;  %v918_v30 = vmul.f32 %v4224_v28, %v906_v23  ;;  %vm924_vm4 = vweird.f32 %v4224_v28 }
 0x1f2   : > { %vm925_vm6 = vmor %vm923_vm5, %vm924_vm4 }
 0x1f3   : > { %v916_v32 = vsel %vm915_vm3, %v4222_v22, %v912_v29  ;;  %v919_v33 = vmul.f32 %v4224_v28, %v918_v30 }
 0x1f4   : > { %v927_v35 = vmul.f32 %v916_v32, %v895_v11 }
 0x1f5   : > { %v920_v36 = vmul.f32 0.5, %v919_v33 }
 0x1f6   : > { %v932_v37 = vmul.f32 %v4217_v31, %v927_v35 }
 0x1f7   : > { %v921_v38 = vsub.f32 1.5, %v920_v36 }
 0x1f8   : > { %v937_v39 = vadd.f32 %v4218_v34, %v932_v37 }
 0x1f9   : > { %v922_v40 = vmul.f32 %v4224_v28, %v921_v38 }
 0x1fa   : > { %939 = vst [vmem:[#allocation2] sm:$0xff] %v937_v39 }
 0x1fb   : > { %v926_v41 = vsel %vm925_vm6, %v4224_v28, %v922_v40 }
 0x1fc   : > { %v928_v42 = vmul.f32 %v926_v41, %v896_v15 }
 0x1fe   : > { %v933_v43 = vmul.f32 %v4217_v31, %v928_v42 }
 0x200   : > { %v938_v44 = vadd.f32 %v4218_v34, %v933_v43 }
 0x202   : > { %940 = vst [vmem:[#allocation2 + $0x8] sm:$0xff] %v938_v44 }
 0x203 PF: > { %v5113_v45 = vld [vmem:[%s5087_s13 + $0x8] sm:$0x1]  ;;  %v3457_v46 = vld [vmem:[%s5037_s28 + $0xa8] sm:$0xf]  ;;  %v3969_v47 = vld [vmem:[%s5037_s28 + $0xb0] sm:$0xf0] }
 0x204   : > { %v3458_v48 = vor.u32 %v3969_v47, %v3457_v46  ;;  %v3968_v49 = vld [vmem:[%s5037_s28 + $0xac] sm:$0xf]  ;;  %v3459_v50 = vld [vmem:[%s5037_s28 + $0xb4] sm:$0xf0]  ;;  %v3445_v51 = vld [vmem:[%s5037_s28 + $0x90] sm:$0xf] }
 0x205   : > { %v3462_v52 = vor.u32 %v3968_v49, %v3459_v50  ;;  %v3966_v53 = vld [vmem:[%s5037_s28 + $0x98] sm:$0xf0]  ;;  %v3965_v54 = vld [vmem:[%s5037_s28 + $0x94] sm:$0xf]  ;;  %v3447_v55 = vld [vmem:[%s5037_s28 + $0x9c] sm:$0xf0] }
 0x206   : > { %1107 = vmatpush.bf16.msra.mxu0 %v3458_v48  ;;  %v3446_v56 = vor.u32 %v3966_v53, %v3445_v51  ;;  %v3450_v57 = vor.u32 %v3965_v54, %v3447_v55  ;;  %v3433_v58 = vld [vmem:[%s5037_s28 + $0x78] sm:$0xf]  ;;  %v3963_v59 = vld [vmem:[%s5037_s28 + $0x80] sm:$0xf0]  ;;  %v3962_v60 = vld [vmem:[%s5037_s28 + $0x7c] sm:$0xf] }
 0x207   : > { %1121 = vmatpush.bf16.msra.mxu1 %v3462_v52  ;;  %v3435_v61 = vld [vmem:[%s5037_s28 + $0x84] sm:$0xf0]  ;;  %v3434_v62 = vor.u32 %v3963_v59, %v3433_v58  ;;  %v3421_v0 = vld [vmem:[%s5037_s28 + $0x60] sm:$0xf]  ;;  %v3960_v1 = vld [vmem:[%s5037_s28 + $0x68] sm:$0xf0] }
 0x208   : > { %v3438_v63 = vor.u32 %v3962_v60, %v3435_v61  ;;  %v3959_v2 = vld [vmem:[%s5037_s28 + $0x64] sm:$0xf]  ;;  %v3423_v3 = vld [vmem:[%s5037_s28 + $0x6c] sm:$0xf0]  ;;  %v3422_v4 = vor.u32 %v3960_v1, %v3421_v0  ;;  %v3409_v6 = vld [vmem:[%s5037_s28 + $0x48] sm:$0xf] }
 0x209   : > { %v3426_v5 = vor.u32 %v3959_v2, %v3423_v3  ;;  %v3957_v7 = vld [vmem:[%s5037_s28 + $0x50] sm:$0xf0]  ;;  %v3956_v8 = vld [vmem:[%s5037_s28 + $0x4c] sm:$0xf]  ;;  %v3411_v9 = vld [vmem:[%s5037_s28 + $0x54] sm:$0xf0] }
 0x20a   : > { %1108 = vmatpush.bf16.msra.mxu0 %v3446_v56  ;;  %v3410_v10 = vor.u32 %v3957_v7, %v3409_v6  ;;  %v3414_v11 = vor.u32 %v3956_v8, %v3411_v9  ;;  %v3397_v12 = vld [vmem:[%s5037_s28 + $0x30] sm:$0xf]  ;;  %v3954_v13 = vld [vmem:[%s5037_s28 + $0x38] sm:$0xf0]  ;;  %v3953_v14 = vld [vmem:[%s5037_s28 + $0x34] sm:$0xf] }
 0x20b   : > { %1122 = vmatpush.bf16.msra.mxu1 %v3450_v57  ;;  %v3399_v15 = vld [vmem:[%s5037_s28 + $0x3c] sm:$0xf0]  ;;  %v3398_v16 = vor.u32 %v3954_v13, %v3397_v12  ;;  %v3385_v18 = vld [vmem:[%s5037_s28 + $0x18] sm:$0xf]  ;;  %v3951_v19 = vld [vmem:[%s5037_s28 + $0x20] sm:$0xf0] }
 0x20c   : > { %v3402_v17 = vor.u32 %v3953_v14, %v3399_v15  ;;  %v3950_v20 = vld [vmem:[%s5037_s28 + $0x1c] sm:$0xf]  ;;  %v3387_v21 = vld [vmem:[%s5037_s28 + $0x24] sm:$0xf0]  ;;  %v3386_v22 = vor.u32 %v3951_v19, %v3385_v18  ;;  %v3373_v24 = vld [vmem:[%s5037_s28] sm:$0xf] }
 0x20d   : > { %v3390_v23 = vor.u32 %v3950_v20, %v3387_v21  ;;  %v3948_v25 = vld [vmem:[%s5037_s28 + $0x8] sm:$0xf0]  ;;  %v3947_v26 = vld [vmem:[%s5037_s28 + $0x4] sm:$0xf]  ;;  %v3375_v27 = vld [vmem:[%s5037_s28 + $0xc] sm:$0xf0] }
 0x20e   : > { %1109 = vmatpush.bf16.msra.mxu0 %v3434_v62  ;;  %v3374_v28 = vor.u32 %v3948_v25, %v3373_v24  ;;  %v5147_v29 = vld [vmem:[#allocation2] sm:$0xff]  ;;  %v5149_v30 = vld [vmem:[#allocation2 + $0x8] sm:$0xff]  ;;  %v3378_v31 = vor.u32 %v3947_v26, %v3375_v27  ;;  %s6143_s18 = sld [smem:[#allocation40_spill]]  ;;  %vm1260_vm7 = vcmask 130048   ;;  %p1629_p12 = scmp.eq.s32.totalorder %s5079_s8, 1 }
 0x20f   : > { %1123 = vmatpush.bf16.msra.mxu1 %v3438_v63  ;;  %v5153_v32 = vpack.c.bf16 %v5149_v30, %v5147_v29  ;;  %v5158_v33 = vld [vmem:[%s5087_s13] sm:$0xff]  ;;  %s3467_s13 = sshll.u32 %s5079_s8, 7  ;;  %s6144_s1 = sld [smem:[#allocation39_spill]] }
 0x210   : > { %v1149_v35 = vperm.slane %v5158_v33, 0  ;;  %v1154_v39 = vperm.slane %v5158_v33, 1  ;;  %p3508_p9 = scmp.ne.s32.totalorder %s5079_s8, 1 }
 0x212   : > { %1110 = vmatpush.bf16.msra.mxu0 %v3422_v4 }
 0x213   : > { %1124 = vmatpush.bf16.msra.mxu1 %v3426_v5 }
 0x214   : > { %v946_v38 = vld [vmem:[%s6143_s18] sm:$0xff] }
 0x215   : > { %v5165_v41 = vperm.slane %v946_v38, 4  ;;  %v5167_v42 = vperm.slane %v946_v38, 5  ;;  %v5169_v47 = vperm.slane %v946_v38, 6  ;;  %v5171_v48 = vperm.slane %v946_v38, 7  ;;  %s5201_s11 = scalar_lea.vmem %s6144_s1, %s3467_s13 }
 0x216   : > { %1111 = vmatpush.bf16.msra.mxu0 %v3410_v10  ;;  %v5173_v53 = vperm.slane %v946_v38, 0  ;;  %v5185_v5 = vperm.slane %v946_v38, 1  ;;  %v5189_v9 = vperm.slane %v946_v38, 2  ;;  %v5193_v13 = vperm.slane %v946_v38, 3  ;;  %v1196_v21 = vld [vmem:[%s5201_s11 + $0x8] sm:$0xff]  ;;  %v1197_v25 = vld [vmem:[%s5201_s11 + $0x10] sm:$0xff] }
 0x217   : > { %1125 = vmatpush.bf16.msra.mxu1 %v3414_v11 }
 0x21a   : > { %1112 = vmatpush.bf16.msra.mxu0 %v3398_v16 }
 0x21b   : > { %1126 = vmatpush.bf16.msra.mxu1 %v3402_v17  ;;  %v1195_v17 = vld [vmem:[%s5201_s11] sm:$0xff] }
 0x21e   : > { %1113 = vmatpush.bf16.msra.mxu0 %v3386_v22 }
 0x21f   : > { %1127 = vmatpush.bf16.msra.mxu1 %v3390_v23 }
 0x222   : > { %1114 = vmatpush.bf16.msra.mxu0 %v3374_v28 }
 0x223   : > { %1128 = vmatpush.bf16.msra.mxu1 %v3378_v31  ;;  %v1198_v31 = vld [vmem:[%s5201_s11 + $0x18] sm:$0xff] }
 0x225   : > { %1115 = vmatmul.bf16.vlgmr.msra.gmra.mxu0 %v5153_v32 }
 0x226   : > { %1129 = vmatmul.bf16.vlgmr.msra.gmra.mxu1 %v5153_v32 }
 0x2a2   : > { %v1116_v34 = vpop.f32.mrf.mxu0 }
 0x2a3   : > { %v1130_v36 = vpop.f32.mrf.mxu1  ;;  %v1150_v37 = vadd.f32 %v1149_v35, %v1116_v34 }
 0x2a4   : > { %v1155_v49 = vadd.f32 %v1154_v39, %v1130_v36 }
 0x2a5   : > { %v1152_v43 = vmul.f32 0.25, %v1150_v37  ;;  %v1199_v37 = vld [vmem:[%s5201_s11 + $0x20] sm:$0xff] }
 0x2a7   : > { %v1173_v54 = vmul.f32 %v5165_v41, %v1152_v43  ;;  %v1176_v55 = vmul.f32 %v5167_v42, %v1152_v43  ;;  %v1179_v56 = vmul.f32 %v5169_v47, %v1152_v43  ;;  %v1182_v57 = vmul.f32 %v5171_v48, %v1152_v43 }
 0x2a8   : > { %v1161_v3 = vmul.f32 %v5173_v53, %v1152_v43  ;;  %v1164_v7 = vmul.f32 %v5185_v5, %v1152_v43  ;;  %v1167_v11 = vmul.f32 %v5189_v9, %v1152_v43  ;;  %v1170_v15 = vmul.f32 %v5193_v13, %v1152_v43 }
 0x2aa   : > { %v1118_v40 = vpop.f32.mrf.mxu0 }
 0x2ab   : > { %v1151_v44 = vadd.f32 %v1149_v35, %v1118_v40  ;;  %v1132_v46 = vpop.f32.mrf.mxu1 }
 0x2ac   : > { %v1156_v50 = vadd.f32 %v1154_v39, %v1132_v46  ;;  %v3465_v46 = vld [vmem:[%s5037_s28 + $0xb0] sm:$0xf] }
 0x2ad   : > { %v1153_v51 = vmul.f32 0.25, %v1151_v44 }
 0x2ae   : > { %v1192_v52 = vpack.c.bf16 %v1156_v50, %v1155_v49  ;;  %v3970_v49 = vld [vmem:[%s5037_s28 + $0xb8] sm:$0xf0] }
 0x2af   : > { %v1174_v58 = vmul.f32 %v5165_v41, %v1153_v51  ;;  %v1177_v59 = vmul.f32 %v5167_v42, %v1153_v51  ;;  %v1180_v60 = vmul.f32 %v5169_v47, %v1153_v51  ;;  %v1183_v61 = vmul.f32 %v5171_v48, %v1153_v51 }
 0x2b0   : > { %1218 = vmatpush.bf16.xpose.msra.mxu3 %v1192_v52  ;;  %v1162_v62 = vmul.f32 %v5173_v53, %v1153_v51  ;;  %v1165_v6 = vmul.f32 %v5185_v5, %v1153_v51  ;;  %v1168_v10 = vmul.f32 %v5189_v9, %v1153_v51  ;;  %v1171_v14 = vmul.f32 %v5193_v13, %v1153_v51  ;;  %v3453_v52 = vld [vmem:[%s5037_s28 + $0x98] sm:$0xf] }
 0x2b1   : > { %v1188_v63 = vpack.c.bf16 %v1174_v58, %v1173_v54  ;;  %v1189_v0 = vpack.c.bf16 %v1177_v59, %v1176_v55  ;;  %v1190_v1 = vpack.c.bf16 %v1180_v60, %v1179_v56  ;;  %v1191_v2 = vpack.c.bf16 %v1183_v61, %v1182_v57  ;;  %v3967_v54 = vld [vmem:[%s5037_s28 + $0xa0] sm:$0xf0]  ;;  %v1203_v56 = vld [vmem:[%s5201_s11 + $0x40] sm:$0xff]  ;;  %v3441_v57 = vld [vmem:[%s5037_s28 + $0x80] sm:$0xf] }
 0x2b2   : > { %v1184_v4 = vpack.c.bf16 %v1162_v62, %v1161_v3  ;;  %v1185_v8 = vpack.c.bf16 %v1165_v6, %v1164_v7  ;;  %v1186_v12 = vpack.c.bf16 %v1168_v10, %v1167_v11  ;;  %v1187_v16 = vpack.c.bf16 %v1171_v14, %v1170_v15  ;;  %v3964_v58 = vld [vmem:[%s5037_s28 + $0x88] sm:$0xf0]  ;;  %v3429_v62 = vld [vmem:[%s5037_s28 + $0x68] sm:$0xf]  ;;  %v3417_v3 = vld [vmem:[%s5037_s28 + $0x50] sm:$0xf] }
 0x2b3   : > { %v3466_v50 = vor.u32 %v3970_v49, %v3465_v46  ;;  %v3454_v55 = vor.u32 %v3967_v54, %v3453_v52  ;;  %v3442_v59 = vor.u32 %v3964_v58, %v3441_v57  ;;  %v3405_v10 = vld [vmem:[%s5037_s28 + $0x38] sm:$0xf]  ;;  %v3955_v11 = vld [vmem:[%s5037_s28 + $0x40] sm:$0xf0]  ;;  %v1207_v49 = vld [vmem:[%s5201_s11 + $0x60] sm:$0xff] }
 0x2b4   : > { %v3406_v14 = vor.u32 %v3955_v11, %v3405_v10  ;;  %v1205_v15 = vld [vmem:[%s5201_s11 + $0x50] sm:$0xff] }
 0x2b5   : > { %1135 = vmatpush.bf16.msra.mxu2 %v3466_v50  ;;  %v1201_v46 = vld [vmem:[%s5201_s11 + $0x30] sm:$0xff] }
 0x2b7   : > { %1219 = vmatmul.bf16.vlgmr.msra.gmra.mxu3 %v1184_v4  ;;  %v3958_v4 = vld [vmem:[%s5037_s28 + $0x58] sm:$0xf0] }
 0x2b8   : > { %v3418_v6 = vor.u32 %v3958_v4, %v3417_v3 }
 0x2b9   : > { %1136 = vmatpush.bf16.msra.mxu2 %v3454_v55  ;;  %v1202_v55 = vld [vmem:[%s5201_s11 + $0x38] sm:$0xff] }
 0x2bd   : > { %1137 = vmatpush.bf16.msra.mxu2 %v3442_v59 }
 0x2c7   : > { %1224 = vmatmul.bf16.gmra.mxu3 %v1185_v8 }
 0x2d7   : > { %1229 = vmatmul.bf16.gmra.mxu3 %v1186_v12 }
 0x2e7   : > { %1234 = vmatmul.bf16.gmra.mxu3 %v1187_v16  ;;  %v3393_v16 = vld [vmem:[%s5037_s28 + $0x20] sm:$0xf] }
 0x2f7   : > { %1239 = vmatmul.bf16.gmra.mxu3 %v1188_v63  ;;  %v3961_v63 = vld [vmem:[%s5037_s28 + $0x70] sm:$0xf0] }
 0x307   : > { %1244 = vmatmul.bf16.gmra.mxu3 %v1189_v0 }
 0x317   : > { %1249 = vmatmul.bf16.gmra.mxu3 %v1190_v1  ;;  %v3430_v1 = vor.u32 %v3961_v63, %v3429_v62  ;;  %v1209_v62 = vld [vmem:[%s5201_s11 + $0x70] sm:$0xff] }
 0x319   : > { %1138 = vmatpush.bf16.msra.mxu2 %v3430_v1 }
 0x31d   : > { %1139 = vmatpush.bf16.msra.mxu2 %v3418_v6 }
 0x321   : > { %1140 = vmatpush.bf16.msra.mxu2 %v3406_v14 }
 0x327   : > { %1254 = vmatmul.bf16.gmra.mxu3 %v1191_v2  ;;  %v1204_v2 = vld [vmem:[%s5201_s11 + $0x48] sm:$0xff] }
 0x33a   : > { %v1220_v18 = vpop.f32.mrf.mxu3 }
 0x33b   : > { %v5204_v19 = vadd.f32 %v1220_v18, %v1195_v17  ;;  %v3952_v17 = vld [vmem:[%s5037_s28 + $0x28] sm:$0xf0] }
 0x33c   : > { %v3394_v18 = vor.u32 %v3952_v17, %v3393_v16 }
 0x33d   : > { %v1261_v20 = vsel %vm1260_vm7, %v5204_v19, -inf }
 0x33e   : > { %1262 = vmax.xlane.f32.xlu0 %v1261_v20  ;;  %1141 = vmatpush.bf16.msra.mxu2 %v3394_v18 }
 0x342   : > { %v1222_v22 = vpop.f32.mrf.mxu3 }
 0x343   : > { %v5209_v23 = vadd.f32 %v1222_v22, %v1196_v21  ;;  %v3381_v22 = vld [vmem:[%s5037_s28 + $0x8] sm:$0xf] }
 0x345   : > { %v1264_v24 = vsel %vm1260_vm7, %v5209_v23, -inf }
 0x346   : > { %1265 = vmax.xlane.f32.xlu0 %v1264_v24  ;;  %v3949_v24 = vld [vmem:[%s5037_s28 + $0x10] sm:$0xf0]  ;;  %s1630_s28 = scalar_select %p1629_p12, 1e-12, 1e-05 }
 0x34a   : > { %v1225_v26 = vpop.f32.mrf.mxu3 }
 0x34b   : > { %v5214_v27 = vadd.f32 %v1225_v26, %v1197_v25  ;;  %v3382_v26 = vor.u32 %v3949_v24, %v3381_v22 }
 0x34d   : > { %v1267_v28 = vsel %vm1260_vm7, %v5214_v27, -inf  ;;  %1142 = vmatpush.bf16.msra.mxu2 %v3382_v26 }
 0x34e   : > { %1268 = vmax.xlane.f32.xlu2 %v1267_v28  ;;  %v1200_v28 = vld [vmem:[%s5201_s11 + $0x28] sm:$0xff] }
 0x350   : > { %1143 = vmatmul.bf16.vlgmr.msra.gmra.mxu2 %v5153_v32 }
 0x352   : > { %v1227_v34 = vpop.f32.mrf.mxu3 }
 0x353   : > { %v5219_v35 = vadd.f32 %v1227_v34, %v1198_v31  ;;  %v1206_v31 = vld [vmem:[%s5201_s11 + $0x58] sm:$0xff] }
 0x355   : > { %v1270_v36 = vsel %vm1260_vm7, %v5219_v35, -inf }
 0x356   : > { %1271 = vmax.xlane.f32.xlu2 %v1270_v36 }
 0x35a   : > { %v1230_v38 = vpop.f32.mrf.mxu3 }
 0x35b   : > { %v5224_v39 = vadd.f32 %v1230_v38, %v1199_v37 }
 0x35d   : > { %v1273_v40 = vsel %vm1260_vm7, %v5224_v39, -inf }
 0x35e   : > { %1274 = vmax.xlane.f32.xlu2 %v1273_v40 }
 0x362   : > { %v1232_v43 = vpop.f32.mrf.mxu3 }
 0x363   : > { %v5263_v34 = vadd.f32 %v1232_v43, %v1200_v28 }
 0x365   : > { %v1276_v40 = vsel %vm1260_vm7, %v5263_v34, -inf }
 0x36a   : > { %v1235_v44 = vpop.f32.mrf.mxu3 }
 0x36b   : > { %v5274_v50 = vadd.f32 %v1235_v44, %v1201_v46 }
 0x36d   : > { %v1279_v54 = vsel %vm1260_vm7, %v5274_v50, -inf }
 0x372   : > { %v5230_v51 = vpop.f32.mrf.mxu3 }
 0x373   : > { %v5285_v57 = vadd.f32 %v5230_v51, %v1202_v55  ;;  %v1210_v51 = vld [vmem:[%s5201_s11 + $0x78] sm:$0xff] }
 0x375   : > { %v1282_v59 = vsel %vm1260_vm7, %v5285_v57, -inf }
 0x37a   : > { %v1240_v60 = vpop.f32.mrf.mxu3 }
 0x37b   : > { %v5237_v61 = vadd.f32 %v1240_v60, %v1203_v56  ;;  %v1208_v56 = vld [vmem:[%s5201_s11 + $0x68] sm:$0xff] }
 0x37d   : > { %v1285_v0 = vsel %vm1260_vm7, %v5237_v61, -inf }
 0x37e   : > { %1286 = vmax.xlane.f32.xlu1 %v1285_v0 }
 0x382   : > { %v1242_v7 = vpop.f32.mrf.mxu3 }
 0x383   : > { %v5246_v8 = vadd.f32 %v1242_v7, %v1204_v2 }
 0x385   : > { %v1288_v12 = vsel %vm1260_vm7, %v5246_v8, -inf }
 0x386   : > { %1289 = vmax.xlane.f32.xlu1 %v1288_v12 }
 0x38a   : > { %v1245_v20 = vpop.f32.mrf.mxu3 }
 0x38b   : > { %v5255_v21 = vadd.f32 %v1245_v20, %v1205_v15 }
 0x38d   : > { %v1291_v25 = vsel %vm1260_vm7, %v5255_v21, -inf }
 0x38e   : > { %1292 = vmax.xlane.f32.xlu0 %v1291_v25 }
 0x392   : > { %v1247_v36 = vpop.f32.mrf.mxu3 }
 0x393   : > { %v5266_v37 = vadd.f32 %v1247_v36, %v1206_v31 }
 0x395   : > { %v1294_v38 = vsel %vm1260_vm7, %v5266_v37, -inf }
 0x396   : > { %1295 = vmax.xlane.f32.xlu1 %v1294_v38  ;;  %1277 = vmax.xlane.f32.xlu0 %v1276_v40 }
 0x39a   : > { %v1250_v43 = vpop.f32.mrf.mxu3 }
 0x39b   : > { %v5276_v52 = vadd.f32 %v1250_v43, %v1207_v49 }
 0x39d   : > { %v1297_v32 = vsel %vm1260_vm7, %v5276_v52, -inf }
 0x39e   : > { %1298 = vmax.xlane.f32.xlu1 %v1297_v32  ;;  %1280 = vmax.xlane.f32.xlu0 %v1279_v54 }
 0x3a2   : > { %v1252_v44 = vpop.f32.mrf.mxu3 }
 0x3a3   : > { %v5287_v58 = vadd.f32 %v1252_v44, %v1208_v56 }
 0x3a5   : > { %v1300_v60 = vsel %vm1260_vm7, %v5287_v58, -inf }
 0x3a6   : > { %1283 = vmax.xlane.f32.xlu1 %v1282_v59  ;;  %1301 = vmax.xlane.f32.xlu2 %v1300_v60 }
 0x3aa   : > { %v1255_v63 = vpop.f32.mrf.mxu3 }
 0x3ab   : > { %v5294_v0 = vadd.f32 %v1255_v63, %v1209_v62 }
 0x3ad   : > { %v1303_v1 = vsel %vm1260_vm7, %v5294_v0, -inf }
 0x3ae   : > { %1304 = vmax.xlane.f32.xlu2 %v1303_v1 }
 0x3b1   : > { %v1263_v2 = vpop.xlane.xlu0 %1262 }
 0x3b2   : > { %v1309_v3 = vsub.f32 %v5204_v19, %v1263_v2  ;;  %v1257_v4 = vpop.f32.mrf.mxu3 }
 0x3b3   : > { %v5300_v6 = vadd.f32 %v1257_v4, %v1210_v51 }
 0x3b4   : > { %v1325_v7 = vmul.f32 1.442695, %v1309_v3 }
 0x3b5   : > { %v1306_v10 = vsel %vm1260_vm7, %v5300_v6, -inf }
 0x3b6   : > { %4225 = vpow2.f32 %v1325_v7  ;;  %1307 = vmax.xlane.f32.xlu0 %v1306_v10 }
 0x3b9   : > { %v1266_v11 = vpop.xlane.xlu0 %1265 }
 0x3ba   : > { %v1310_v12 = vsub.f32 %v5209_v23, %v1266_v11 }
 0x3bc   : > { %v5305_v14 = vpop.eup %4225  ;;  %v1327_v15 = vmul.f32 1.442695, %v1310_v12 }
 0x3bd   : > { %v1357_v16 = vsel %vm1260_vm7, %v5305_v14, 0.0 }
 0x3be   : > { %4227 = vpow2.f32 %v1327_v15  ;;  %1358 = vadd.xlane.f32.xlu1 %v1357_v16 }
 0x3c1   : > { %v1269_v19 = vpop.xlane.xlu2 %1268 }
 0x3c2   : > { %v1311_v17 = vsub.f32 %v5214_v27, %v1269_v19 }
 0x3c4   : > { %v5310_v18 = vpop.eup %4227  ;;  %v1329_v20 = vmul.f32 1.442695, %v1311_v17 }
 0x3c5   : > { %v1360_v22 = vsel %vm1260_vm7, %v5310_v18, 0.0 }
 0x3c6   : > { %4229 = vpow2.f32 %v1329_v20  ;;  %1361 = vadd.xlane.f32.xlu2 %v1360_v22 }
 0x3c9   : > { %v1272_v25 = vpop.xlane.xlu2 %1271 }
 0x3ca   : > { %v1312_v27 = vsub.f32 %v5219_v35, %v1272_v25 }
 0x3cc   : > { %v5314_v23 = vpop.eup %4229  ;;  %v1331_v36 = vmul.f32 1.442695, %v1312_v27 }
 0x3cd   : > { %v1363_v24 = vsel %vm1260_vm7, %v5314_v23, 0.0 }
 0x3ce   : > { %1364 = vadd.xlane.f32.xlu2 %v1363_v24 }
 0x3d1   : > { %v1275_v38 = vpop.xlane.xlu2 %1274 }
 0x3d2   : > { %v1313_v43 = vsub.f32 %v5224_v39, %v1275_v38 }
 0x3d3   : > { %v1144_v22 = vpop.f32.mrf.mxu2 }
 0x3f1   : > { %v1287_v26 = vpop.xlane.xlu1 %1286 }
 0x3f2   : > { %v1317_v28 = vsub.f32 %v5237_v61, %v1287_v26  ;;  %v1333_v61 = vmul.f32 1.442695, %v1313_v43  ;;  %v1146_v43 = vpop.f32.mrf.mxu2 }
 0x3f4   : > { %v1341_v31 = vmul.f32 1.442695, %v1317_v28 }
 0x3f6   : > { %4231 = vpow2.f32 %v1341_v31 }
 0x3f7   : > { %4233 = vpow2.f32 %v1331_v36 }
 0x3f9   : > { %v1290_v40 = vpop.xlane.xlu1 %1289 }
 0x3fa   : > { %v1318_v46 = vsub.f32 %v5246_v8, %v1290_v40 }
 0x3fc   : > { %v5321_v49 = vpop.eup %4231  ;;  %v1343_v32 = vmul.f32 1.442695, %v1318_v46 }
 0x3fd   : > { %v1381_v54 = vsel %vm1260_vm7, %v5321_v49, 0.0  ;;  %v5326_v55 = vpop.eup %4233 }
 0x3fe   : > { %4235 = vpow2.f32 %v1343_v32  ;;  %1382 = vadd.xlane.f32.xlu0 %v1381_v54  ;;  %v1366_v59 = vsel %vm1260_vm7, %v5326_v55, 0.0 }
 0x3ff   : > { %4237 = vpow2.f32 %v1333_v61 }
 0x401   : > { %v1293_v35 = vpop.xlane.xlu0 %1292 }
 0x402   : > { %v1319_v56 = vsub.f32 %v5255_v21, %v1293_v35 }
 0x404   : > { %v5329_v44 = vpop.eup %4235  ;;  %v1345_v8 = vmul.f32 1.442695, %v1319_v56 }
 0x405   : > { %v1384_v39 = vsel %vm1260_vm7, %v5329_v44, 0.0  ;;  %v5335_v63 = vpop.eup %4237 }
 0x406   : > { %4239 = vpow2.f32 %v1345_v8  ;;  %1367 = vadd.xlane.f32.xlu0 %v1366_v59  ;;  %1385 = vadd.xlane.f32.xlu1 %v1384_v39  ;;  %v1369_v4 = vsel %vm1260_vm7, %v5335_v63, 0.0 }
 0x409   : > { %v1296_v60 = vpop.xlane.xlu1 %1295  ;;  %v1278_v62 = vpop.xlane.xlu0 %1277 }
 0x40a   : > { %v1320_v1 = vsub.f32 %v5266_v37, %v1296_v60  ;;  %v1314_v21 = vsub.f32 %v5263_v34, %v1278_v62 }
 0x40c   : > { %v5339_v51 = vpop.eup %4239  ;;  %v1347_v2 = vmul.f32 1.442695, %v1320_v1  ;;  %v1335_v3 = vmul.f32 1.442695, %v1314_v21 }
 0x40d   : > { %v1387_v7 = vsel %vm1260_vm7, %v5339_v51, 0.0 }
 0x40e   : > { %4241 = vpow2.f32 %v1347_v2  ;;  %1370 = vadd.xlane.f32.xlu0 %v1369_v4  ;;  %1388 = vadd.xlane.f32.xlu1 %v1387_v7 }
 0x40f   : > { %4243 = vpow2.f32 %v1335_v3 }
 0x411   : > { %v1299_v10 = vpop.xlane.xlu1 %1298  ;;  %v1281_v11 = vpop.xlane.xlu0 %1280 }
 0x412   : > { %v1321_v37 = vsub.f32 %v5276_v52, %v1299_v10  ;;  %v1315_v34 = vsub.f32 %v5274_v50, %v1281_v11  ;;  %v1157_v50 = vperm.slane %v5158_v33, 2 }
 0x414   : > { %v5347_v12 = vpop.eup %4241  ;;  %v1349_v15 = vmul.f32 1.442695, %v1321_v37  ;;  %v1337_v16 = vmul.f32 1.442695, %v1315_v34  ;;  %v1158_v40 = vadd.f32 %v1157_v50, %v1144_v22 }
 0x415   : > { %v5349_v19 = vpop.eup %4243  ;;  %v1390_v17 = vsel %vm1260_vm7, %v5347_v12, 0.0 }
 0x416   : > { %4245 = vpow2.f32 %v1349_v15  ;;  %1391 = vadd.xlane.f32.xlu2 %v1390_v17  ;;  %v1372_v20 = vsel %vm1260_vm7, %v5349_v19, 0.0 }
 0x417   : > { %4247 = vpow2.f32 %v1337_v16  ;;  %1373 = vadd.xlane.f32.xlu1 %v1372_v20 }
 0x419   : > { %v1284_v52 = vpop.xlane.xlu1 %1283  ;;  %v1302_v24 = vpop.xlane.xlu2 %1301 }
 0x41a   : > { %v1316_v25 = vsub.f32 %v5285_v57, %v1284_v52  ;;  %v1322_v26 = vsub.f32 %v5287_v58, %v1302_v24  ;;  %v1159_v57 = vadd.f32 %v1157_v50, %v1146_v43 }
 0x41c   : > { %v5358_v28 = vpop.eup %4245  ;;  %v1339_v27 = vmul.f32 1.442695, %v1316_v25  ;;  %v1351_v31 = vmul.f32 1.442695, %v1322_v26  ;;  %v1445_v32 = vpack.c.bf16 %v1159_v57, %v1158_v40 }
 0x41d   : > { %v5360_v36 = vpop.eup %4247  ;;  %v1393_v38 = vsel %vm1260_vm7, %v5358_v28, 0.0 }
 0x41e   : > { %4249 = vpow2.f32 %v1339_v27  ;;  %1394 = vadd.xlane.f32.xlu2 %v1393_v38  ;;  %v1375_v46 = vsel %vm1260_vm7, %v5360_v36, 0.0  ;;  %1477 = vmatpush.bf16.msrb.mxu0 %v1445_v32 }
 0x41f   : > { %4251 = vpow2.f32 %v1351_v31  ;;  %1376 = vadd.xlane.f32.xlu1 %v1375_v46  ;;  %4083 = vmatpush.bf16.msrb.mxu2 %v1445_v32 }
 0x421   : > { %v1305_v58 = vpop.xlane.xlu2 %1304 }
 0x422   : > { %v1323_v54 = vsub.f32 %v5294_v0, %v1305_v58 }
 0x424   : > { %v5367_v61 = vpop.eup %4249  ;;  %v1353_v35 = vmul.f32 1.442695, %v1323_v54 }
 0x425   : > { %v5369_v56 = vpop.eup %4251  ;;  %v1378_v8 = vsel %vm1260_vm7, %v5367_v61, 0.0 }
 0x426   : > { %4253 = vpow2.f32 %v1353_v35  ;;  %v1396_v59 = vsel %vm1260_vm7, %v5369_v56, 0.0  ;;  %1379 = vadd.xlane.f32.xlu2 %v1378_v8 }
 0x427   : > { %1397 = vadd.xlane.f32.xlu0 %v1396_v59 }
 0x429   : > { %v1308_v39 = vpop.xlane.xlu0 %1307 }
 0x42a   : > { %v1324_v60 = vsub.f32 %v5300_v6, %v1308_v39 }
 0x42c   : > { %v5376_v0 = vpop.eup %4253  ;;  %v1355_v62 = vmul.f32 1.442695, %v1324_v60 }
 0x42d   : > { %v1399_v1 = vsel %vm1260_vm7, %v5376_v0, 0.0 }
 0x42e   : > { %4255 = vpow2.f32 %v1355_v62 }
 0x42f   : > { %1400 = vadd.xlane.f32.xlu0 %v1399_v1 }
 0x431   : > { %v1359_v2 = vpop.xlane.xlu1 %1358 }
 0x432   : > { %4257 = vrcp.f32 %v1359_v2 }
 0x434   : > { %v5380_v21 = vpop.eup %4255 }
 0x435   : > { %v1402_v3 = vsel %vm1260_vm7, %v5380_v21, 0.0 }
 0x436   : > { %1403 = vadd.xlane.f32.xlu1 %v1402_v3 }
 0x438   : > { %v4258_v7 = vpop.eup %4257 }
 0x439   : > { %v1362_v4 = vpop.xlane.xlu2 %1361  ;;  %v1421_v10 = vmul.f32 %v4258_v7, %v5305_v14 }
 0x43a   : > { %4259 = vrcp.f32 %v1362_v4 }
 0x440   : > { %v4260_v6 = vpop.eup %4259 }
 0x441   : > { %v1422_v11 = vmul.f32 %v4260_v6, %v5310_v18  ;;  %v1365_v15 = vpop.xlane.xlu2 %1364 }
 0x443   : > { %v1437_v37 = vpack.c.bf16 %v1422_v11, %v1421_v10 }
 0x445   : > { %3468 = vmatmul.msk.bf16.vlgmr.msrb.gmra.mxu0 %vm1260_vm7, %v1437_v37 }
 0x471   : > { %v1383_v34 = vpop.xlane.xlu0 %1382 }
 0x472   : > { %4261 = vrcp.f32 %v1383_v34 }
 0x473   : > { %4263 = vrcp.f32 %v1365_v15 }
 0x478   : > { %v4262_v20 = vpop.eup %4261 }
 0x479   : > { %v1386_v16 = vpop.xlane.xlu1 %1385  ;;  %v1368_v17 = vpop.xlane.xlu0 %1367  ;;  %v1429_v50 = vmul.f32 %v4262_v20, %v5321_v49 }
 0x47a   : > { %4265 = vrcp.f32 %v1386_v16  ;;  %v4264_v22 = vpop.eup %4263  ;;  %v3978_v16 = vld [vmem:[%s5044_s10 + $0x38] sm:$0xff] }
 0x47b   : > { %4267 = vrcp.f32 %v1368_v17  ;;  %v1423_v25 = vmul.f32 %v4264_v22, %v5314_v23  ;;  %1615 = vmatpush.bf16.msrb.mxu1 %v3978_v16  ;;  %v3977_v22 = vld [vmem:[%s5044_s10 + $0x30] sm:$0xff]  ;;  %v4660_v16 = vmov 128.0  }
 0x47f   : > { %1616 = vmatpush.bf16.msrb.mxu1 %v3977_v22 }
 0x480   : > { %v4266_v52 = vpop.eup %4265 }
 0x481   : > { %v4268_v24 = vpop.eup %4267  ;;  %v1430_v14 = vmul.f32 %v4266_v52, %v5329_v44  ;;  %v1389_v18 = vpop.xlane.xlu1 %1388 }
 0x482   : > { %v1424_v26 = vmul.f32 %v4268_v24, %v5326_v55  ;;  %v1371_v38 = vpop.xlane.xlu0 %1370  ;;  %4269 = vrcp.f32 %v1389_v18  ;;  %v3975_v24 = vld [vmem:[%s5044_s10 + $0x20] sm:$0xff] }
 0x483   : > { %v1441_v27 = vpack.c.bf16 %v1430_v14, %v1429_v50  ;;  %4271 = vrcp.f32 %v1371_v38  ;;  %v3974_v50 = vld [vmem:[%s5044_s10 + $0x18] sm:$0xff] }
 0x484   : > { %v1438_v31 = vpack.c.bf16 %v1424_v26, %v1423_v25  ;;  %v3973_v25 = vld [vmem:[%s5044_s10 + $0x10] sm:$0xff]  ;;  %v3972_v26 = vld [vmem:[%s5044_s10 + $0x8] sm:$0xff] }
 0x485   : > { %3472 = vmatmul.msk.bf16.vlgmr.msrb.gmra.mxu2 %vm1260_vm7, %v1441_v27 }
 0x486   : > { %3469 = vmatmul.msk.bf16.gmra.mxu0 %vm1260_vm7, %v1438_v31  ;;  %v3971_v31 = vld [vmem:[%s5044_s10] sm:$0xff] }
 0x488   : > { %v4270_v49 = vpop.eup %4269 }
 0x489   : > { %v1392_v40 = vpop.xlane.xlu2 %1391  ;;  %v4272_v44 = vpop.eup %4271  ;;  %v1431_v55 = vmul.f32 %v4270_v49, %v5339_v51 }
 0x48a   : > { %4273 = vrcp.f32 %v1392_v40  ;;  %v1374_v46 = vpop.xlane.xlu1 %1373  ;;  %v1425_v32 = vmul.f32 %v4272_v44, %v5335_v63 }
 0x48b   : > { %4275 = vrcp.f32 %v1374_v46 }
 0x490   : > { %v4274_v43 = vpop.eup %4273 }
 0x491   : > { %v4276_v57 = vpop.eup %4275  ;;  %v1395_v23 = vpop.xlane.xlu2 %1394  ;;  %v1432_v58 = vmul.f32 %v4274_v43, %v5347_v12 }
 0x492   : > { %v1426_v54 = vmul.f32 %v4276_v57, %v5349_v19  ;;  %v1377_v59 = vpop.xlane.xlu1 %1376 }
 0x493   : > { %v1442_v35 = vpack.c.bf16 %v1432_v58, %v1431_v55  ;;  %4277 = vrcp.f32 %v1377_v59 }
 0x494   : > { %v1439_v8 = vpack.c.bf16 %v1426_v54, %v1425_v32  ;;  %4279 = vrcp.f32 %v1395_v23 }
 0x495   : > { %3473 = vmatmul.msk.bf16.gmra.mxu2 %vm1260_vm7, %v1442_v35 }
 0x496   : > { %3470 = vmatmul.msk.bf16.gmra.mxu0 %vm1260_vm7, %v1439_v8 }
 0x499   : > { %v1380_v39 = vpop.xlane.xlu2 %1379  ;;  %v4278_v51 = vpop.eup %4277 }
 0x49a   : > { %4281 = vrcp.f32 %v1380_v39  ;;  %v1398_v60 = vpop.xlane.xlu0 %1397  ;;  %v4280_v62 = vpop.eup %4279  ;;  %v1427_v63 = vmul.f32 %v4278_v51, %v5360_v36 }
 0x49b   : > { %4283 = vrcp.f32 %v1398_v60  ;;  %v1433_v2 = vmul.f32 %v4280_v62, %v5358_v28 }
 0x4a0   : > { %v4282_v12 = vpop.eup %4281 }
 0x4a1   : > { %v4284_v1 = vpop.eup %4283  ;;  %v1428_v19 = vmul.f32 %v4282_v12, %v5367_v61 }
 0x4a2   : > { %v1434_v3 = vmul.f32 %v4284_v1, %v5369_v56  ;;  %v1401_v6 = vpop.xlane.xlu0 %1400 }
 0x4a3   : > { %v1440_v4 = vpack.c.bf16 %v1428_v19, %v1427_v63  ;;  %4285 = vrcp.f32 %v1401_v6 }
 0x4a4   : > { %v1443_v7 = vpack.c.bf16 %v1434_v3, %v1433_v2 }
 0x4a6   : > { %3471 = vmatmul.msk.bf16.gmra.mxu0 %vm1260_vm7, %v1440_v4  ;;  %3474 = vmatmul.msk.bf16.gmra.mxu2 %vm1260_vm7, %v1443_v7 }
 0x4a9   : > { %v1404_v10 = vpop.xlane.xlu1 %1403  ;;  %v4286_v36 = vpop.eup %4285 }
 0x4aa   : > { %4287 = vrcp.f32 %v1404_v10  ;;  %v1435_v61 = vmul.f32 %v4286_v36, %v5376_v0  ;;  %v3976_v0 = vld [vmem:[%s5044_s10 + $0x28] sm:$0xff] }
 0x4ab   : > { %1617 = vmatpush.bf16.msrb.mxu1 %v3976_v0  ;;  %4289 = vrcp.f32 %v4660_v16 }
 0x4af   : > { %1618 = vmatpush.bf16.msrb.mxu1 %v3975_v24 }
 0x4b0   : > { %v4288_v11 = vpop.eup %4287 }
 0x4b1   : > { %v1436_v28 = vmul.f32 %v4288_v11, %v5380_v21 }
 0x4b3   : > { %v1444_v56 = vpack.c.bf16 %v1436_v28, %v1435_v61  ;;  %1619 = vmatpush.bf16.msrb.mxu1 %v3974_v50  ;;  %v1566_v28 = vperm.slane %v5158_v33, 3 }
 0x4b6   : > { %3475 = vmatmul.msk.bf16.gmra.mxu2 %vm1260_vm7, %v1444_v56 }
 0x4b7   : > { %1620 = vmatpush.bf16.msrb.mxu1 %v3973_v25 }
 0x4bb   : > { %1621 = vmatpush.bf16.msrb.mxu1 %v3972_v26  ;;  %v1656_v26 = vstv %s1630_s28 }
 0x4bf   : > { %1622 = vmatpush.bf16.msrb.mxu1 %v3971_v31 }
 0x4c2   : > { %v1479_v37 = vpop.f32.mrf.mxu0 }
 0x4c3   : > { %v1519_v43 = vmul.f32 %v1479_v37, %v5173_v53 }
 0x4ca   : > { %v1481_v34 = vpop.f32.mrf.mxu0 }
 0x4cb   : > { %v1520_v57 = vmul.f32 %v1481_v34, %v5173_v53 }
 0x503   : > { %v1484_v15 = vpop.f32.mrf.mxu0 }
 0x504   : > { %v1521_v46 = vmul.f32 %v1484_v15, %v5185_v5 }
 0x506   : > { %v1523_v32 = vadd.f32 %v1521_v46, %v1519_v43 }
 0x508   : > { %v1499_v17 = vpop.f32.mrf.mxu2 }
 0x509   : > { %v1533_v51 = vmul.f32 %v1499_v17, %v5165_v41  ;;  %v4290_v17 = vpop.eup %4289 }
 0x50a   : > { %vm1642_vm8 = vweird.f32 %v4290_v17 }
 0x50b   : > { %v1486_v20 = vpop.f32.mrf.mxu0 }
 0x50c   : > { %v1522_v49 = vmul.f32 %v1486_v20, %v5185_v5 }
 0x50e   : > { %v1524_v54 = vadd.f32 %v1522_v49, %v1520_v57 }
 0x510   : > { %v1501_v52 = vpop.f32.mrf.mxu2 }
 0x511   : > { %v1534_v62 = vmul.f32 %v1501_v52, %v5165_v41 }
 0x513   : > { %v1489_v21 = vpop.f32.mrf.mxu0 }
 0x514   : > { %v1525_v23 = vmul.f32 %v1489_v21, %v5189_v9 }
 0x516   : > { %v1527_v59 = vadd.f32 %v1525_v23, %v1523_v32 }
 0x518   : > { %v1504_v14 = vpop.f32.mrf.mxu2 }
 0x51b   : > { %v1491_v18 = vpop.f32.mrf.mxu0 }
 0x51c   : > { %v1526_v55 = vmul.f32 %v1491_v18, %v5189_v9  ;;  %v1537_v9 = vmul.f32 %v1504_v14, %v5167_v42 }
 0x51e   : > { %v1528_v39 = vadd.f32 %v1526_v55, %v1524_v54 }
 0x520   : > { %v1506_v27 = vpop.f32.mrf.mxu2 }
 0x521   : > { %v1538_v63 = vmul.f32 %v1506_v27, %v5167_v42 }
 0x523   : > { %v1494_v38 = vpop.f32.mrf.mxu0 }
 0x524   : > { %v1529_v35 = vmul.f32 %v1494_v38, %v5193_v13 }
 0x526   : > { %v1531_v60 = vadd.f32 %v1529_v35, %v1527_v59 }
 0x528   : > { %v1535_v12 = vadd.f32 %v1533_v51, %v1531_v60  ;;  %v1681_v60 = vperm.slane %v5158_v33, 4 }
 0x529   : > { %v1509_v40 = vpop.f32.mrf.mxu2 }
 0x52a   : > { %v1539_v19 = vadd.f32 %v1537_v9, %v1535_v12  ;;  %v1541_v2 = vmul.f32 %v1509_v40, %v5169_v47 }
 0x52b   : > { %v1496_v44 = vpop.f32.mrf.mxu0 }
 0x52c   : > { %v1530_v8 = vmul.f32 %v1496_v44, %v5193_v13  ;;  %v1543_v6 = vadd.f32 %v1541_v2, %v1539_v19 }
 0x52e   : > { %v1532_v5 = vadd.f32 %v1530_v8, %v1528_v39 }
 0x530   : > { %v1536_v1 = vadd.f32 %v1534_v62, %v1532_v5 }
 0x531   : > { %v1511_v58 = vpop.f32.mrf.mxu2 }
 0x532   : > { %v1540_v3 = vadd.f32 %v1538_v63, %v1536_v1  ;;  %v1542_v13 = vmul.f32 %v1511_v58, %v5169_v47 }
 0x534   : > { %v1544_v10 = vadd.f32 %v1542_v13, %v1540_v3 }
 0x539   : > { %v1514_v53 = vpop.f32.mrf.mxu2 }
 0x53a   : > { %v1545_v4 = vmul.f32 %v1514_v53, %v5171_v48  ;;  %v1684_v53 = vperm.slane %v5158_v33, 5 }
 0x53c   : > { %v1547_v36 = vadd.f32 %v1545_v4, %v1543_v6 }
 0x541   : > { %v1516_v7 = vpop.f32.mrf.mxu2 }
 0x542   : > { %v1546_v41 = vmul.f32 %v1516_v7, %v5171_v48  ;;  %v1638_v48 = vmul.f32 128.0, %v4290_v17 }
 0x544   : > { %v1548_v11 = vadd.f32 %v1546_v41, %v1544_v10  ;;  %v1639_v20 = vsub.f32 1.0, %v1638_v48 }
 0x546   : > { %v1549_v61 = vpack.c.bf16 %v1548_v11, %v1547_v36  ;;  %v1640_v22 = vmul.f32 %v4290_v17, %v1639_v20 }
 0x548   : > { %1623 = vmatmul.bf16.vlgmr.msrb.gmra.mxu1 %v1549_v61  ;;  %v1641_v0 = vadd.f32 %v4290_v17, %v1640_v22 }
 0x54a   : > { %v5435_v52 = vsel %vm1642_vm8, %v4290_v17, %v1641_v0 }
 0x5c5   : > { %v1624_v42 = vpop.f32.mrf.mxu1 }
 0x5c6   : > { %v1625_v56 = vadd.f32 %v1624_v42, %v1566_v28 }
 0x5c8   : > { %v1631_v37 = vadd.f32 %v1625_v56, %v5147_v29 }
 0x5ca   : > { %1633 = vadd.xlane.f32.xlu2 %v1631_v37 }
 0x5cd   : > { %v1626_v34 = vpop.f32.mrf.mxu1 }
 0x5ce   : > { %v1627_v47 = vadd.f32 %v1626_v34, %v1566_v28 }
 0x5d0   : > { %v1632_v15 = vadd.f32 %v1627_v47, %v5149_v30 }
 0x5d2   : > { %1635 = vadd.xlane.f32.xlu0 %v1632_v15 }
 0x63d   : > { %v1634_v21 = vpop.xlane.xlu2 %1633 }
 0x63e   : > { %v1644_v29 = vmul.f32 %v5435_v52, %v1634_v21 }
 0x640   : > { %v1646_v24 = vsub.f32 %v1631_v37, %v1644_v29 }
 0x642   : > { %v1648_v50 = vmul.f32 %v1646_v24, %v1646_v24 }
 0x644   : > { %1650 = vadd.xlane.f32.xlu1 %v1648_v50 }
 0x645   : > { %v1636_v14 = vpop.xlane.xlu0 %1635 }
 0x646   : > { %v1645_v30 = vmul.f32 %v5435_v52, %v1636_v14 }
 0x648   : > { %v1647_v18 = vsub.f32 %v1632_v15, %v1645_v30 }
 0x64a   : > { %v1649_v25 = vmul.f32 %v1647_v18, %v1647_v18 }
 0x64c   : > { %1652 = vadd.xlane.f32.xlu2 %v1649_v25 }
 0x6b7   : > { %v1651_v27 = vpop.xlane.xlu1 %1650 }
 0x6b8   : > { %v1654_v31 = vmul.f32 %v1651_v27, %v5435_v52 }
 0x6ba   : > { %v1657_v38 = vadd.f32 %v1656_v26, %v1654_v31 }
 0x6bc   : > { %4291 = vrsqrt.f32 %v1657_v38  ;;  %vm1665_vm10 = vweird.f32 %v1657_v38 }
 0x6bf   : > { %v1653_v40 = vpop.xlane.xlu2 %1652 }
 0x6c0   : > { %v1655_v46 = vmul.f32 %v1653_v40, %v5435_v52 }
 0x6c2   : > { %v4292_v49 = vpop.eup %4291  ;;  %v1658_v44 = vadd.f32 %v1656_v26, %v1655_v46 }
 0x6c3   : > { %v1660_v43 = vmul.f32 %v4292_v49, %v1657_v38  ;;  %vm1666_vm9 = vweird.f32 %v4292_v49 }
 0x6c4   : > { %4293 = vrsqrt.f32 %v1658_v44  ;;  %vm1667_vm11 = vmor %vm1665_vm10, %vm1666_vm9  ;;  %vm1675_vm13 = vweird.f32 %v1658_v44 }
 0x6c5   : > { %v1661_v57 = vmul.f32 %v4292_v49, %v1660_v43 }
 0x6c7   : > { %v1662_v23 = vmul.f32 0.5, %v1661_v57 }
 0x6c9   : > { %v1663_v55 = vsub.f32 1.5, %v1662_v23 }
 0x6ca   : > { %v4294_v58 = vpop.eup %4293 }
 0x6cb   : > { %v1664_v32 = vmul.f32 %v4292_v49, %v1663_v55  ;;  %v1670_v54 = vmul.f32 %v4294_v58, %v1658_v44  ;;  %vm1676_vm12 = vweird.f32 %v4294_v58 }
 0x6cc   : > { %vm1677_vm14 = vmor %vm1675_vm13, %vm1676_vm12 }
 0x6cd   : > { %v1671_v35 = vmul.f32 %v4294_v58, %v1670_v54  ;;  %v1668_v8 = vsel %vm1667_vm11, %v4292_v49, %v1664_v32 }
 0x6ce   : > { %v1679_v5 = vmul.f32 %v1668_v8, %v1646_v24 }
 0x6cf   : > { %v1672_v59 = vmul.f32 0.5, %v1671_v35 }
 0x6d0   : > { %v1682_v12 = vmul.f32 %v1681_v60, %v1679_v5 }
 0x6d1   : > { %v1673_v39 = vsub.f32 1.5, %v1672_v59 }
 0x6d2   : > { %v5444_v63 = vadd.f32 %v1684_v53, %v1682_v12 }
 0x6d3   : > { %v1674_v51 = vmul.f32 %v4294_v58, %v1673_v39 }
 0x6d5   : > { %v1678_v62 = vsel %vm1677_vm14, %v4294_v58, %v1674_v51 }
 0x6d6   : > { %v1680_v1 = vmul.f32 %v1678_v62, %v1647_v18 }
 0x6d8   : > { %v1683_v9 = vmul.f32 %v1681_v60, %v1680_v1  ;;  %1690 = sbr.rel (%p3508_p9) target bundleno = 2434 (0x982), region = 116 }
 0x6da   : > { %v5446_v19 = vadd.f32 %v1684_v53, %v1683_v9 }
 0x6dc   : > { %v5450_v2 = vpack.c.bf16 %v5446_v19, %v5444_v63 }
 0x6dd   : > { %v3623_v3 = vld [vmem:[%s5051_s3 + $0xe0] sm:$0xf]  ;;  %v4009_v13 = vld [vmem:[%s5051_s3 + $0xec] sm:$0xf0]  ;;  %v4007_v4 = vld [vmem:[%s5051_s3 + $0xe4] sm:$0xf] }
 0x6de   : > { %v3624_v7 = vor.u32 %v4009_v13, %v3623_v3  ;;  %v3625_v6 = vld [vmem:[%s5051_s3 + $0xf0] sm:$0xf0]  ;;  %v3631_v10 = vld [vmem:[%s5051_s3 + $0xe8] sm:$0xf]  ;;  %v4010_v41 = vld [vmem:[%s5051_s3 + $0xf4] sm:$0xf0] }
 0x6df   : > { %v3628_v36 = vor.u32 %v4007_v4, %v3625_v6  ;;  %v3632_v11 = vor.u32 %v4010_v41, %v3631_v10  ;;  %v4008_v61 = vld [vmem:[%s5051_s3 + $0xec] sm:$0xf]  ;;  %v3633_v28 = vld [vmem:[%s5051_s3 + $0xf8] sm:$0xf0]  ;;  %v3607_v42 = vld [vmem:[%s5051_s3 + $0xc0] sm:$0xf] }
 0x6e0   : > { %1893 = vmatpush.bf16.msra.mxu0 %v3624_v7  ;;  %v3636_v56 = vor.u32 %v4008_v61, %v3633_v28  ;;  %v4005_v37 = vld [vmem:[%s5051_s3 + $0xcc] sm:$0xf0]  ;;  %v4003_v34 = vld [vmem:[%s5051_s3 + $0xc4] sm:$0xf]  ;;  %v3609_v47 = vld [vmem:[%s5051_s3 + $0xd0] sm:$0xf0] }
 0x6e1   : > { %1907 = vmatpush.bf16.msra.mxu1 %v3628_v36  ;;  %1921 = vmatpush.bf16.msra.mxu2 %v3632_v11  ;;  %v3608_v15 = vor.u32 %v4005_v37, %v3607_v42  ;;  %v3612_v16 = vor.u32 %v4003_v34, %v3609_v47  ;;  %v3615_v17 = vld [vmem:[%s5051_s3 + $0xc8] sm:$0xf]  ;;  %v4006_v48 = vld [vmem:[%s5051_s3 + $0xd4] sm:$0xf0]  ;;  %v4004_v20 = vld [vmem:[%s5051_s3 + $0xcc] sm:$0xf] }
 0x6e2   : > { %1935 = vmatpush.bf16.msra.mxu3 %v3636_v56  ;;  %v3616_v22 = vor.u32 %v4006_v48, %v3615_v17  ;;  %v3617_v0 = vld [vmem:[%s5051_s3 + $0xd8] sm:$0xf0]  ;;  %v3591_v21 = vld [vmem:[%s5051_s3 + $0xa0] sm:$0xf]  ;;  %v4001_v29 = vld [vmem:[%s5051_s3 + $0xac] sm:$0xf0] }
 0x6e3   : > { %v3620_v24 = vor.u32 %v4004_v20, %v3617_v0  ;;  %v3999_v50 = vld [vmem:[%s5051_s3 + $0xa4] sm:$0xf]  ;;  %v3593_v14 = vld [vmem:[%s5051_s3 + $0xb0] sm:$0xf0]  ;;  %v3599_v30 = vld [vmem:[%s5051_s3 + $0xa8] sm:$0xf]  ;;  %v3592_v18 = vor.u32 %v4001_v29, %v3591_v21 }
 0x6e4   : > { %1894 = vmatpush.bf16.msra.mxu0 %v3608_v15  ;;  %v4002_v25 = vld [vmem:[%s5051_s3 + $0xb4] sm:$0xf0]  ;;  %v4000_v26 = vld [vmem:[%s5051_s3 + $0xac] sm:$0xf]  ;;  %v3601_v27 = vld [vmem:[%s5051_s3 + $0xb8] sm:$0xf0]  ;;  %v3596_v31 = vor.u32 %v3999_v50, %v3593_v14 }
 0x6e5   : > { %1908 = vmatpush.bf16.msra.mxu1 %v3612_v16  ;;  %1922 = vmatpush.bf16.msra.mxu2 %v3616_v22  ;;  %v3600_v38 = vor.u32 %v4002_v25, %v3599_v30  ;;  %v3575_v40 = vld [vmem:[%s5051_s3 + $0x80] sm:$0xf]  ;;  %v3997_v46 = vld [vmem:[%s5051_s3 + $0x8c] sm:$0xf0]  ;;  %v3995_v49 = vld [vmem:[%s5051_s3 + $0x84] sm:$0xf]  ;;  %v3604_v44 = vor.u32 %v4000_v26, %v3601_v27 }
 0x6e6   : > { %1936 = vmatpush.bf16.msra.mxu3 %v3620_v24  ;;  %v3577_v43 = vld [vmem:[%s5051_s3 + $0x90] sm:$0xf0]  ;;  %v3583_v57 = vld [vmem:[%s5051_s3 + $0x88] sm:$0xf]  ;;  %v3998_v23 = vld [vmem:[%s5051_s3 + $0x94] sm:$0xf0]  ;;  %v3576_v32 = vor.u32 %v3997_v46, %v3575_v40 }
 0x6e7   : > { %v3996_v55 = vld [vmem:[%s5051_s3 + $0x8c] sm:$0xf]  ;;  %v3585_v58 = vld [vmem:[%s5051_s3 + $0x98] sm:$0xf0]  ;;  %v3580_v54 = vor.u32 %v3995_v49, %v3577_v43  ;;  %v3584_v35 = vor.u32 %v3998_v23, %v3583_v57  ;;  %v3559_v8 = vld [vmem:[%s5051_s3 + $0x60] sm:$0xf] }
 0x6e8   : > { %1895 = vmatpush.bf16.msra.mxu0 %v3592_v18  ;;  %v3993_v59 = vld [vmem:[%s5051_s3 + $0x6c] sm:$0xf0]  ;;  %v3991_v39 = vld [vmem:[%s5051_s3 + $0x64] sm:$0xf]  ;;  %v3588_v60 = vor.u32 %v3996_v55, %v3585_v58  ;;  %v3561_v5 = vld [vmem:[%s5051_s3 + $0x70] sm:$0xf0] }
 0x6e9   : > { %1909 = vmatpush.bf16.msra.mxu1 %v3596_v31  ;;  %1923 = vmatpush.bf16.msra.mxu2 %v3600_v38  ;;  %v3567_v51 = vld [vmem:[%s5051_s3 + $0x68] sm:$0xf]  ;;  %v3994_v62 = vld [vmem:[%s5051_s3 + $0x74] sm:$0xf0]  ;;  %v3992_v53 = vld [vmem:[%s5051_s3 + $0x6c] sm:$0xf]  ;;  %v3560_v1 = vor.u32 %v3993_v59, %v3559_v8  ;;  %v3564_v9 = vor.u32 %v3991_v39, %v3561_v5 }
 0x6ea   : > { %1937 = vmatpush.bf16.msra.mxu3 %v3604_v44  ;;  %v3569_v12 = vld [vmem:[%s5051_s3 + $0x78] sm:$0xf0]  ;;  %v3568_v3 = vor.u32 %v3994_v62, %v3567_v51  ;;  %v3543_v13 = vld [vmem:[%s5051_s3 + $0x40] sm:$0xf]  ;;  %v3989_v4 = vld [vmem:[%s5051_s3 + $0x4c] sm:$0xf0] }
 0x6eb   : > { %v3987_v7 = vld [vmem:[%s5051_s3 + $0x44] sm:$0xf]  ;;  %v3572_v6 = vor.u32 %v3992_v53, %v3569_v12  ;;  %v3545_v10 = vld [vmem:[%s5051_s3 + $0x50] sm:$0xf0]  ;;  %v3551_v41 = vld [vmem:[%s5051_s3 + $0x48] sm:$0xf]  ;;  %v3544_v28 = vor.u32 %v3989_v4, %v3543_v13 }
 0x6ec   : > { %1896 = vmatpush.bf16.msra.mxu0 %v3576_v32  ;;  %v3990_v36 = vld [vmem:[%s5051_s3 + $0x54] sm:$0xf0]  ;;  %v3988_v11 = vld [vmem:[%s5051_s3 + $0x4c] sm:$0xf]  ;;  %v3553_v61 = vld [vmem:[%s5051_s3 + $0x58] sm:$0xf0]  ;;  %v3548_v42 = vor.u32 %v3987_v7, %v3545_v10 }
 0x6ed   : > { %1910 = vmatpush.bf16.msra.mxu1 %v3580_v54  ;;  %1924 = vmatpush.bf16.msra.mxu2 %v3584_v35  ;;  %v3552_v56 = vor.u32 %v3990_v36, %v3551_v41  ;;  %v3527_v37 = vld [vmem:[%s5051_s3 + $0x20] sm:$0xf]  ;;  %v3985_v34 = vld [vmem:[%s5051_s3 + $0x2c] sm:$0xf0]  ;;  %v3983_v47 = vld [vmem:[%s5051_s3 + $0x24] sm:$0xf]  ;;  %v3556_v15 = vor.u32 %v3988_v11, %v3553_v61 }
 0x6ee   : > { %1938 = vmatpush.bf16.msra.mxu3 %v3588_v60  ;;  %v3529_v16 = vld [vmem:[%s5051_s3 + $0x30] sm:$0xf0]  ;;  %v3535_v17 = vld [vmem:[%s5051_s3 + $0x28] sm:$0xf]  ;;  %v3986_v48 = vld [vmem:[%s5051_s3 + $0x34] sm:$0xf0]  ;;  %v3528_v0 = vor.u32 %v3985_v34, %v3527_v37 }
 0x6ef   : > { %v3984_v20 = vld [vmem:[%s5051_s3 + $0x2c] sm:$0xf]  ;;  %v3537_v22 = vld [vmem:[%s5051_s3 + $0x38] sm:$0xf0]  ;;  %v3532_v21 = vor.u32 %v3983_v47, %v3529_v16  ;;  %v3536_v29 = vor.u32 %v3986_v48, %v3535_v17  ;;  %v3511_v24 = vld [vmem:[%s5051_s3] sm:$0xf] }
 0x6f0   : > { %1897 = vmatpush.bf16.msra.mxu0 %v3560_v1  ;;  %v3981_v50 = vld [vmem:[%s5051_s3 + $0xc] sm:$0xf0]  ;;  %v3979_v14 = vld [vmem:[%s5051_s3 + $0x4] sm:$0xf]  ;;  %v3540_v30 = vor.u32 %v3984_v20, %v3537_v22  ;;  %v3513_v18 = vld [vmem:[%s5051_s3 + $0x10] sm:$0xf0] }
 0x6f1   : > { %1911 = vmatpush.bf16.msra.mxu1 %v3564_v9  ;;  %1925 = vmatpush.bf16.msra.mxu2 %v3568_v3  ;;  %v3519_v25 = vld [vmem:[%s5051_s3 + $0x8] sm:$0xf]  ;;  %v3982_v26 = vld [vmem:[%s5051_s3 + $0x14] sm:$0xf0]  ;;  %v3980_v27 = vld [vmem:[%s5051_s3 + $0xc] sm:$0xf]  ;;  %v3512_v38 = vor.u32 %v3981_v50, %v3511_v24  ;;  %v3516_v40 = vor.u32 %v3979_v14, %v3513_v18 }
 0x6f2   : > { %1939 = vmatpush.bf16.msra.mxu3 %v3572_v6  ;;  %v3521_v31 = vld [vmem:[%s5051_s3 + $0x18] sm:$0xf0]  ;;  %v3520_v46 = vor.u32 %v3982_v26, %v3519_v25  ;;  %v5522_v44 = vld [vmem:[%s5092_s2] sm:$0xf] }
 0x6f3   : > { %v3524_v49 = vor.u32 %v3980_v27, %v3521_v31  ;;  %v1725_v43 = vperm.slane %v5522_v44, 0  ;;  %v1726_v57 = vperm.slane %v5522_v44, 1  ;;  %v1727_v8 = vperm.slane %v5522_v44, 2 }
 0x6f4   : > { %1898 = vmatpush.bf16.msra.mxu0 %v3544_v28  ;;  %v1728_v9 = vperm.slane %v5522_v44, 3 }
 0x6f5   : > { %1912 = vmatpush.bf16.msra.mxu1 %v3548_v42  ;;  %1926 = vmatpush.bf16.msra.mxu2 %v3552_v56 }
 0x6f6   : > { %1940 = vmatpush.bf16.msra.mxu3 %v3556_v15 }
 0x6f8   : > { %1899 = vmatpush.bf16.msra.mxu0 %v3528_v0 }
 0x6f9   : > { %1913 = vmatpush.bf16.msra.mxu1 %v3532_v21  ;;  %1927 = vmatpush.bf16.msra.mxu2 %v3536_v29 }
 0x6fa   : > { %1941 = vmatpush.bf16.msra.mxu3 %v3540_v30 }
 0x6fc   : > { %1900 = vmatpush.bf16.msra.mxu0 %v3512_v38 }
 0x6fd   : > { %1914 = vmatpush.bf16.msra.mxu1 %v3516_v40  ;;  %1928 = vmatpush.bf16.msra.mxu2 %v3520_v46 }
 0x6fe   : > { %1942 = vmatpush.bf16.msra.mxu3 %v3524_v49 }
 0x6ff   : > { %1901 = vmatmul.bf16.vlgmr.msra.gmra.mxu0 %v5450_v2 }
 0x700   : > { %1915 = vmatmul.bf16.vlgmr.msra.gmra.mxu1 %v5450_v2  ;;  %1929 = vmatmul.bf16.vlgmr.msra.gmra.mxu2 %v5450_v2 }
 0x701   : > { %1943 = vmatmul.bf16.vlgmr.msra.gmra.mxu3 %v5450_v2 }
 0x77c   : > { %v1902_v23 = vpop.f32.mrf.mxu0 }
 0x77d   : > { %v5526_v55 = vadd.f32 %v1902_v23, %v1725_v43  ;;  %v1916_v58 = vpop.f32.mrf.mxu1 }
 0x77e   : > { %v5530_v32 = vadd.f32 %v1916_v58, %v1726_v57 }
 0x77f   : > { %v5533_v54 = vmul.f32 0.70710677, %v5526_v55 }
 0x780   : > { %v5536_v35 = vmul.f32 0.70710677, %v5530_v32 }
 0x781   : > { %v1965_v59 = vmul.f32 %v5533_v54, %v5533_v54 }
 0x782   : > { %v2005_v39 = vmul.f32 %v5536_v35, %v5536_v35 }
 0x783   : > { %v5543_v60 = vmin.f32 %v1965_v59, 16.0  ;;  %v1930_v5 = vpop.f32.mrf.mxu2 }
 0x784   : > { %v5545_v51 = vmin.f32 %v2005_v39, 16.0  ;;  %v5549_v62 = vadd.f32 %v1930_v5, %v1727_v8  ;;  %v1944_v4 = vpop.f32.mrf.mxu3  ;;  %v1904_v28 = vpop.f32.mrf.mxu0 }
 0x785   : > { %v1978_v53 = vmul.f32 3.8918573e-05, %v5543_v60  ;;  %v1967_v12 = vmul.f32 2.1237322e-06, %v5543_v60  ;;  %v5565_v61 = vadd.f32 %v1944_v4, %v1728_v9  ;;  %v5570_v15 = vadd.f32 %v1904_v28, %v1725_v43  ;;  %v1918_v43 = vpop.f32.mrf.mxu1 }
 0x786   : > { %v2018_v1 = vmul.f32 3.8918573e-05, %v5545_v51  ;;  %v5556_v13 = vmul.f32 0.70710677, %v5549_v62  ;;  %v2007_v10 = vmul.f32 2.1237322e-06, %v5545_v51 }
 0x787   : > { %v1979_v3 = vadd.f32 0.001143296, %v1978_v53  ;;  %v1968_v36 = vadd.f32 0.00028619796, %v1967_v12  ;;  %v5575_v48 = vmul.f32 0.70710677, %v5565_v61 }
 0x788   : > { %v2019_v7 = vadd.f32 0.001143296, %v2018_v1  ;;  %v2045_v41 = vmul.f32 %v5556_v13, %v5556_v13  ;;  %v2008_v47 = vadd.f32 0.00028619796, %v2007_v10  ;;  %v5581_v24 = vmul.f32 0.70710677, %v5570_v15 }
 0x789   : > { %v1980_v6 = vmul.f32 %v1979_v3, %v5543_v60  ;;  %v1969_v16 = vmul.f32 %v1968_v36, %v5543_v60  ;;  %v2085_v14 = vmul.f32 %v5575_v48, %v5575_v48  ;;  %v1919_v1 = vadd.f32 %v1918_v43, %v1726_v57 }
 0x78a   : > { %v2020_v11 = vmul.f32 %v2019_v7, %v5545_v51  ;;  %v5567_v56 = vmin.f32 %v2045_v41, 16.0  ;;  %v2009_v21 = vmul.f32 %v2008_v47, %v5545_v51  ;;  %v2125_v31 = vmul.f32 %v5581_v24, %v5581_v24 }
 0x78b   : > { %v1981_v42 = vadd.f32 0.014752088, %v1980_v6  ;;  %v1970_v50 = vadd.f32 0.0036580483, %v1969_v16  ;;  %v5590_v40 = vmin.f32 %v2085_v14, 16.0 }
 0x78c   : > { %v2021_v37 = vadd.f32 0.014752088, %v2020_v11  ;;  %v2058_v22 = vmul.f32 3.8918573e-05, %v5567_v56  ;;  %v2010_v26 = vadd.f32 0.0036580483, %v2009_v21 }
 0x78d   : > { %v1982_v34 = vmul.f32 %v1981_v42, %v5543_v60  ;;  %v1971_v38 = vmul.f32 %v1970_v50, %v5543_v60  ;;  %v2047_v59 = vmul.f32 2.1237322e-06, %v5567_v56  ;;  %v5597_v39 = vmin.f32 %v2125_v31, 16.0 }
 0x78e   : > { %v2022_v17 = vmul.f32 %v2021_v37, %v5545_v51  ;;  %v2059_v18 = vadd.f32 0.001143296, %v2058_v22  ;;  %v2011_v23 = vmul.f32 %v2010_v26, %v5545_v51  ;;  %v2098_v53 = vmul.f32 3.8918573e-05, %v5590_v40 }
 0x78f   : > { %v1983_v20 = vadd.f32 0.112945676, %v1982_v34  ;;  %v1972_v5 = vadd.f32 0.05243302, %v1971_v38  ;;  %v2048_v7 = vadd.f32 0.00028619796, %v2047_v59 }
 0x790   : > { %v2023_v29 = vadd.f32 0.112945676, %v2022_v17  ;;  %v2060_v46 = vmul.f32 %v2059_v18, %v5567_v56  ;;  %v2012_v3 = vadd.f32 0.05243302, %v2011_v23  ;;  %v2127_v6 = vmul.f32 2.1237322e-06, %v5597_v39 }
 0x791   : > { %v1984_v0 = vmul.f32 %v1983_v20, %v5543_v60  ;;  %v1973_v10 = vmul.f32 %v1972_v5, %v5543_v60  ;;  %v2099_v41 = vadd.f32 0.001143296, %v2098_v53  ;;  %v2138_v11 = vmul.f32 3.8918573e-05, %v5597_v39  ;;  %v1932_v5 = vpop.f32.mrf.mxu2  ;;  %v1946_v53 = vpop.f32.mrf.mxu3 }
 0x792   : > { %v2024_v27 = vmul.f32 %v2023_v29, %v5545_v51  ;;  %v2061_v12 = vadd.f32 0.014752088, %v2060_v46  ;;  %v5608_v28 = vmul.f32 0.70710677, %v1919_v1  ;;  %v2128_v42 = vadd.f32 0.00028619796, %v2127_v6 }
 0x793   : > { %v1985_v30 = vadd.f32 0.4994258, %v1984_v0  ;;  %v2013_v57 = vmul.f32 %v2012_v3, %v5545_v51  ;;  %v2049_v34 = vmul.f32 %v2048_v7, %v5567_v56  ;;  %v1974_v16 = vadd.f32 0.18741608, %v1973_v10 }
 0x794   : > { %v2025_v58 = vadd.f32 0.4994258, %v2024_v27  ;;  %v2062_v36 = vmul.f32 %v2061_v12, %v5567_v56  ;;  %v2100_v17 = vmul.f32 %v2099_v41, %v5590_v40  ;;  %v2139_v22 = vadd.f32 0.001143296, %v2138_v11 }
 0x795   : > { %v1986_v25 = vmul.f32 %v1985_v30, %v5543_v60  ;;  %v2165_v0 = vmul.f32 %v5608_v28, %v5608_v28  ;;  %v2087_v21 = vmul.f32 2.1237322e-06, %v5590_v40  ;;  %v2129_v29 = vmul.f32 %v2128_v42, %v5597_v39 }
 0x796   : > { %v2026_v4 = vmul.f32 %v2025_v58, %v5545_v51  ;;  %v2063_v20 = vadd.f32 0.112945676, %v2062_v36  ;;  %v2014_v14 = vadd.f32 0.18741608, %v2013_v57  ;;  %v2050_v30 = vadd.f32 0.0036580483, %v2049_v34 }
 0x797   : > { %v5593_v49 = vadd.f32 1.0, %v1986_v25  ;;  %v1975_v18 = vmul.f32 %v1974_v16, %v5543_v60  ;;  %v2101_v25 = vadd.f32 0.014752088, %v2100_v17  ;;  %v2140_v26 = vmul.f32 %v2139_v22, %v5597_v39  ;;  %v4018_v22 = vld [vmem:[%s5057_s26 + $0x38] sm:$0xff] }
 0x798   : > { %v5611_v37 = vadd.f32 1.0, %v2026_v4  ;;  %v2064_v27 = vmul.f32 %v2063_v20, %v5567_v56  ;;  %v5627_v31 = vmin.f32 %v2165_v0, 16.0  ;;  %v2130_v38 = vadd.f32 0.0036580483, %v2129_v29  ;;  %v4026_v0 = vld [vmem:[%s5057_s26 + $0x78] sm:$0xff]  ;;  %2562 = vmatpush.bf16.msrb.mxu0 %v4018_v22 }
 0x799   : > { %4295 = vrcp.f32 %v5593_v49  ;;  %v2141_v46 = vadd.f32 0.014752088, %v2140_v26  ;;  %v2015_v23 = vmul.f32 %v2014_v14, %v5545_v51  ;;  %v2051_v58 = vmul.f32 %v2050_v30, %v5567_v56  ;;  %2576 = vmatpush.bf16.msrb.mxu1 %v4026_v0 }
 0x79a   : > { %4297 = vrcp.f32 %v5611_v37  ;;  %v2088_v59 = vadd.f32 0.00028619796, %v2087_v21  ;;  %v5632_v12 = vmul.f32 0.5, %v5526_v55  ;;  %v1976_v60 = vadd.f32 1.1283791, %v1975_v18 }
 0x79b   : > { %v2102_v3 = vmul.f32 %v2101_v25, %v5590_v40  ;;  %v2142_v4 = vmul.f32 %v2141_v46, %v5597_v39  ;;  %v5639_v6 = vmul.f32 0.5, %v5530_v32  ;;  %v2065_v10 = vadd.f32 0.4994258, %v2064_v27 }
 0x79c   : > { %v5642_v51 = vmul.f32 0.5, %v5570_v15  ;;  %v2167_v41 = vmul.f32 2.1237322e-06, %v5627_v31  ;;  %v2131_v36 = vmul.f32 %v2130_v38, %v5597_v39  ;;  %v5646_v55 = vmul.f32 0.5, %v1919_v1 }
 0x79d   : > { %v5650_v11 = vadd.f32 %v1932_v5, %v1727_v8  ;;  %v5654_v32 = vadd.f32 %v1946_v53, %v1728_v9  ;;  %v2016_v15 = vadd.f32 1.1283791, %v2015_v23  ;;  %v2052_v57 = vadd.f32 0.05243302, %v2051_v58  ;;  %v4025_v5 = vld [vmem:[%s5057_s26 + $0x70] sm:$0xff]  ;;  %v4023_v53 = vld [vmem:[%s5057_s26 + $0x60] sm:$0xff] }
 0x79e   : > { %v2089_v34 = vmul.f32 %v2088_v59, %v5590_v40  ;;  %v5659_v16 = vmul.f32 %v1976_v60, %v5533_v54  ;;  %v2103_v17 = vadd.f32 0.112945676, %v2102_v3  ;;  %v2143_v20 = vadd.f32 0.112945676, %v2142_v4  ;;  %v4017_v59 = vld [vmem:[%s5057_s26 + $0x30] sm:$0xff]  ;;  %2577 = vmatpush.bf16.msrb.mxu1 %v4025_v5  ;;  %v4015_v5 = vld [vmem:[%s5057_s26 + $0x20] sm:$0xff] }
 0x79f   : > { %v5614_v47 = vpop.eup %4295  ;;  %vm1993_vm15 = vweird.f32 %v5593_v49  ;;  %v1997_v44 = vand.u32 2147483647, %v5593_v49  ;;  %v2066_v8 = vmul.f32 %v2065_v10, %v5567_v56  ;;  %v2168_v9 = vadd.f32 0.00028619796, %v2167_v41  ;;  %v4034_v10 = vld [vmem:[%s5057_s26 + $0xb8] sm:$0xff]  ;;  %2563 = vmatpush.bf16.msrb.mxu0 %v4017_v59 }
 0x7a0   : > { %v1989_v50 = vmul.f32 %v5614_v47, %v5593_v49  ;;  %v5636_v7 = vpop.eup %4297  ;;  %v1999_v21 = vand.u32 2147483648, %v5593_v49  ;;  %v2132_v29 = vadd.f32 0.05243302, %v2131_v36  ;;  %v2144_v54 = vmul.f32 %v2143_v20, %v5597_v39  ;;  %v4042_v41 = vld [vmem:[%s5057_s26 + $0xf8] sm:$0xff]  ;;  %2590 = vmatpush.bf16.msrb.mxu2 %v4034_v10  ;;  %v4032_v10 = vld [vmem:[%s5057_s26 + $0xa8] sm:$0xff] }
 0x7a1   : > { %v2029_v1 = vmul.f32 %v5636_v7, %v5611_v37  ;;  %vm1994_vm0 = vweird.f32 %v5614_v47  ;;  %v2053_v30 = vmul.f32 %v2052_v57, %v5567_v56  ;;  %v5675_v18 = vmul.f32 0.70710677, %v5650_v11  ;;  %2604 = vmatpush.bf16.msrb.mxu3 %v4042_v41  ;;  %v4040_v41 = vld [vmem:[%s5057_s26 + $0xe8] sm:$0xff] }
 0x7a2   : > { %v1990_v43 = vsub.f32 1.0, %v1989_v50  ;;  %v2178_v50 = vmul.f32 3.8918573e-05, %v5627_v31  ;;  %v2104_v26 = vmul.f32 %v2103_v17, %v5590_v40  ;;  %v2145_v27 = vadd.f32 0.4994258, %v2144_v54  ;;  %vm5691_vm1 = vmor %vm1993_vm15, %vm1994_vm0  ;;  %v4041_v54 = vld [vmem:[%s5057_s26 + $0xf0] sm:$0xff] }
 0x7a3   : > { %v2030_v25 = vsub.f32 1.0, %v2029_v1  ;;  %v5679_v46 = vmul.f32 %v2016_v15, %v5536_v35  ;;  %v5682_v23 = vadd.f32 1.0, %v2066_v8  ;;  %v2169_v58 = vmul.f32 %v2168_v9, %v5627_v31  ;;  %v4016_v8 = vld [vmem:[%s5057_s26 + $0x28] sm:$0xff] }
 0x7a4   : > { %v1991_v42 = vmul.f32 %v5614_v47, %v1990_v43  ;;  %v2179_v38 = vadd.f32 0.001143296, %v2178_v50  ;;  %v2037_v43 = vand.u32 2147483647, %v5611_v37  ;;  %v2000_v60 = vor.u32 1.1754944e-38, %v1999_v21  ;;  %v4024_v9 = vld [vmem:[%s5057_s26 + $0x68] sm:$0xff]  ;;  %2564 = vmatpush.bf16.msrb.mxu0 %v4016_v8 }
 0x7a5   : > { %v2133_v35 = vmul.f32 %v2132_v29, %v5597_v39  ;;  %v2146_v3 = vmul.f32 %v2145_v27, %v5597_v39  ;;  %v2090_v49 = vadd.f32 0.0036580483, %v2089_v34  ;;  %v2205_v15 = vmul.f32 %v5675_v18, %v5675_v18  ;;  %v4033_v29 = vld [vmem:[%s5057_s26 + $0xb0] sm:$0xff]  ;;  %2578 = vmatpush.bf16.msrb.mxu1 %v4024_v9  ;;  %2605 = vmatpush.bf16.msrb.mxu3 %v4041_v54  ;;  %v4022_v8 = vld [vmem:[%s5057_s26 + $0x58] sm:$0xff] }
 0x7a6   : > { %v1992_v14 = vadd.f32 %v5614_v47, %v1991_v42  ;;  %v2180_v4 = vmul.f32 %v2179_v38, %v5627_v31  ;;  %v2054_v42 = vadd.f32 0.18741608, %v2053_v30  ;;  %v2031_v57 = vmul.f32 %v5636_v7, %v2030_v25  ;;  %2591 = vmatpush.bf16.msrb.mxu2 %v4033_v29 }
 0x7a7   : > { %v2105_v1 = vadd.f32 0.4994258, %v2104_v26  ;;  %v5706_v17 = vadd.f32 1.0, %v2146_v3  ;;  %vm1998_vm2 = vcmp.eq.f32.partialorder %v1997_v44, 8.507059e+37  ;;  %4299 = vrcp.f32 %v5682_v23 }
 0x7a8   : > { %v1996_v36 = vsel %vm5691_vm1, %v5614_v47, %v1992_v14  ;;  %v2181_v20 = vadd.f32 0.014752088, %v2180_v4  ;;  %v2170_v47 = vadd.f32 0.0036580483, %v2169_v58  ;;  %v5709_v34 = vmin.f32 %v2205_v15, 16.0  ;;  %2565 = vmatpush.bf16.msrb.mxu0 %v4015_v5 }
 0x7a9   : > { %v2001_v22 = vsel %vm1998_vm2, %v2000_v60, %v1996_v36  ;;  %v2134_v0 = vadd.f32 0.18741608, %v2133_v35  ;;  %4301 = vrcp.f32 %v5706_v17  ;;  %v5715_v21 = vmul.f32 0.70710677, %v5654_v32  ;;  %2579 = vmatpush.bf16.msrb.mxu1 %v4023_v53  ;;  %2606 = vmatpush.bf16.msrb.mxu3 %v4040_v41  ;;  %v4013_v53 = vld [vmem:[%s5057_s26 + $0x10] sm:$0xff] }
 0x7aa   : > { %v2039_v50 = vand.u32 2147483648, %v5611_v37  ;;  %v2055_v44 = vmul.f32 %v2054_v42, %v5567_v56  ;;  %v2091_v14 = vmul.f32 %v2090_v49, %v5590_v40  ;;  %v2182_v30 = vmul.f32 %v2181_v20, %v5627_v31  ;;  %2592 = vmatpush.bf16.msrb.mxu2 %v4032_v10 }
 0x7ab   : > { %v5724_v25 = vadd.f32 %v5636_v7, %v2031_v57  ;;  %vm2034_vm3 = vweird.f32 %v5636_v7  ;;  %v2207_v26 = vmul.f32 2.1237322e-06, %v5709_v34  ;;  %v2218_v27 = vmul.f32 3.8918573e-05, %v5709_v34 }
 0x7ac   : > { %v5730_v56 = vmul.f32 %v2001_v22, %v5659_v16  ;;  %v2106_v38 = vmul.f32 %v2105_v1, %v5590_v40  ;;  %v2171_v58 = vmul.f32 %v2170_v47, %v5627_v31  ;;  %v2183_v59 = vadd.f32 0.112945676, %v2182_v30  ;;  %v4014_v47 = vld [vmem:[%s5057_s26 + $0x18] sm:$0xff] }
 0x7ad   : > { %v2135_v60 = vmul.f32 %v2134_v0, %v5597_v39  ;;  %v2208_v35 = vadd.f32 0.00028619796, %v2207_v26  ;;  %v2219_v3 = vadd.f32 0.001143296, %v2218_v27  ;;  %v2245_v4 = vmul.f32 %v5715_v21, %v5715_v21  ;;  %v5741_v16 = vpop.eup %4299  ;;  %2566 = vmatpush.bf16.msrb.mxu0 %v4014_v47  ;;  %2580 = vmatpush.bf16.msrb.mxu1 %v4022_v8  ;;  %v4038_v22 = vld [vmem:[%s5057_s26 + $0xd8] sm:$0xff] }
 0x7ae   : > { %vm2033_vm4 = vweird.f32 %v5611_v37  ;;  %v5744_v36 = vor.u32 1.1754944e-38, %v2039_v50  ;;  %v5746_v42 = vadd.f32 0.05243302, %v2091_v14  ;;  %v2184_v49 = vmul.f32 %v2183_v59, %v5627_v31  ;;  %v4031_v37 = vld [vmem:[%s5057_s26 + $0xa0] sm:$0xff] }
 0x7af   : > { %v5749_v39 = vpop.eup %4301  ;;  %v5751_v15 = vadd.f32 1.1283791, %v2055_v44  ;;  %v2209_v57 = vmul.f32 %v2208_v35, %v5709_v34  ;;  %v2220_v1 = vmul.f32 %v2219_v3, %v5709_v34  ;;  %v5755_v20 = vmin.f32 %v2245_v4, 16.0  ;;  %vm5764_vm5 = vmor %vm2033_vm4, %vm2034_vm3  ;;  %2593 = vmatpush.bf16.msrb.mxu2 %v4031_v37 }
 0x7b0   : > { %v3637_v9 = vclamps-f32 %v5730_v56, 1.0  ;;  %v5768_v0 = vadd.f32 1.0, %v2106_v38  ;;  %v2149_v29 = vmul.f32 %v5749_v39, %v5706_v17  ;;  %v2172_v54 = vadd.f32 0.05243302, %v2171_v58 }
 0x7b1   : > { %v2036_v50 = vsel %vm5764_vm5, %v5636_v7, %v5724_v25  ;;  %vm5778_vm6 = vcmp.eq.f32.partialorder %v2037_v43, 8.507059e+37  ;;  %v2136_v14 = vadd.f32 1.1283791, %v2135_v60  ;;  %v2185_v30 = vadd.f32 0.4994258, %v2184_v49  ;;  %v4039_v43 = vld [vmem:[%s5057_s26 + $0xe0] sm:$0xff]  ;;  %2567 = vmatpush.bf16.msrb.mxu0 %v4013_v53 }
 0x7b2   : > { %v2221_v26 = vadd.f32 0.014752088, %v2220_v1  ;;  %v5784_v27 = vmul.f32 %v5741_v16, %v5682_v23  ;;  %v2150_v56 = vsub.f32 1.0, %v2149_v29  ;;  %v2159_v38 = vand.u32 2147483648, %v5706_v17  ;;  %v4021_v60 = vld [vmem:[%s5057_s26 + $0x50] sm:$0xff]  ;;  %2607 = vmatpush.bf16.msrb.mxu3 %v4039_v43 }
 0x7b3   : > { %v2247_v7 = vmul.f32 2.1237322e-06, %v5755_v20  ;;  %v2186_v25 = vmul.f32 %v2185_v30, %v5627_v31  ;;  %v2210_v58 = vadd.f32 0.0036580483, %v2209_v57  ;;  %v2258_v5 = vmul.f32 3.8918573e-05, %v5755_v20  ;;  %2581 = vmatpush.bf16.msrb.mxu1 %v4021_v60 }
 0x7b4   : > { %v2222_v59 = vmul.f32 %v2221_v26, %v5709_v34  ;;  %v2151_v35 = vmul.f32 %v5749_v39, %v2150_v56  ;;  %vm2154_vm7 = vweird.f32 %v5749_v39  ;;  %v2157_v3 = vand.u32 2147483647, %v5706_v17  ;;  %v4030_v57 = vld [vmem:[%s5057_s26 + $0x98] sm:$0xff]  ;;  %v4012_v26 = vld [vmem:[%s5057_s26 + $0x8] sm:$0xff]  ;;  %v4029_v43 = vld [vmem:[%s5057_s26 + $0x90] sm:$0xff] }
 0x7b5   : > { %v2173_v4 = vmul.f32 %v2172_v54, %v5627_v31  ;;  %4303 = vrcp.f32 %v5768_v0  ;;  %v5800_v10 = vadd.f32 1.0, %v2186_v25  ;;  %v2248_v49 = vadd.f32 0.00028619796, %v2247_v7  ;;  %2594 = vmatpush.bf16.msrb.mxu2 %v4030_v57  ;;  %v4037_v25 = vld [vmem:[%s5057_s26 + $0xd0] sm:$0xff]  ;;  %2568 = vmatpush.bf16.msrb.mxu0 %v4012_v26 }
 0x7b6   : > { %v2223_v41 = vadd.f32 0.112945676, %v2222_v59  ;;  %v2070_v1 = vsub.f32 1.0, %v5784_v27  ;;  %v2152_v47 = vadd.f32 %v5749_v39, %v2151_v35  ;;  %vm2153_vm8 = vweird.f32 %v5706_v17  ;;  %v4020_v27 = vld [vmem:[%s5057_s26 + $0x48] sm:$0xff]  ;;  %2608 = vmatpush.bf16.msrb.mxu3 %v4038_v22 }
 0x7b7   : > { %v2259_v8 = vadd.f32 0.001143296, %v2258_v5  ;;  %v2137_v29 = vmul.f32 %v2136_v14, %v5581_v24  ;;  %vm2155_vm9 = vmor %vm2153_vm8, %vm2154_vm7  ;;  %v2160_v54 = vor.u32 1.1754944e-38, %v2159_v38  ;;  %4305 = vrcp.f32 %v5800_v10  ;;  %2582 = vmatpush.bf16.msrb.mxu1 %v4020_v27  ;;  %v4028_v22 = vld [vmem:[%s5057_s26 + $0x88] sm:$0xff] }
 0x7b8   : > { %v2211_v30 = vmul.f32 %v2210_v58, %v5709_v34  ;;  %v2156_v17 = vsel %vm2155_vm9, %v5749_v39, %v2152_v47  ;;  %vm2158_vm10 = vcmp.eq.f32.partialorder %v2157_v3, 8.507059e+37  ;;  %v2174_v56 = vadd.f32 0.18741608, %v2173_v4  ;;  %v4019_v4 = vld [vmem:[%s5057_s26 + $0x40] sm:$0xff] }
 0x7b9   : > { %v2224_v7 = vmul.f32 %v2223_v41, %v5709_v34  ;;  %v2077_v24 = vand.u32 2147483647, %v5682_v23  ;;  %v2161_v14 = vsel %vm2158_vm10, %v2160_v54, %v2156_v17  ;;  %v2249_v38 = vmul.f32 %v2248_v49, %v5755_v20  ;;  %2595 = vmatpush.bf16.msrb.mxu2 %v4029_v43  ;;  %v4027_v43 = vld [vmem:[%s5057_s26 + $0x80] sm:$0xff] }
 0x7ba   : > { %v2260_v37 = vmul.f32 %v2259_v8, %v5755_v20  ;;  %v2285_v58 = vadd.f32 1.0, %v3637_v9  ;;  %v2041_v39 = vsel %vm5778_vm6, %v5744_v36, %v2036_v50  ;;  %v2162_v59 = vmul.f32 %v2161_v14, %v2137_v29  ;;  %v4011_v9 = vld [vmem:[%s5057_s26] sm:$0xff]  ;;  %2609 = vmatpush.bf16.msrb.mxu3 %v4037_v25  ;;  %v4036_v29 = vld [vmem:[%s5057_s26 + $0xc8] sm:$0xff] }
 0x7bb   : > { %v2225_v5 = vadd.f32 0.4994258, %v2224_v7  ;;  %v5824_v53 = vpop.eup %4303  ;;  %vm2073_vm11 = vweird.f32 %v5682_v23  ;;  %v2093_v60 = vmul.f32 %v5746_v42, %v5590_v40  ;;  %v2212_v35 = vadd.f32 0.05243302, %v2211_v30  ;;  %2569 = vmatpush.bf16.msrb.mxu0 %v4011_v9  ;;  %2583 = vmatpush.bf16.msrb.mxu1 %v4019_v4  ;;  %v4035_v25 = vld [vmem:[%s5057_s26 + $0xc0] sm:$0xff] }
 0x7bc   : > { %v2261_v3 = vadd.f32 0.014752088, %v2260_v37  ;;  %v2071_v44 = vmul.f32 %v5741_v16, %v2070_v1  ;;  %v3641_v36 = vclamps-f32 %v2162_v59, 1.0  ;;  %v2175_v50 = vmul.f32 %v2174_v56, %v5627_v31 }
 0x7bd   : > { %v2226_v41 = vmul.f32 %v2225_v5, %v5709_v34  ;;  %v4306_v49 = vpop.eup %4305  ;;  %v2042_v57 = vmul.f32 %v2041_v39, %v5679_v46  ;;  %v2079_v42 = vand.u32 2147483648, %v5682_v23  ;;  %v2250_v47 = vadd.f32 0.0036580483, %v2249_v38  ;;  %2596 = vmatpush.bf16.msrb.mxu2 %v4028_v22 }
 0x7be   : > { %v2262_v8 = vmul.f32 %v2261_v3, %v5755_v20  ;;  %v2293_v54 = vmul.f32 %v2285_v58, %v5632_v12  ;;  %vm2074_vm12 = vweird.f32 %v5741_v16  ;;  %v2289_v1 = vadd.f32 1.0, %v3641_v36  ;;  %2610 = vmatpush.bf16.msrb.mxu3 %v4036_v29 }
 0x7bf   : > { %v2189_v31 = vmul.f32 %v4306_v49, %v5800_v10  ;;  %v2109_v46 = vmul.f32 %v5824_v53, %v5768_v0  ;;  %v2213_v30 = vmul.f32 %v2212_v35, %v5709_v34  ;;  %v5845_v26 = vadd.f32 1.0, %v2226_v41  ;;  %vm5860_vm14 = vmor %vm2073_vm11, %vm2074_vm12 }
 0x7c0   : > { %v2263_v27 = vadd.f32 0.112945676, %v2262_v8  ;;  %v2072_v17 = vadd.f32 %v5741_v16, %v2071_v44  ;;  %v2297_v12 = vmul.f32 %v2289_v1, %v5642_v51  ;;  %v2176_v56 = vadd.f32 1.1283791, %v2175_v50 }
 0x7c1   : > { %v2190_v7 = vsub.f32 1.0, %v2189_v31  ;;  %v2197_v14 = vand.u32 2147483647, %v5800_v10  ;;  %v2199_v38 = vand.u32 2147483648, %v5800_v10  ;;  %4307 = vrcp.f32 %v5845_v26  ;;  %2597 = vmatpush.bf16.msrb.mxu2 %v4027_v43 }
 0x7c2   : > { %v2251_v37 = vmul.f32 %v2250_v47, %v5755_v20  ;;  %vm2194_vm13 = vweird.f32 %v4306_v49  ;;  %v2264_v39 = vmul.f32 %v2263_v27, %v5755_v20  ;;  %v2301_v59 = vpack.c.bf16 %v2297_v12, %v2293_v54  ;;  %2611 = vmatpush.bf16.msrb.mxu3 %v4035_v25 }
 0x7c3   : > { %v2191_v58 = vmul.f32 %v4306_v49, %v2190_v7  ;;  %vm5864_vm15 = vcmp.eq.f32.partialorder %v2077_v24, 8.507059e+37  ;;  %v2094_v35 = vadd.f32 0.18741608, %v2093_v60  ;;  %v2110_v3 = vsub.f32 1.0, %v2109_v46 }
 0x7c4   : > { %v2214_v9 = vadd.f32 0.18741608, %v2213_v30  ;;  %v2076_v4 = vsel %vm5860_vm14, %v5741_v16, %v2072_v17  ;;  %vm2193_vm0 = vweird.f32 %v5800_v10  ;;  %v2265_v36 = vadd.f32 0.4994258, %v2264_v39  ;;  %2570 = vmatmul.bf16.vlgmr.msrb.gmra.mxu0 %v2301_v59 }
 0x7c5   : > { %v2192_v44 = vadd.f32 %v4306_v49, %v2191_v58  ;;  %v3638_v23 = vclamps-f32 %v2042_v57, 1.0  ;;  %v2080_v50 = vor.u32 1.1754944e-38, %v2079_v42  ;;  %vm2195_vm1 = vmor %vm2193_vm0, %vm2194_vm13  ;;  %v2200_v24 = vor.u32 1.1754944e-38, %v2199_v38 }
 0x7c6   : > { %v2252_v41 = vadd.f32 0.05243302, %v2251_v37  ;;  %v2177_v60 = vmul.f32 %v2176_v56, %v5608_v28  ;;  %vm2198_vm2 = vcmp.eq.f32.partialorder %v2197_v14, 8.507059e+37  ;;  %v2266_v8 = vmul.f32 %v2265_v36, %v5755_v20 }
 0x7c7   : > { %v2196_v47 = vsel %vm2195_vm1, %v4306_v49, %v2192_v44  ;;  %v4308_v16 = vpop.eup %4307  ;;  %v2081_v10 = vsel %vm5864_vm15, %v2080_v50, %v2076_v4  ;;  %v2111_v22 = vmul.f32 %v5824_v53, %v2110_v3  ;;  %v2215_v57 = vmul.f32 %v2214_v9, %v5709_v34 }
 0x7c8   : > { %v2201_v29 = vsel %vm2198_vm2, %v2200_v24, %v2196_v47  ;;  %v2057_v42 = vmul.f32 %v5751_v15, %v5556_v13  ;;  %v2095_v54 = vmul.f32 %v2094_v35, %v5590_v40  ;;  %v2229_v28 = vmul.f32 %v4308_v16, %v5845_v26 }
 0x7c9   : > { %v2202_v1 = vmul.f32 %v2201_v29, %v2177_v60  ;;  %v2286_v49 = vadd.f32 1.0, %v3638_v23  ;;  %v2119_v31 = vand.u32 2147483648, %v5768_v0  ;;  %v2253_v46 = vmul.f32 %v2252_v41, %v5755_v20 }
 0x7ca   : > { %v2267_v30 = vadd.f32 1.0, %v2266_v8  ;;  %v2082_v27 = vmul.f32 %v2081_v10, %v2057_v42  ;;  %vm2114_vm3 = vweird.f32 %v5824_v53  ;;  %v2230_v12 = vsub.f32 1.0, %v2229_v28 }
 0x7cb   : > { %v3642_v17 = vclamps-f32 %v2202_v1, 1.0  ;;  %v2112_v34 = vadd.f32 %v5824_v53, %v2111_v22  ;;  %v2216_v56 = vadd.f32 1.1283791, %v2215_v57  ;;  %v2239_v13 = vand.u32 2147483648, %v5845_v26 }
 0x7cc   : > { %4309 = vrcp.f32 %v2267_v30  ;;  %v2231_v15 = vmul.f32 %v4308_v16, %v2230_v12  ;;  %vm2234_vm4 = vweird.f32 %v4308_v16  ;;  %v2237_v7 = vand.u32 2147483647, %v5845_v26 }
 0x7cd   : > { %v2290_v40 = vadd.f32 1.0, %v3642_v17  ;;  %v2096_v14 = vadd.f32 1.1283791, %v2095_v54  ;;  %vm2113_vm5 = vweird.f32 %v5768_v0  ;;  %v2117_v38 = vand.u32 2147483647, %v5768_v0 }
 0x7ce   : > { %v2254_v37 = vadd.f32 0.18741608, %v2253_v46  ;;  %v2294_v43 = vmul.f32 %v2286_v49, %v5639_v6  ;;  %vm5894_vm6 = vmor %vm2113_vm5, %vm2114_vm3  ;;  %v2232_v39 = vadd.f32 %v4308_v16, %v2231_v15  ;;  %vm2233_vm7 = vweird.f32 %v5845_v26 }
 0x7cf   : > { %v2298_v58 = vmul.f32 %v2290_v40, %v5646_v55  ;;  %v3639_v59 = vclamps-f32 %v2082_v27, 1.0  ;;  %v2116_v51 = vsel %vm5894_vm6, %v5824_v53, %v2112_v34  ;;  %v2120_v0 = vor.u32 1.1754944e-38, %v2119_v31  ;;  %vm2235_vm8 = vmor %vm2233_vm7, %vm2234_vm4 }
 0x7d0   : > { %v2240_v5 = vor.u32 1.1754944e-38, %v2239_v13  ;;  %v2217_v6 = vmul.f32 %v2216_v56, %v5675_v18  ;;  %v2236_v35 = vsel %vm2235_vm8, %v4308_v16, %v2232_v39  ;;  %vm2238_vm9 = vcmp.eq.f32.partialorder %v2237_v7, 8.507059e+37 }
 0x7d1   : > { %v2302_v3 = vpack.c.bf16 %v2298_v58, %v2294_v43  ;;  %vm2118_vm10 = vcmp.eq.f32.partialorder %v2117_v38, 8.507059e+37  ;;  %v2255_v55 = vmul.f32 %v2254_v37, %v5755_v20  ;;  %v2097_v23 = vmul.f32 %v2096_v14, %v5575_v48 }
 0x7d2   : > { %v4310_v9 = vpop.eup %4309  ;;  %v2241_v4 = vsel %vm2238_vm9, %v2240_v5, %v2236_v35  ;;  %v2121_v44 = vsel %vm2118_vm10, %v2120_v0, %v2116_v51  ;;  %v1951_v53 = vmul.f32 0.5, %v5549_v62  ;;  %v2287_v50 = vadd.f32 1.0, %v3639_v59 }
 0x7d3   : > { %v2242_v26 = vmul.f32 %v2241_v4, %v2217_v6  ;;  %v2269_v36 = vmul.f32 %v4310_v9, %v2267_v30  ;;  %2584 = vmatmul.bf16.vlgmr.msrb.gmra.mxu1 %v2302_v3  ;;  %v2122_v18 = vmul.f32 %v2121_v44, %v2097_v23  ;;  %v1955_v60 = vmul.f32 0.5, %v5650_v11 }
 0x7d4   : > { %v2256_v47 = vadd.f32 1.1283791, %v2255_v55  ;;  %v2279_v8 = vand.u32 2147483648, %v2267_v30  ;;  %vm2274_vm11 = vweird.f32 %v4310_v9  ;;  %v2277_v20 = vand.u32 2147483647, %v2267_v30 }
 0x7d5   : > { %v3643_v24 = vclamps-f32 %v2242_v26, 1.0  ;;  %v2270_v41 = vsub.f32 1.0, %v2269_v36  ;;  %v2295_v22 = vmul.f32 %v2287_v50, %v1951_v53  ;;  %vm2273_vm12 = vweird.f32 %v2267_v30 }
 0x7d6   : > { %v3640_v42 = vclamps-f32 %v2122_v18, 1.0  ;;  %vm2275_vm13 = vmor %vm2273_vm12, %vm2274_vm11  ;;  %v2280_v48 = vor.u32 1.1754944e-38, %v2279_v8  ;;  %v2257_v62 = vmul.f32 %v2256_v47, %v5715_v21  ;;  %vm2278_vm14 = vcmp.eq.f32.partialorder %v2277_v20, 8.507059e+37 }
 0x7d7   : > { %v2291_v16 = vadd.f32 1.0, %v3643_v24  ;;  %v2271_v10 = vmul.f32 %v4310_v9, %v2270_v41  ;;  %v1952_v46 = vmul.f32 0.5, %v5565_v61  ;;  %v1956_v27 = vmul.f32 0.5, %v5654_v32 }
 0x7d8   : > { %v2288_v49 = vadd.f32 1.0, %v3640_v42  ;;  %v2369_v21 = vperm.slane %v5158_v33, 6 }
 0x7d9   : > { %v2299_v29 = vmul.f32 %v2291_v16, %v1955_v60  ;;  %v2272_v57 = vadd.f32 %v4310_v9, %v2271_v10 }
 0x7da   : > { %v2296_v12 = vmul.f32 %v2288_v49, %v1952_v46 }
 0x7db   : > { %v2276_v54 = vsel %vm2275_vm13, %v4310_v9, %v2272_v57  ;;  %v2303_v1 = vpack.c.bf16 %v2299_v29, %v2295_v22  ;;  %v2660_v29 = vperm.slane %v5158_v33, 7 }
 0x7dc   : > { %v2281_v28 = vsel %vm2278_vm14, %v2280_v48, %v2276_v54  ;;  %v2663_v48 = vperm.slane %v5113_v45, 0 }
 0x7dd   : > { %v2282_v11 = vmul.f32 %v2281_v28, %v2257_v62  ;;  %2598 = vmatmul.bf16.vlgmr.msrb.gmra.mxu2 %v2303_v1 }
 0x7df   : > { %v3644_v31 = vclamps-f32 %v2282_v11, 1.0 }
 0x7e1   : > { %v2292_v17 = vadd.f32 1.0, %v3644_v31 }
 0x7e3   : > { %v2300_v30 = vmul.f32 %v2292_v17, %v1956_v27 }
 0x7e5   : > { %v2304_v34 = vpack.c.bf16 %v2300_v30, %v2296_v12 }
 0x7e7   : > { %2612 = vmatmul.bf16.vlgmr.msrb.gmra.mxu3 %v2304_v34 }
 0x841   : > { %v2571_v56 = vpop.f32.mrf.mxu0 }
 0x842   : > { %v2572_v13 = vadd.f32 %v2571_v56, %v2369_v21 }
 0x849   : > { %v2573_v14 = vpop.f32.mrf.mxu0 }
 0x84a   : > { %v2574_v37 = vadd.f32 %v2573_v14, %v2369_v21 }
 0x850   : > { %v2585_v40 = vpop.f32.mrf.mxu1 }
 0x851   : > { %v2586_v7 = vadd.f32 %v2585_v40, %v2572_v13 }
 0x858   : > { %v2587_v61 = vpop.f32.mrf.mxu1 }
 0x859   : > { %v2588_v32 = vadd.f32 %v2587_v61, %v2574_v37 }
 0x860   : > { %v2599_v15 = vpop.f32.mrf.mxu2 }
 0x861   : > { %v2600_v38 = vadd.f32 %v2599_v15, %v2586_v7 }
 0x868   : > { %v2601_v58 = vpop.f32.mrf.mxu2 }
 0x869   : > { %v2602_v59 = vadd.f32 %v2601_v58, %v2588_v32 }
 0x86a   : > { %v2613_v43 = vpop.f32.mrf.mxu3 }
 0x86b   : > { %v2614_v25 = vadd.f32 %v2613_v43, %v2600_v38 }
 0x86d   : > { %v2618_v39 = vadd.f32 %v2614_v25, %v5444_v63 }
 0x86f   : > { %2620 = vadd.xlane.f32.xlu0 %v2618_v39 }
 0x872   : > { %v2615_v51 = vpop.f32.mrf.mxu3 }
 0x873   : > { %v2616_v0 = vadd.f32 %v2615_v51, %v2602_v59 }
 0x875   : > { %v2619_v5 = vadd.f32 %v2616_v0, %v5446_v19 }
 0x877   : > { %2622 = vadd.xlane.f32.xlu0 %v2619_v5 }
 0x8e2   : > { %v2621_v6 = vpop.xlane.xlu0 %2620 }
 0x8e3   : > { %v2624_v35 = vmul.f32 %v2621_v6, %v5435_v52 }
 0x8e5   : > { %v2626_v3 = vsub.f32 %v2618_v39, %v2624_v35 }
 0x8e7   : > { %v2628_v9 = vmul.f32 %v2626_v3, %v2626_v3 }
 0x8e9   : > { %2630 = vadd.xlane.f32.xlu1 %v2628_v9 }
 0x8ea   : > { %v2623_v4 = vpop.xlane.xlu0 %2622 }
 0x8eb   : > { %v2625_v55 = vmul.f32 %v2623_v4, %v5435_v52 }
 0x8ed   : > { %v2627_v44 = vsub.f32 %v2619_v5, %v2625_v55 }
 0x8ef   : > { %v2629_v26 = vmul.f32 %v2627_v44, %v2627_v44 }
 0x8f1   : > { %2632 = vadd.xlane.f32.xlu1 %v2629_v26 }
 0x95c   : > { %v2631_v36 = vpop.xlane.xlu1 %2630 }
 0x95d   : > { %v2634_v23 = vmul.f32 %v2631_v36, %v5435_v52 }
 0x95f   : > { %v2636_v53 = vadd.f32 1e-12, %v2634_v23 }
 0x961   : > { %4311 = vrsqrt.f32 %v2636_v53  ;;  %vm2644_vm0 = vweird.f32 %v2636_v53 }
 0x964   : > { %v2633_v50 = vpop.xlane.xlu1 %2632 }
 0x965   : > { %v2635_v24 = vmul.f32 %v2633_v50, %v5435_v52 }
 0x967   : > { %v4312_v41 = vpop.eup %4311  ;;  %v2637_v18 = vadd.f32 1e-12, %v2635_v24 }
 0x968   : > { %v2639_v60 = vmul.f32 %v4312_v41, %v2636_v53  ;;  %vm2645_vm15 = vweird.f32 %v4312_v41 }
 0x969   : > { %4313 = vrsqrt.f32 %v2637_v18  ;;  %vm2646_vm1 = vmor %vm2644_vm0, %vm2645_vm15  ;;  %vm2654_vm3 = vweird.f32 %v2637_v18 }
 0x96a   : > { %v2640_v47 = vmul.f32 %v4312_v41, %v2639_v60 }
 0x96c   : > { %v2641_v8 = vmul.f32 0.5, %v2640_v47 }
 0x96e   : > { %v2642_v16 = vsub.f32 1.5, %v2641_v8 }
 0x96f   : > { %v4314_v10 = vpop.eup %4313 }
 0x970   : > { %v2643_v20 = vmul.f32 %v4312_v41, %v2642_v16  ;;  %v2649_v22 = vmul.f32 %v4314_v10, %v2637_v18  ;;  %vm2655_vm2 = vweird.f32 %v4314_v10 }
 0x971   : > { %vm2656_vm4 = vmor %vm2654_vm3, %vm2655_vm2 }
 0x972   : > { %v2647_v57 = vsel %vm2646_vm1, %v4312_v41, %v2643_v20  ;;  %v2650_v42 = vmul.f32 %v4314_v10, %v2649_v22 }
 0x973   : > { %v2658_v62 = vmul.f32 %v2647_v57, %v2626_v3 }
 0x974   : > { %v2651_v54 = vmul.f32 0.5, %v2650_v42 }
 0x975   : > { %v2661_v1 = vmul.f32 %v2660_v29, %v2658_v62 }
 0x976   : > { %v2652_v28 = vsub.f32 1.5, %v2651_v54 }
 0x977   : > { %v2664_v11 = vadd.f32 %v2663_v48, %v2661_v1 }
 0x978   : > { %v2653_v49 = vmul.f32 %v4314_v10, %v2652_v28 }
 0x979   : > { %2666 = vst [vmem:[#allocation2] sm:$0xff] %v2664_v11 }
 0x97a   : > { %v2657_v31 = vsel %vm2656_vm4, %v4314_v10, %v2653_v49 }
 0x97b   : > { %v2659_v46 = vmul.f32 %v2657_v31, %v2627_v44 }
 0x97d   : > { %v2662_v27 = vmul.f32 %v2660_v29, %v2659_v46 }
 0x97f   : > { %v2665_v17 = vadd.f32 %v2663_v48, %v2662_v27 }
 0x981   : > { %2667 = vst [vmem:[#allocation2 + $0x8] sm:$0xff] %v2665_v17 }
 0x982 PF: > { %p3773_p1 = scmp.ne.s32.totalorder %s5079_s8, 0 }
 0x984   : > { %2671 = sbr.rel (%p3773_p1) target bundleno = 3028 (0xbd4), region = 120 }
 0x989   : > { %v3832_v12 = vld [vmem:[%s5064_s16 + $0x70] sm:$0xf]  ;;  %v4058_v30 = vld [vmem:[%s5064_s16 + $0x74] sm:$0xf0]  ;;  %v4057_v34 = vld [vmem:[%s5064_s16 + $0x74] sm:$0xf] }
 0x98a   : > { %v3833_v56 = vor.u32 %v4058_v30, %v3832_v12  ;;  %v3834_v21 = vld [vmem:[%s5064_s16 + $0x78] sm:$0xf0]  ;;  %v3824_v13 = vld [vmem:[%s5064_s16 + $0x60] sm:$0xf]  ;;  %v4056_v40 = vld [vmem:[%s5064_s16 + $0x64] sm:$0xf0] }
 0x98b   : > { %v3837_v15 = vor.u32 %v4057_v34, %v3834_v21  ;;  %v4055_v7 = vld [vmem:[%s5064_s16 + $0x64] sm:$0xf]  ;;  %v3826_v14 = vld [vmem:[%s5064_s16 + $0x68] sm:$0xf0]  ;;  %v3825_v38 = vor.u32 %v4056_v40, %v3824_v13  ;;  %v3816_v43 = vld [vmem:[%s5064_s16 + $0x50] sm:$0xf] }
 0x98c   : > { %2774 = vmatpush.bf16.msra.mxu0 %v3833_v56  ;;  %v3829_v37 = vor.u32 %v4055_v7, %v3826_v14  ;;  %v4054_v25 = vld [vmem:[%s5064_s16 + $0x54] sm:$0xf0]  ;;  %v4053_v61 = vld [vmem:[%s5064_s16 + $0x54] sm:$0xf]  ;;  %v3818_v58 = vld [vmem:[%s5064_s16 + $0x58] sm:$0xf0] }
 0x98d   : > { %2788 = vmatpush.bf16.msra.mxu1 %v3837_v15  ;;  %v3817_v32 = vor.u32 %v4054_v25, %v3816_v43  ;;  %v3821_v39 = vor.u32 %v4053_v61, %v3818_v58  ;;  %v3808_v59 = vld [vmem:[%s5064_s16 + $0x40] sm:$0xf]  ;;  %v4052_v51 = vld [vmem:[%s5064_s16 + $0x44] sm:$0xf0]  ;;  %v4051_v0 = vld [vmem:[%s5064_s16 + $0x44] sm:$0xf] }
 0x98e   : > { %v3810_v5 = vld [vmem:[%s5064_s16 + $0x48] sm:$0xf0]  ;;  %v4066_v6 = vld [vmem:[%s5070_s4 + $0x38] sm:$0xff]  ;;  %v3809_v35 = vor.u32 %v4052_v51, %v3808_v59  ;;  %v3800_v4 = vld [vmem:[%s5064_s16 + $0x30] sm:$0xf] }
 0x98f   : > { %v4074_v3 = vld [vmem:[%s5070_s4 + $0x78] sm:$0xff]  ;;  %v3813_v9 = vor.u32 %v4051_v0, %v3810_v5  ;;  %2937 = vmatpush.bf16.msra.mxu2 %v4066_v6  ;;  %v4065_v44 = vld [vmem:[%s5070_s4 + $0x30] sm:$0xff]  ;;  %v3792_v24 = vld [vmem:[%s5064_s16 + $0x20] sm:$0xf]  ;;  %v2840_v6 = vperm.slane %v5158_v33, 6 }
 0x990   : > { %2775 = vmatpush.bf16.msra.mxu0 %v3825_v38  ;;  %v4050_v55 = vld [vmem:[%s5064_s16 + $0x34] sm:$0xf0]  ;;  %v4049_v26 = vld [vmem:[%s5064_s16 + $0x34] sm:$0xf]  ;;  %v3802_v36 = vld [vmem:[%s5064_s16 + $0x38] sm:$0xf0]  ;;  %2951 = vmatpush.bf16.msra.mxu3 %v4074_v3 }
 0x991   : > { %2789 = vmatpush.bf16.msra.mxu1 %v3829_v37  ;;  %v4073_v23 = vld [vmem:[%s5070_s4 + $0x70] sm:$0xff]  ;;  %v3801_v53 = vor.u32 %v4050_v55, %v3800_v4  ;;  %v3805_v50 = vor.u32 %v4049_v26, %v3802_v36  ;;  %v4048_v41 = vld [vmem:[%s5064_s16 + $0x24] sm:$0xf0]  ;;  %v4047_v60 = vld [vmem:[%s5064_s16 + $0x24] sm:$0xf] }
 0x992   : > { %v4064_v18 = vld [vmem:[%s5070_s4 + $0x28] sm:$0xff]  ;;  %v3793_v16 = vor.u32 %v4048_v41, %v3792_v24  ;;  %v3784_v20 = vld [vmem:[%s5064_s16 + $0x10] sm:$0xf]  ;;  %v4046_v22 = vld [vmem:[%s5064_s16 + $0x14] sm:$0xf0] }
 0x993   : > { %2938 = vmatpush.bf16.msra.mxu2 %v4065_v44  ;;  %v3794_v47 = vld [vmem:[%s5064_s16 + $0x28] sm:$0xf0]  ;;  %v4063_v29 = vld [vmem:[%s5070_s4 + $0x20] sm:$0xff]  ;;  %v4045_v57 = vld [vmem:[%s5064_s16 + $0x14] sm:$0xf]  ;;  %v3785_v62 = vor.u32 %v4046_v22, %v3784_v20 }
 0x994   : > { %2776 = vmatpush.bf16.msra.mxu0 %v3817_v32  ;;  %2952 = vmatpush.bf16.msra.mxu3 %v4073_v23  ;;  %v4072_v8 = vld [vmem:[%s5070_s4 + $0x68] sm:$0xff]  ;;  %v3797_v10 = vor.u32 %v4047_v60, %v3794_v47  ;;  %v3786_v42 = vld [vmem:[%s5064_s16 + $0x18] sm:$0xf0]  ;;  %v4071_v48 = vld [vmem:[%s5070_s4 + $0x60] sm:$0xff] }
 0x995   : > { %2790 = vmatpush.bf16.msra.mxu1 %v3821_v39  ;;  %v3789_v54 = vor.u32 %v4045_v57, %v3786_v42  ;;  %v3776_v1 = vld [vmem:[%s5064_s16] sm:$0xf]  ;;  %v4044_v28 = vld [vmem:[%s5064_s16 + $0x4] sm:$0xf0]  ;;  %v4043_v11 = vld [vmem:[%s5064_s16 + $0x4] sm:$0xf] }
 0x996   : > { %v3778_v49 = vld [vmem:[%s5064_s16 + $0x8] sm:$0xf0]  ;;  %v3777_v31 = vor.u32 %v4044_v28, %v3776_v1  ;;  %v4062_v27 = vld [vmem:[%s5070_s4 + $0x18] sm:$0xff]  ;;  %v4061_v12 = vld [vmem:[%s5070_s4 + $0x10] sm:$0xff] }
 0x997   : > { %2939 = vmatpush.bf16.msra.mxu2 %v4064_v18  ;;  %v3781_v46 = vor.u32 %v4043_v11, %v3778_v49  ;;  %v4070_v17 = vld [vmem:[%s5070_s4 + $0x58] sm:$0xff]  ;;  %v4069_v30 = vld [vmem:[%s5070_s4 + $0x50] sm:$0xff]  ;;  %v4060_v34 = vld [vmem:[%s5070_s4 + $0x8] sm:$0xff]  ;;  %v3007_v49 = vperm.slane %v5158_v33, 7 }
 0x998   : > { %2777 = vmatpush.bf16.msra.mxu0 %v3809_v35  ;;  %2953 = vmatpush.bf16.msra.mxu3 %v4072_v8  ;;  %v4068_v56 = vld [vmem:[%s5070_s4 + $0x48] sm:$0xff]  ;;  %v4059_v21 = vld [vmem:[%s5070_s4] sm:$0xff]  ;;  %v2688_v40 = vld [vmem:[%s5097_s9] sm:$0x3] }
 0x999   : > { %2791 = vmatpush.bf16.msra.mxu1 %v3813_v9  ;;  %v4067_v13 = vld [vmem:[%s5070_s4 + $0x40] sm:$0xff]  ;;  %v2690_v7 = vperm.slane %v2688_v40, 0  ;;  %v2691_v14 = vperm.slane %v2688_v40, 1 }
 0x99b   : > { %2940 = vmatpush.bf16.msra.mxu2 %v4063_v29 }
 0x99c   : > { %2778 = vmatpush.bf16.msra.mxu0 %v3801_v53  ;;  %2954 = vmatpush.bf16.msra.mxu3 %v4071_v48 }
 0x99d   : > { %2792 = vmatpush.bf16.msra.mxu1 %v3805_v50 }
 0x99f   : > { %2941 = vmatpush.bf16.msra.mxu2 %v4062_v27  ;;  %v3010_v27 = vperm.slane %v5113_v45, 0 }
 0x9a0   : > { %2779 = vmatpush.bf16.msra.mxu0 %v3793_v16  ;;  %2955 = vmatpush.bf16.msra.mxu3 %v4070_v17 }
 0x9a1   : > { %2793 = vmatpush.bf16.msra.mxu1 %v3797_v10 }
 0x9a3   : > { %2942 = vmatpush.bf16.msra.mxu2 %v4061_v12 }
 0x9a4   : > { %2780 = vmatpush.bf16.msra.mxu0 %v3785_v62  ;;  %2956 = vmatpush.bf16.msra.mxu3 %v4069_v30 }
 0x9a5   : > { %2794 = vmatpush.bf16.msra.mxu1 %v3789_v54 }
 0x9a7   : > { %2943 = vmatpush.bf16.msra.mxu2 %v4060_v34 }
 0x9a8   : > { %2781 = vmatpush.bf16.msra.mxu0 %v3777_v31  ;;  %2957 = vmatpush.bf16.msra.mxu3 %v4068_v56 }
 0x9a9   : > { %2795 = vmatpush.bf16.msra.mxu1 %v3781_v46 }
 0x9ab   : > { %2782 = vmatmul.bf16.vlgmr.msra.gmra.mxu0 %v5450_v2  ;;  %2944 = vmatpush.bf16.msra.mxu2 %v4059_v21 }
 0x9ac   : > { %2796 = vmatmul.bf16.vlgmr.msra.gmra.mxu1 %v5450_v2  ;;  %2958 = vmatpush.bf16.msra.mxu3 %v4067_v13 }
 0xa28   : > { %v2783_v15 = vpop.f32.mrf.mxu0 }
 0xa29   : > { %v2797_v2 = vpop.f32.mrf.mxu1  ;;  %v2784_v38 = vadd.f32 %v2783_v15, %v2690_v7 }
 0xa2a   : > { %v2798_v37 = vadd.f32 %v2797_v2, %v2691_v14 }
 0xa2b   : > { %v2802_v32 = vmax.f32 %v2784_v38, 0.0 }
 0xa2c   : > { %v2803_v59 = vmax.f32 %v2798_v37, 0.0 }
 0xa30   : > { %v2785_v43 = vpop.f32.mrf.mxu0 }
 0xa31   : > { %v2786_v25 = vadd.f32 %v2785_v43, %v2690_v7  ;;  %v2799_v61 = vpop.f32.mrf.mxu1 }
 0xa32   : > { %v2800_v58 = vadd.f32 %v2799_v61, %v2691_v14 }
 0xa33   : > { %v2804_v39 = vmax.f32 %v2786_v25, 0.0 }
 0xa34   : > { %v2805_v51 = vmax.f32 %v2800_v58, 0.0 }
 0xa35   : > { %v2806_v0 = vpack.c.bf16 %v2804_v39, %v2802_v32 }
 0xa36   : > { %v2807_v5 = vpack.c.bf16 %v2805_v51, %v2803_v59 }
 0xa37   : > { %2945 = vmatmul.bf16.vlgmr.msra.gmra.mxu2 %v2806_v0 }
 0xa38   : > { %2959 = vmatmul.bf16.vlgmr.msra.gmra.mxu3 %v2807_v5 }
 0xaba   : > { %v2946_v35 = vpop.f32.mrf.mxu2 }
 0xabb   : > { %v2947_v3 = vadd.f32 %v2946_v35, %v2840_v6  ;;  %v2960_v9 = vpop.f32.mrf.mxu3 }
 0xabd   : > { %v2961_v4 = vadd.f32 %v2960_v9, %v2947_v3 }
 0xabf   : > { %v2965_v55 = vadd.f32 %v2961_v4, %v5444_v63 }
 0xac1   : > { %2967 = vadd.xlane.f32.xlu0 %v2965_v55 }
 0xac2   : > { %v2948_v44 = vpop.f32.mrf.mxu2 }
 0xac3   : > { %v2949_v26 = vadd.f32 %v2948_v44, %v2840_v6  ;;  %v2962_v36 = vpop.f32.mrf.mxu3 }
 0xac5   : > { %v2963_v23 = vadd.f32 %v2962_v36, %v2949_v26 }
 0xac7   : > { %v2966_v53 = vadd.f32 %v2963_v23, %v5446_v19 }
 0xac9   : > { %2969 = vadd.xlane.f32.xlu0 %v2966_v53 }
 0xb34   : > { %v2968_v50 = vpop.xlane.xlu0 %2967 }
 0xb35   : > { %v2971_v24 = vmul.f32 %v2968_v50, %v5435_v52 }
 0xb37   : > { %v2973_v41 = vsub.f32 %v2965_v55, %v2971_v24 }
 0xb39   : > { %v2975_v18 = vmul.f32 %v2973_v41, %v2973_v41 }
 0xb3b   : > { %2977 = vadd.xlane.f32.xlu1 %v2975_v18 }
 0xb3c   : > { %v2970_v60 = vpop.xlane.xlu0 %2969 }
 0xb3d   : > { %v2972_v47 = vmul.f32 %v2970_v60, %v5435_v52 }
 0xb3f   : > { %v2974_v8 = vsub.f32 %v2966_v53, %v2972_v47 }
 0xb41   : > { %v2976_v16 = vmul.f32 %v2974_v8, %v2974_v8 }
 0xb43   : > { %2979 = vadd.xlane.f32.xlu1 %v2976_v16 }
 0xbae   : > { %v2978_v63 = vpop.xlane.xlu1 %2977 }
 0xbaf   : > { %v2981_v10 = vmul.f32 %v2978_v63, %v5435_v52 }
 0xbb1   : > { %v2983_v20 = vadd.f32 1e-05, %v2981_v10 }
 0xbb3   : > { %4315 = vrsqrt.f32 %v2983_v20  ;;  %vm2991_vm6 = vweird.f32 %v2983_v20 }
 0xbb6   : > { %v2980_v22 = vpop.xlane.xlu1 %2979 }
 0xbb7   : > { %v2982_v19 = vmul.f32 %v2980_v22, %v5435_v52 }
 0xbb9   : > { %v4316_v29 = vpop.eup %4315  ;;  %v2984_v57 = vadd.f32 1e-05, %v2982_v19 }
 0xbba   : > { %v2986_v42 = vmul.f32 %v4316_v29, %v2983_v20  ;;  %vm2992_vm5 = vweird.f32 %v4316_v29 }
 0xbbb   : > { %4317 = vrsqrt.f32 %v2984_v57  ;;  %vm2993_vm7 = vmor %vm2991_vm6, %vm2992_vm5  ;;  %vm3001_vm9 = vweird.f32 %v2984_v57 }
 0xbbc   : > { %v2987_v48 = vmul.f32 %v4316_v29, %v2986_v42 }
 0xbbe   : > { %v2988_v62 = vmul.f32 0.5, %v2987_v48 }
 0xbc0   : > { %v2989_v54 = vsub.f32 1.5, %v2988_v62 }
 0xbc1   : > { %v4318_v1 = vpop.eup %4317 }
 0xbc2   : > { %v2990_v28 = vmul.f32 %v4316_v29, %v2989_v54  ;;  %v2996_v11 = vmul.f32 %v4318_v1, %v2984_v57  ;;  %vm3002_vm8 = vweird.f32 %v4318_v1 }
 0xbc3   : > { %vm3003_vm10 = vmor %vm3001_vm9, %vm3002_vm8 }
 0xbc4   : > { %v2994_v31 = vsel %vm2993_vm7, %v4316_v29, %v2990_v28  ;;  %v2997_v46 = vmul.f32 %v4318_v1, %v2996_v11 }
 0xbc5   : > { %v3005_v52 = vmul.f32 %v2994_v31, %v2973_v41 }
 0xbc6   : > { %v2998_v17 = vmul.f32 0.5, %v2997_v46 }
 0xbc7   : > { %v3008_v12 = vmul.f32 %v3007_v49, %v3005_v52 }
 0xbc8   : > { %v2999_v30 = vsub.f32 1.5, %v2998_v17 }
 0xbc9   : > { %v3011_v34 = vadd.f32 %v3010_v27, %v3008_v12 }
 0xbca   : > { %v3000_v56 = vmul.f32 %v4318_v1, %v2999_v30 }
 0xbcb   : > { %3013 = vst [vmem:[#allocation2] sm:$0xff] %v3011_v34 }
 0xbcc   : > { %v3004_v21 = vsel %vm3003_vm10, %v4318_v1, %v3000_v56 }
 0xbcd   : > { %v3006_v13 = vmul.f32 %v3004_v21, %v2974_v8 }
 0xbcf   : > { %v3009_v40 = vmul.f32 %v3007_v49, %v3006_v13 }
 0xbd1   : > { %v3012_v15 = vadd.f32 %v3010_v27, %v3009_v40 }
 0xbd3   : > { %3014 = vst [vmem:[#allocation2 + $0x8] sm:$0xff] %v3012_v15 }
 0xbd4 PF: > { %p3902_p8 = scmp.ne.s32.totalorder %s4804_s22, 7 }
 0xbd5   : > { %s6157_s3 = sld [smem:[#allocation48_spill]] (!%p3902_p8) }
 0xbd6   : > { %3018 = sbr.rel (%p3902_p8) target bundleno = 3201 (0xc81), region = 124  ;;  %s6158_s20 = sld [smem:[#allocation49_spill]] (!%p3902_p8) }
 0xbdb   : > { %v4082_v45 = vld [vmem:[%s6157_s3 + $0x38] sm:$0xff]  ;;  %v4081_v33 = vld [vmem:[%s6157_s3 + $0x30] sm:$0xff]  ;;  %v3019_v2 = vld [vmem:[#allocation2] sm:$0xff]  ;;  %vm3033_vm11 = vcmask 1040384  }
 0xbdc   : > { %3104 = vmatpush.bf16.msra.mxu0 %v4082_v45  ;;  %v3020_v7 = vld [vmem:[#allocation2 + $0x8] sm:$0xff]  ;;  %v3021_v14 = vrot.slane %v3019_v2, 4  ;;  %v4079_v61 = vld [vmem:[%s6157_s3 + $0x20] sm:$0xff]  ;;  %v4078_v39 = vld [vmem:[%s6157_s3 + $0x18] sm:$0xff] }
 0xbdd   : > { %v3027_v38 = vrot.slane %v3020_v7, 4  ;;  %v4080_v37 = vld [vmem:[%s6157_s3 + $0x28] sm:$0xff]  ;;  %v4077_v0 = vld [vmem:[%s6157_s3 + $0x10] sm:$0xff]  ;;  %v4075_v4 = vld [vmem:[%s6157_s3] sm:$0xff] }
 0xbde   : > { %v3022_v43 = vmax.f32 %v3019_v2, %v3021_v14  ;;  %v4076_v35 = vld [vmem:[%s6157_s3 + $0x8] sm:$0xff]  ;;  %v4319_v26 = vld [vmem:[%s6158_s20] ss:$0 sm:$0xff] }
 0xbdf   : > { %v3028_v25 = vmax.f32 %v3020_v7, %v3027_v38 }
 0xbe0   : > { %3105 = vmatpush.bf16.msra.mxu0 %v4081_v33  ;;  %v3023_v58 = vrot.slane %v3022_v43, 2 }
 0xbe1   : > { %v3029_v32 = vrot.slane %v3028_v25, 2 }
 0xbe2   : > { %v3024_v59 = vmax.f32 %v3022_v43, %v3023_v58 }
 0xbe3   : > { %v3030_v51 = vmax.f32 %v3028_v25, %v3029_v32 }
 0xbe4   : > { %3106 = vmatpush.bf16.msra.mxu0 %v4080_v37  ;;  %v3025_v5 = vrot.slane %v3024_v59, 1 }
 0xbe5   : > { %v3031_v6 = vrot.slane %v3030_v51, 1 }
 0xbe6   : > { %v3026_v3 = vmax.f32 %v3024_v59, %v3025_v5 }
 0xbe7   : > { %v3032_v9 = vmax.f32 %v3030_v51, %v3031_v6 }
 0xbe8   : > { %3107 = vmatpush.bf16.msra.mxu0 %v4079_v61 }
 0xbe9   : > { %v3034_v55 = vsel %vm3033_vm11, %v3026_v3, %v3032_v9 }
 0xbea   : > { %v3035_v44 = vpack.c.bf16 %v3034_v55, %v3034_v55 }
 0xbec   : > { %3108 = vmatpush.bf16.msra.mxu0 %v4078_v39 }
 0xbf0   : > { %3109 = vmatpush.bf16.msra.mxu0 %v4077_v0 }
 0xbf4   : > { %3110 = vmatpush.bf16.msra.mxu0 %v4076_v35 }
 0xbf8   : > { %3111 = vmatpush.bf16.msra.mxu0 %v4075_v4 }
 0xbfb   : > { %3112 = vmatmul.bf16.vlgmr.msra.gmra.mxu0 %v3035_v44 }
 0xc78   : > { %v3113_v36 = vpop.f32.mrf.mxu0 }
 0xc79   : > { %v3114_v23 = vadd.f32 %v4319_v26, %v3113_v36 }
 0xc7b   : > { %3117 = vst [vmem:[#allocation16] sm:$0x3] %v3114_v23 }
 0xc80   : > { %v3115_v53 = vpop.f32.mrf.mxu0 }
 0xc81 PF: > { %p4123_p4 = scmp.eq.s32.totalorder %s4804_s22, 7  ;;  %s4661_s1 = smov [#allocation16]  }
 0xc82   : > { %s3124_s11 = sshll.u32 %s4661_s1, 4  ;;  %s6159_s10 = sld [smem:[#allocation50_spill]]  ;;  %s3125_s11 = int_to_ptr.vmem [resolvable:$true] %s3124_s11 }
 0xc88   : > { %s3126_s26 = sshll.u32 %s6159_s10, 4  ;;  %s3127_s26 = int_to_ptr.hbm [resolvable:$true] %s3126_s26 }
 0xc89   : > { %4100 = dma.vmem_to_hbm [thread:$0]  (%p4123_p4), %s3125_s11, 32, %s3127_s26, [#allocation7]  }
 0xc8a   : > { %4607 = dma.done.wait (%p4123_p4), [#allocation7], 32  }
 0xc8b   : > { %4609 = vsyncadd (%p4123_p4), [#allocation7], 4294967264 }
 0xc8c PF: > { %s6160_s30 = sld [smem:[#allocation25_spill]]  ;;  %p45_p5 = scmp.ge.s32.totalorder %s4807_s23, 10  }
 0xc8d   : > { %s6161_s4 = sld [smem:[#allocation26_spill]]  ;;  %s6166_s28 = smov %s4616_s29 }
 0xc8e   : > { %s6162_s18 = sld [smem:[#allocation33_spill]]  ;;  %s6167_s29 = smov %s4620_s0 }
 0xc8f   : > { %s6163_s19 = sld [smem:[#allocation27_spill]]  ;;  %s6168_s0 = smov %s4987_s5 }
 0xc90   : > { %s6164_s1 = sld [smem:[#allocation28_spill]]  ;;  %s6169_s21 = smov %s4807_s23 }
 0xc91   : > { %s6165_s20 = sld [smem:[#allocation29_spill]]  ;;  %47 = sbr.rel (!%p45_p5) target bundleno = 41 (0x29), region = 208 }
 0xc96   :  { %3140 = vsyncpa [#allocation6], 1 }
 0xc97   :  { %3142 = vsyncpa [#allocation6 + $0x1], 1 }
 0xc98   :  { %3143 = vsyncpa [#allocation9], 1 }
 0xc99   :  { %3145 = vsyncpa [#allocation9 + $0x1], 1 }
 0xc9a   :  { %3146 = vsyncpa [#allocation12], 1 }
 0xc9b   :  { %3148 = vsyncpa [#allocation12 + $0x1], 1 }
 0xc9c   :  { %3149 = vsyncpa [#allocation15], 1 }
 0xc9d   :  { %3151 = vsyncpa [#allocation15 + $0x1], 1 }
 0xc9e   :  { %3152 = vsyncpa [#allocation7], 1 }
 0xc9f   :  { %3154 = vsyncpa [#allocation7 + $0x1], 1 }

</bundles_post_ra>
